<compile_context>
chip_gen: v6e
topology: v6e:2x2x1
jax: 0.10.0
libtpu: 0.0.40
codegen_flags: <defaults>
</compile_context>

<pallas_src>
import functools

import jax
import jax.numpy as jnp
from jax import lax
from jax.experimental import pallas as pl
from jax.experimental.pallas import tpu as pltpu


# ----------------------------------------------------------------------------
# Kernel: one grid step == Bt batch elements.
# ----------------------------------------------------------------------------
def _mdgcrn_cell_kernel(xe_ref, st_ref, ed_ref, es_ref,
                        wg_xe_ref, wg_s_ref, bg_ref,
                        wu_xe_ref, wu_s_ref, bu_ref,
                        h_ref, *, cheb_k, hidden_dim, embed_dim):
    f32 = jnp.float32
    xe = xe_ref[...]            # [Bt, N, Din + 2E]   ([x | e_dyn], pre-concat)
    st = st_ref[...]            # [Bt, N, H]
    ed = ed_ref[...]            # [Bt, N, 2E]
    es = es_ref[...]            # [N, E]
    bg = bg_ref[...]            # [N, 2H]
    bu = bu_ref[...]            # [N, H]

    bt, n_nodes, _ = xe.shape
    h_dim = hidden_dim
    e_dim = embed_dim
    m_rows = bt * n_nodes

    # ---- dynamic adjacency: softmax(relu(E_d @ E_d^T)) per batch -------------
    # contract last dims of both operands (no explicit transpose), batch dim 0.
    logits = lax.dot_general(ed, ed, (((2,), (2,)), ((0,), (0,))),
                             preferred_element_type=f32)       # [Bt, N, N]
    logits = jnp.maximum(logits, 0.0)
    mx = jnp.max(logits, axis=-1, keepdims=True)
    ex = jnp.exp(logits - mx)
    row_sum = jnp.sum(ex, axis=-1, keepdims=True)
    # Exact normalization (approx reciprocal caused >5e-3 end-to-end error).
    adj = ex / row_sum                                          # [Bt, N, N]

    # ---- Chebyshev supports T1..T(K-1); T0 = I handled implicitly ------------
    supports = []
    if cheb_k > 1:
        supports.append(adj)
    for k in range(2, cheb_k):
        prev2 = (jnp.broadcast_to(jnp.eye(n_nodes, dtype=f32),
                                  (bt, n_nodes, n_nodes))
                 if k == 2 else supports[-2])
        nxt = 2.0 * lax.dot_general(adj, supports[-1],
                                    (((2,), (1,)), ((0,), (0,))),
                                    preferred_element_type=f32) - prev2
        supports.append(nxt)

    def graph_agg(feat):
        """[Bt, N, w] -> list (len cheb_k) of [Bt*N, w]: T_k applied per batch."""
        width = feat.shape[-1]
        outs = [feat.reshape(m_rows, width)]                    # T0 = I
        for s in supports:
            t = lax.dot_general(s, feat, (((2,), (1,)), ((0,), (0,))),
                                preferred_element_type=f32)
            outs.append(t.reshape(m_rows, width))
        return outs

    def e_contract(y2, out_dim):
        """Per-node contraction over the embed dim.

        y2: [Bt*N, E*out_dim] with column index d*out_dim + o.
        returns [Bt, N, out_dim] = sum_d E_static[n, d] * y[b, n, d, :].
        """
        y3 = y2.reshape(bt, n_nodes, e_dim * out_dim)
        acc = es[None, :, 0:1] * y3[:, :, 0:out_dim]
        for d in range(1, e_dim):
            acc = acc + es[None, :, d:d + 1] * y3[:, :, d * out_dim:(d + 1) * out_dim]
        return acc

    # ---- gate + shared projections (MXU matmuls) ------------------------------
    agg_xe = graph_agg(xe)      # reused by both gate and candidate
    agg_s = graph_agg(st)       # gate only (candidate uses z * state)

    y_g = None                  # [Bt*N, E*2H]
    y_u = None                  # [Bt*N, E*H]
    for k in range(cheb_k):
        pg = (jnp.dot(agg_xe[k], wg_xe_ref[k], preferred_element_type=f32)
              + jnp.dot(agg_s[k], wg_s_ref[k], preferred_element_type=f32))
        pu = jnp.dot(agg_xe[k], wu_xe_ref[k], preferred_element_type=f32)
        y_g = pg if y_g is None else y_g + pg
        y_u = pu if y_u is None else y_u + pu

    zr = jax.nn.sigmoid(e_contract(y_g, 2 * h_dim) + bg[None, :, :])  # [Bt,N,2H]
    z = zr[:, :, :h_dim]
    r = zr[:, :, h_dim:]

    # ---- candidate (only the state group changes: z * state) ------------------
    agg_zs = graph_agg(z * st)
    for k in range(cheb_k):
        y_u = y_u + jnp.dot(agg_zs[k], wu_s_ref[k], preferred_element_type=f32)

    hc = jnp.tanh(e_contract(y_u, h_dim) + bu[None, :, :])            # [Bt,N,H]

    # ---- GRU update ------------------------------------------------------------
    h_ref[...] = r * st + (1.0 - r) * hc


# ----------------------------------------------------------------------------
# Wrapper: weight-pool re-layout (plain JAX, done once) + pallas_call.
# ----------------------------------------------------------------------------
def mdgcrn_cell(x, state, node_embeddings, params, *, cheb_k, batch_block=None):
    e_dyn, e_static = node_embeddings           # [B,N,2E], [N,E]
    wpool_g, bpool_g, wpool_u, bpool_u = params

    B, N, Din = x.shape
    H = state.shape[-1]
    E = e_static.shape[-1]
    two_e = e_dyn.shape[-1]
    assert two_e == 2 * E
    assert cheb_k >= 1

    if batch_block is None:
        batch_block = 1
        for cand in (8, 4, 2):
            if B % cand == 0:
                batch_block = cand
                break
    assert B % batch_block == 0
    Bt = batch_block

    # "static" feature group [x | e_dyn] shared by the gate and candidate inputs.
    xe = jnp.concatenate([x, e_dyn], axis=-1)            # [B, N, Din + 2E]

    def split_pool(wpool):
        # wpool: [E, K, Cin, O] with Cin ordered as [x | state | e_dyn].
        out_dim = wpool.shape[-1]
        w_x = wpool[:, :, :Din, :]
        w_s = wpool[:, :, Din:Din + H, :]
        w_e = wpool[:, :, Din + H:, :]
        w_xe = jnp.concatenate([w_x, w_e], axis=2)        # [E, K, Din+2E, O]
        # -> [K, width, E*O]  (column index = d*O + o), one MXU matmul per (k, group)
        w_xe = jnp.transpose(w_xe, (1, 2, 0, 3)).reshape(cheb_k, Din + two_e,
                                                         E * out_dim)
        w_s = jnp.transpose(w_s, (1, 2, 0, 3)).reshape(cheb_k, H, E * out_dim)
        return w_xe, w_s

    wg_xe, wg_s = split_pool(wpool_g)                    # O = 2H
    wu_xe, wu_s = split_pool(wpool_u)                    # O = H
    bg = e_static @ bpool_g                              # [N, 2H]
    bu = e_static @ bpool_u                              # [N, H]

    Cin = Din + H + two_e
    flops = (2 * B * N * N * two_e
             + 2 * B * N * N * N * max(cheb_k - 2, 0)
             + 2 * B * N * N * max(cheb_k - 1, 0) * (Din + two_e + 2 * H)
             + 2 * B * N * cheb_k * Cin * E * 3 * H
             + 2 * B * N * E * 3 * H
             + 6 * B * N * H)
    transcendentals = B * N * N + 3 * B * N * H
    bytes_accessed = 4 * (xe.size + state.size + e_dyn.size + B * N * H
                          + e_static.size + wg_xe.size + wg_s.size + bg.size
                          + wu_xe.size + wu_s.size + bu.size)

    kernel = functools.partial(_mdgcrn_cell_kernel, cheb_k=cheb_k,
                               hidden_dim=H, embed_dim=E)

    return pl.pallas_call(
        kernel,
        out_shape=jax.ShapeDtypeStruct((B, N, H), jnp.float32),
        grid=(B // Bt,),
        in_specs=[
            pl.BlockSpec((Bt, N, Din + two_e), lambda b: (b, 0, 0)),      # [x|e_dyn]
            pl.BlockSpec((Bt, N, H),           lambda b: (b, 0, 0)),      # state
            pl.BlockSpec((Bt, N, two_e),       lambda b: (b, 0, 0)),      # e_dyn
            pl.BlockSpec((N, E),               lambda b: (0, 0)),         # e_static
            pl.BlockSpec((cheb_k, Din + two_e, E * 2 * H), lambda b: (0, 0, 0)),
            pl.BlockSpec((cheb_k, H,           E * 2 * H), lambda b: (0, 0, 0)),
            pl.BlockSpec((N, 2 * H),           lambda b: (0, 0)),         # gate bias
            pl.BlockSpec((cheb_k, Din + two_e, E * H),     lambda b: (0, 0, 0)),
            pl.BlockSpec((cheb_k, H,           E * H),     lambda b: (0, 0, 0)),
            pl.BlockSpec((N, H),               lambda b: (0, 0)),         # update bias
        ],
        out_specs=pl.BlockSpec((Bt, N, H), lambda b: (b, 0, 0)),
        compiler_params=pltpu.CompilerParams(
            dimension_semantics=("parallel",),
            vmem_limit_bytes=32 * 1024 * 1024),
        cost_estimate=pl.CostEstimate(flops=int(flops),
                                      transcendentals=int(transcendentals),
                                      bytes_accessed=int(bytes_accessed)),
    )(xe, state, e_dyn, e_static, wg_xe, wg_s, bg, wu_xe, wu_s, bu)


# ----------------------------------------------------------------------------
# Pure-JAX reference (same math) for correctness checking.
# ----------------------------------------------------------------------------
def mdgcrn_cell_ref(x, state, node_embeddings, params, *, cheb_k):
    e_dyn, e_static = node_embeddings
    wpool_g, bpool_g, wpool_u, bpool_u = params
    B, N, _ = x.shape
    H = state.shape[-1]

    logits = jnp.maximum(jnp.einsum('bnd,bmd->bnm', e_dyn, e_dyn), 0.0)
    adj = jax.nn.softmax(logits, axis=-1)                     # [B, N, N]
    eye = jnp.broadcast_to(jnp.eye(N, dtype=x.dtype), (B, N, N))
    support_set = [eye, adj]
    for _ in range(2, cheb_k):
        support_set.append(2.0 * jnp.einsum('bnm,bmk->bnk', adj,
                                            support_set[-1]) - support_set[-2])
    supports = jnp.stack(support_set[:max(cheb_k, 1)], axis=1)  # [B, K, N, N]

    def dgcc(feat, wpool, bpool):
        xg = jnp.einsum('bknm,bmc->bnkc', supports, feat)       # [B,N,K,C]
        w = jnp.einsum('nd,dkio->nkio', e_static, wpool)
        b = e_static @ bpool
        return jnp.einsum('bnki,nkio->bno', xg, w) + b

    cat1 = jnp.concatenate([x, state, e_dyn], axis=-1)
    zr = jax.nn.sigmoid(dgcc(cat1, wpool_g, bpool_g))
    z, r = zr[..., :H], zr[..., H:]
    cat2 = jnp.concatenate([x, z * state, e_dyn], axis=-1)
    hc = jnp.tanh(dgcc(cat2, wpool_u, bpool_u))
    return r * state + (1.0 - r) * hc


if __name__ == "__main__":
    # small shapes consistent with the module
    B, N = 8, 16
    dim_in, dim_out = 2, 64          # dim_out == hidden_dim
    cheb_k, embed_dim = 2, 8
    Cin = dim_in + dim_out + 2 * embed_dim

    key = jax.random.PRNGKey(0)
    ks = jax.random.split(key, 8)
    x = jax.random.normal(ks[0], (B, N, dim_in), jnp.float32)
    state = jax.random.normal(ks[1], (B, N, dim_out), jnp.float32)
    e_dyn = jax.random.normal(ks[2], (B, N, 2 * embed_dim), jnp.float32) * 0.5
    e_static = jax.random.normal(ks[3], (N, embed_dim), jnp.float32) * 0.5

    # deterministic parameter init (shapes from DGCC.__init__)
    wpool_g = jax.random.normal(ks[4], (embed_dim, cheb_k, Cin, 2 * dim_out),
                                jnp.float32) * 0.1
    bpool_g = jax.random.normal(ks[5], (embed_dim, 2 * dim_out),
                                jnp.float32) * 0.1
    wpool_u = jax.random.normal(ks[6], (embed_dim, cheb_k, Cin, dim_out),
                                jnp.float32) * 0.1
    bpool_u = jax.random.normal(ks[7], (embed_dim, dim_out),
                                jnp.float32) * 0.1
    params = (wpool_g, bpool_g, wpool_u, bpool_u)
    node_embeddings = (e_dyn, e_static)

    h = mdgcrn_cell(x, state, node_embeddings, params, cheb_k=cheb_k,
                    batch_block=4)
    h = jax.block_until_ready(h)

    h_ref = mdgcrn_cell_ref(x, state, node_embeddings, params, cheb_k=cheb_k)
    assert h.shape == (B, N, dim_out)
    max_err = float(jnp.max(jnp.abs(h - h_ref)))
    assert jnp.allclose(h, h_ref, atol=2e-3, rtol=2e-3), max_err
    print("KERNEL_OK")
</pallas_src>

<mosaic_0001>
module attributes {stable_mosaic.version = 11 : i64} {
  func.func @_mdgcrn_cell_kernel(%arg0: i32, %arg1: memref<4x16x18xf32, #tpu.memory_space<vmem>>, %arg2: memref<4x16x64xf32, #tpu.memory_space<vmem>>, %arg3: memref<4x16x16xf32, #tpu.memory_space<vmem>>, %arg4: memref<16x8xf32, #tpu.memory_space<vmem>>, %arg5: memref<2x18x1024xf32, #tpu.memory_space<vmem>>, %arg6: memref<2x64x1024xf32, #tpu.memory_space<vmem>>, %arg7: memref<16x128xf32, #tpu.memory_space<vmem>>, %arg8: memref<2x18x512xf32, #tpu.memory_space<vmem>>, %arg9: memref<2x64x512xf32, #tpu.memory_space<vmem>>, %arg10: memref<16x64xf32, #tpu.memory_space<vmem>>, %arg11: memref<4x16x64xf32, #tpu.memory_space<vmem>>) attributes {dimension_semantics = [#tpu.dimension_semantics<parallel>], iteration_bounds = array<i64: 2>, scalar_prefetch = 0 : i64, scratch_operands = 0 : i64, tpu.core_type = #tpu.core_type<tc>, window_params = [{transform_indices = @transform_0, window_bounds = array<i64: 4, 16, 18>}, {transform_indices = @transform_1, window_bounds = array<i64: 4, 16, 64>}, {transform_indices = @transform_2, window_bounds = array<i64: 4, 16, 16>}, {pipeline_mode = #tpu.pipeline_mode<synchronous>, transform_indices = @transform_3, window_bounds = array<i64: 16, 8>}, {pipeline_mode = #tpu.pipeline_mode<synchronous>, transform_indices = @transform_4, window_bounds = array<i64: 2, 18, 1024>}, {pipeline_mode = #tpu.pipeline_mode<synchronous>, transform_indices = @transform_5, window_bounds = array<i64: 2, 64, 1024>}, {pipeline_mode = #tpu.pipeline_mode<synchronous>, transform_indices = @transform_6, window_bounds = array<i64: 16, 128>}, {pipeline_mode = #tpu.pipeline_mode<synchronous>, transform_indices = @transform_7, window_bounds = array<i64: 2, 18, 512>}, {pipeline_mode = #tpu.pipeline_mode<synchronous>, transform_indices = @transform_8, window_bounds = array<i64: 2, 64, 512>}, {pipeline_mode = #tpu.pipeline_mode<synchronous>, transform_indices = @transform_9, window_bounds = array<i64: 16, 64>}, {transform_indices = @transform_10, window_bounds = array<i64: 4, 16, 64>}]} {
    %c0 = arith.constant 0 : index
    %c0_0 = arith.constant 0 : index
    %c0_1 = arith.constant 0 : index
    %0 = vector.load %arg1[%c0, %c0_0, %c0_1] : memref<4x16x18xf32, #tpu.memory_space<vmem>>, vector<4x16x18xf32>
    %c0_2 = arith.constant 0 : index
    %c0_3 = arith.constant 0 : index
    %c0_4 = arith.constant 0 : index
    %1 = vector.load %arg2[%c0_2, %c0_3, %c0_4] : memref<4x16x64xf32, #tpu.memory_space<vmem>>, vector<4x16x64xf32>
    %c0_5 = arith.constant 0 : index
    %c0_6 = arith.constant 0 : index
    %c0_7 = arith.constant 0 : index
    %2 = vector.load %arg3[%c0_5, %c0_6, %c0_7] : memref<4x16x16xf32, #tpu.memory_space<vmem>>, vector<4x16x16xf32>
    %c0_8 = arith.constant 0 : index
    %c0_9 = arith.constant 0 : index
    %3 = vector.load %arg4[%c0_8, %c0_9] : memref<16x8xf32, #tpu.memory_space<vmem>>, vector<16x8xf32>
    %c0_10 = arith.constant 0 : index
    %c0_11 = arith.constant 0 : index
    %4 = vector.load %arg7[%c0_10, %c0_11] : memref<16x128xf32, #tpu.memory_space<vmem>>, vector<16x128xf32>
    %c0_12 = arith.constant 0 : index
    %c0_13 = arith.constant 0 : index
    %5 = vector.load %arg10[%c0_12, %c0_13] : memref<16x64xf32, #tpu.memory_space<vmem>>, vector<16x64xf32>
    %cst = arith.constant dense<0.000000e+00> : vector<4x16x16xf32>
    %6 = tpu.matmul %2, %2, %cst {dimension_numbers = #tpu.dot_dimension_numbers<[2], [2], [1], [1], [0, 0, 0, 1, 1, 1], [0], [0]>} : vector<4x16x16xf32>, vector<4x16x16xf32>, vector<4x16x16xf32> -> vector<4x16x16xf32>
    %cst_14 = arith.constant 0.000000e+00 : f32
    %7 = vector.broadcast %cst_14 : f32 to vector<4x16x16xf32>
    %8 = arith.maximumf %6, %7 : vector<4x16x16xf32>
    %cst_15 = arith.constant dense<0xFF800000> : vector<4x16xf32>
    %9 = vector.multi_reduction <maximumf>, %8, %cst_15 [2] : vector<4x16x16xf32> to vector<4x16xf32>
    %10 = vector.shape_cast %9 : vector<4x16xf32> to vector<4x16x1xf32>
    %11 = vector.broadcast %10 : vector<4x16x1xf32> to vector<4x16x16xf32>
    %12 = arith.subf %8, %11 : vector<4x16x16xf32>
    %13 = math.exp %12 : vector<4x16x16xf32>
    %cst_16 = arith.constant dense<0.000000e+00> : vector<4x16xf32>
    %14 = vector.multi_reduction <add>, %13, %cst_16 [2] : vector<4x16x16xf32> to vector<4x16xf32>
    %15 = vector.shape_cast %14 : vector<4x16xf32> to vector<4x16x1xf32>
    %16 = vector.broadcast %15 : vector<4x16x1xf32> to vector<4x16x16xf32>
    %17 = arith.divf %13, %16 : vector<4x16x16xf32>
    %18 = vector.shape_cast %0 : vector<4x16x18xf32> to vector<64x18xf32>
    %cst_17 = arith.constant dense<0.000000e+00> : vector<4x16x18xf32>
    %19 = tpu.matmul %17, %0, %cst_17 {dimension_numbers = #tpu.dot_dimension_numbers<[2], [1], [1], [2], [0, 0, 0, 1, 1, 2], [0], [0]>} : vector<4x16x16xf32>, vector<4x16x18xf32>, vector<4x16x18xf32> -> vector<4x16x18xf32>
    %20 = vector.shape_cast %19 : vector<4x16x18xf32> to vector<64x18xf32>
    %21 = vector.shape_cast %1 : vector<4x16x64xf32> to vector<64x64xf32>
    %cst_18 = arith.constant dense<0.000000e+00> : vector<4x16x64xf32>
    %22 = tpu.matmul %17, %1, %cst_18 {dimension_numbers = #tpu.dot_dimension_numbers<[2], [1], [1], [2], [0, 0, 0, 1, 1, 2], [0], [0]>} : vector<4x16x16xf32>, vector<4x16x64xf32>, vector<4x16x64xf32> -> vector<4x16x64xf32>
    %23 = vector.shape_cast %22 : vector<4x16x64xf32> to vector<64x64xf32>
    %c0_19 = arith.constant 0 : index
    %c0_20 = arith.constant 0 : index
    %c0_21 = arith.constant 0 : index
    %24 = vector.load %arg5[%c0_19, %c0_20, %c0_21] : memref<2x18x1024xf32, #tpu.memory_space<vmem>>, vector<1x18x1024xf32>
    %25 = vector.shape_cast %24 : vector<1x18x1024xf32> to vector<18x1024xf32>
    %cst_22 = arith.constant dense<0.000000e+00> : vector<64x1024xf32>
    %26 = tpu.matmul %18, %25, %cst_22 {dimension_numbers = #tpu.dot_dimension_numbers<[1], [0], [0], [1], [0, 0, 1, 1], [], []>} : vector<64x18xf32>, vector<18x1024xf32>, vector<64x1024xf32> -> vector<64x1024xf32>
    %c0_23 = arith.constant 0 : index
    %c0_24 = arith.constant 0 : index
    %c0_25 = arith.constant 0 : index
    %27 = vector.load %arg6[%c0_23, %c0_24, %c0_25] : memref<2x64x1024xf32, #tpu.memory_space<vmem>>, vector<1x64x1024xf32>
    %28 = vector.shape_cast %27 : vector<1x64x1024xf32> to vector<64x1024xf32>
    %cst_26 = arith.constant dense<0.000000e+00> : vector<64x1024xf32>
    %29 = tpu.matmul %21, %28, %cst_26 {dimension_numbers = #tpu.dot_dimension_numbers<[1], [0], [0], [1], [0, 0, 1, 1], [], []>} : vector<64x64xf32>, vector<64x1024xf32>, vector<64x1024xf32> -> vector<64x1024xf32>
    %30 = arith.addf %26, %29 : vector<64x1024xf32>
    %c0_27 = arith.constant 0 : index
    %c0_28 = arith.constant 0 : index
    %c0_29 = arith.constant 0 : index
    %31 = vector.load %arg8[%c0_27, %c0_28, %c0_29] : memref<2x18x512xf32, #tpu.memory_space<vmem>>, vector<1x18x512xf32>
    %32 = vector.shape_cast %31 : vector<1x18x512xf32> to vector<18x512xf32>
    %cst_30 = arith.constant dense<0.000000e+00> : vector<64x512xf32>
    %33 = tpu.matmul %18, %32, %cst_30 {dimension_numbers = #tpu.dot_dimension_numbers<[1], [0], [0], [1], [0, 0, 1, 1], [], []>} : vector<64x18xf32>, vector<18x512xf32>, vector<64x512xf32> -> vector<64x512xf32>
    %c1 = arith.constant 1 : index
    %c0_31 = arith.constant 0 : index
    %c0_32 = arith.constant 0 : index
    %34 = vector.load %arg5[%c1, %c0_31, %c0_32] : memref<2x18x1024xf32, #tpu.memory_space<vmem>>, vector<1x18x1024xf32>
    %35 = vector.shape_cast %34 : vector<1x18x1024xf32> to vector<18x1024xf32>
    %cst_33 = arith.constant dense<0.000000e+00> : vector<64x1024xf32>
    %36 = tpu.matmul %20, %35, %cst_33 {dimension_numbers = #tpu.dot_dimension_numbers<[1], [0], [0], [1], [0, 0, 1, 1], [], []>} : vector<64x18xf32>, vector<18x1024xf32>, vector<64x1024xf32> -> vector<64x1024xf32>
    %c1_34 = arith.constant 1 : index
    %c0_35 = arith.constant 0 : index
    %c0_36 = arith.constant 0 : index
    %37 = vector.load %arg6[%c1_34, %c0_35, %c0_36] : memref<2x64x1024xf32, #tpu.memory_space<vmem>>, vector<1x64x1024xf32>
    %38 = vector.shape_cast %37 : vector<1x64x1024xf32> to vector<64x1024xf32>
    %cst_37 = arith.constant dense<0.000000e+00> : vector<64x1024xf32>
    %39 = tpu.matmul %23, %38, %cst_37 {dimension_numbers = #tpu.dot_dimension_numbers<[1], [0], [0], [1], [0, 0, 1, 1], [], []>} : vector<64x64xf32>, vector<64x1024xf32>, vector<64x1024xf32> -> vector<64x1024xf32>
    %40 = arith.addf %36, %39 : vector<64x1024xf32>
    %c1_38 = arith.constant 1 : index
    %c0_39 = arith.constant 0 : index
    %c0_40 = arith.constant 0 : index
    %41 = vector.load %arg8[%c1_38, %c0_39, %c0_40] : memref<2x18x512xf32, #tpu.memory_space<vmem>>, vector<1x18x512xf32>
    %42 = vector.shape_cast %41 : vector<1x18x512xf32> to vector<18x512xf32>
    %cst_41 = arith.constant dense<0.000000e+00> : vector<64x512xf32>
    %43 = tpu.matmul %20, %42, %cst_41 {dimension_numbers = #tpu.dot_dimension_numbers<[1], [0], [0], [1], [0, 0, 1, 1], [], []>} : vector<64x18xf32>, vector<18x512xf32>, vector<64x512xf32> -> vector<64x512xf32>
    %44 = arith.addf %30, %40 : vector<64x1024xf32>
    %45 = arith.addf %33, %43 : vector<64x512xf32>
    %46 = vector.shape_cast %44 : vector<64x1024xf32> to vector<4x16x1024xf32>
    %47 = vector.extract_strided_slice %3 {offsets = [0, 0], sizes = [16, 1], strides = [1, 1]} : vector<16x8xf32> to vector<16x1xf32>
    %48 = vector.shape_cast %47 : vector<16x1xf32> to vector<1x16x1xf32>
    %49 = vector.extract_strided_slice %46 {offsets = [0, 0, 0], sizes = [4, 16, 128], strides = [1, 1, 1]} : vector<4x16x1024xf32> to vector<4x16x128xf32>
    %50 = vector.broadcast %48 : vector<1x16x1xf32> to vector<4x16x128xf32>
    %51 = arith.mulf %50, %49 : vector<4x16x128xf32>
    %52 = vector.extract_strided_slice %3 {offsets = [0, 1], sizes = [16, 1], strides = [1, 1]} : vector<16x8xf32> to vector<16x1xf32>
    %53 = vector.shape_cast %52 : vector<16x1xf32> to vector<1x16x1xf32>
    %54 = vector.extract_strided_slice %46 {offsets = [0, 0, 128], sizes = [4, 16, 128], strides = [1, 1, 1]} : vector<4x16x1024xf32> to vector<4x16x128xf32>
    %55 = vector.broadcast %53 : vector<1x16x1xf32> to vector<4x16x128xf32>
    %56 = arith.mulf %55, %54 : vector<4x16x128xf32>
    %57 = arith.addf %51, %56 : vector<4x16x128xf32>
    %58 = vector.extract_strided_slice %3 {offsets = [0, 2], sizes = [16, 1], strides = [1, 1]} : vector<16x8xf32> to vector<16x1xf32>
    %59 = vector.shape_cast %58 : vector<16x1xf32> to vector<1x16x1xf32>
    %60 = vector.extract_strided_slice %46 {offsets = [0, 0, 256], sizes = [4, 16, 128], strides = [1, 1, 1]} : vector<4x16x1024xf32> to vector<4x16x128xf32>
    %61 = vector.broadcast %59 : vector<1x16x1xf32> to vector<4x16x128xf32>
    %62 = arith.mulf %61, %60 : vector<4x16x128xf32>
    %63 = arith.addf %57, %62 : vector<4x16x128xf32>
    %64 = vector.extract_strided_slice %3 {offsets = [0, 3], sizes = [16, 1], strides = [1, 1]} : vector<16x8xf32> to vector<16x1xf32>
    %65 = vector.shape_cast %64 : vector<16x1xf32> to vector<1x16x1xf32>
    %66 = vector.extract_strided_slice %46 {offsets = [0, 0, 384], sizes = [4, 16, 128], strides = [1, 1, 1]} : vector<4x16x1024xf32> to vector<4x16x128xf32>
    %67 = vector.broadcast %65 : vector<1x16x1xf32> to vector<4x16x128xf32>
    %68 = arith.mulf %67, %66 : vector<4x16x128xf32>
    %69 = arith.addf %63, %68 : vector<4x16x128xf32>
    %70 = vector.extract_strided_slice %3 {offsets = [0, 4], sizes = [16, 1], strides = [1, 1]} : vector<16x8xf32> to vector<16x1xf32>
    %71 = vector.shape_cast %70 : vector<16x1xf32> to vector<1x16x1xf32>
    %72 = vector.extract_strided_slice %46 {offsets = [0, 0, 512], sizes = [4, 16, 128], strides = [1, 1, 1]} : vector<4x16x1024xf32> to vector<4x16x128xf32>
    %73 = vector.broadcast %71 : vector<1x16x1xf32> to vector<4x16x128xf32>
    %74 = arith.mulf %73, %72 : vector<4x16x128xf32>
    %75 = arith.addf %69, %74 : vector<4x16x128xf32>
    %76 = vector.extract_strided_slice %3 {offsets = [0, 5], sizes = [16, 1], strides = [1, 1]} : vector<16x8xf32> to vector<16x1xf32>
    %77 = vector.shape_cast %76 : vector<16x1xf32> to vector<1x16x1xf32>
    %78 = vector.extract_strided_slice %46 {offsets = [0, 0, 640], sizes = [4, 16, 128], strides = [1, 1, 1]} : vector<4x16x1024xf32> to vector<4x16x128xf32>
    %79 = vector.broadcast %77 : vector<1x16x1xf32> to vector<4x16x128xf32>
    %80 = arith.mulf %79, %78 : vector<4x16x128xf32>
    %81 = arith.addf %75, %80 : vector<4x16x128xf32>
    %82 = vector.extract_strided_slice %3 {offsets = [0, 6], sizes = [16, 1], strides = [1, 1]} : vector<16x8xf32> to vector<16x1xf32>
    %83 = vector.shape_cast %82 : vector<16x1xf32> to vector<1x16x1xf32>
    %84 = vector.extract_strided_slice %46 {offsets = [0, 0, 768], sizes = [4, 16, 128], strides = [1, 1, 1]} : vector<4x16x1024xf32> to vector<4x16x128xf32>
    %85 = vector.broadcast %83 : vector<1x16x1xf32> to vector<4x16x128xf32>
    %86 = arith.mulf %85, %84 : vector<4x16x128xf32>
    %87 = arith.addf %81, %86 : vector<4x16x128xf32>
    %88 = vector.extract_strided_slice %3 {offsets = [0, 7], sizes = [16, 1], strides = [1, 1]} : vector<16x8xf32> to vector<16x1xf32>
    %89 = vector.shape_cast %88 : vector<16x1xf32> to vector<1x16x1xf32>
    %90 = vector.extract_strided_slice %46 {offsets = [0, 0, 896], sizes = [4, 16, 128], strides = [1, 1, 1]} : vector<4x16x1024xf32> to vector<4x16x128xf32>
    %91 = vector.broadcast %89 : vector<1x16x1xf32> to vector<4x16x128xf32>
    %92 = arith.mulf %91, %90 : vector<4x16x128xf32>
    %93 = arith.addf %87, %92 : vector<4x16x128xf32>
    %94 = vector.shape_cast %4 : vector<16x128xf32> to vector<1x16x128xf32>
    %95 = vector.broadcast %94 : vector<1x16x128xf32> to vector<4x16x128xf32>
    %96 = arith.addf %93, %95 : vector<4x16x128xf32>
    %97 = arith.negf %96 : vector<4x16x128xf32>
    %98 = math.exp %97 : vector<4x16x128xf32>
    %cst_42 = arith.constant 1.000000e+00 : f32
    %99 = vector.broadcast %cst_42 : f32 to vector<4x16x128xf32>
    %100 = arith.addf %99, %98 : vector<4x16x128xf32>
    %101 = arith.divf %99, %100 : vector<4x16x128xf32>
    %102 = vector.extract_strided_slice %101 {offsets = [0, 0, 0], sizes = [4, 16, 64], strides = [1, 1, 1]} : vector<4x16x128xf32> to vector<4x16x64xf32>
    %103 = vector.extract_strided_slice %101 {offsets = [0, 0, 64], sizes = [4, 16, 64], strides = [1, 1, 1]} : vector<4x16x128xf32> to vector<4x16x64xf32>
    %104 = arith.mulf %102, %1 : vector<4x16x64xf32>
    %105 = vector.shape_cast %104 : vector<4x16x64xf32> to vector<64x64xf32>
    %cst_43 = arith.constant dense<0.000000e+00> : vector<4x16x64xf32>
    %106 = tpu.matmul %17, %104, %cst_43 {dimension_numbers = #tpu.dot_dimension_numbers<[2], [1], [1], [2], [0, 0, 0, 1, 1, 2], [0], [0]>} : vector<4x16x16xf32>, vector<4x16x64xf32>, vector<4x16x64xf32> -> vector<4x16x64xf32>
    %107 = vector.shape_cast %106 : vector<4x16x64xf32> to vector<64x64xf32>
    %c0_44 = arith.constant 0 : index
    %c0_45 = arith.constant 0 : index
    %c0_46 = arith.constant 0 : index
    %108 = vector.load %arg9[%c0_44, %c0_45, %c0_46] : memref<2x64x512xf32, #tpu.memory_space<vmem>>, vector<1x64x512xf32>
    %109 = vector.shape_cast %108 : vector<1x64x512xf32> to vector<64x512xf32>
    %cst_47 = arith.constant dense<0.000000e+00> : vector<64x512xf32>
    %110 = tpu.matmul %105, %109, %cst_47 {dimension_numbers = #tpu.dot_dimension_numbers<[1], [0], [0], [1], [0, 0, 1, 1], [], []>} : vector<64x64xf32>, vector<64x512xf32>, vector<64x512xf32> -> vector<64x512xf32>
    %111 = arith.addf %45, %110 : vector<64x512xf32>
    %c1_48 = arith.constant 1 : index
    %c0_49 = arith.constant 0 : index
    %c0_50 = arith.constant 0 : index
    %112 = vector.load %arg9[%c1_48, %c0_49, %c0_50] : memref<2x64x512xf32, #tpu.memory_space<vmem>>, vector<1x64x512xf32>
    %113 = vector.shape_cast %112 : vector<1x64x512xf32> to vector<64x512xf32>
    %cst_51 = arith.constant dense<0.000000e+00> : vector<64x512xf32>
    %114 = tpu.matmul %107, %113, %cst_51 {dimension_numbers = #tpu.dot_dimension_numbers<[1], [0], [0], [1], [0, 0, 1, 1], [], []>} : vector<64x64xf32>, vector<64x512xf32>, vector<64x512xf32> -> vector<64x512xf32>
    %115 = arith.addf %111, %114 : vector<64x512xf32>
    %116 = vector.shape_cast %115 : vector<64x512xf32> to vector<4x16x512xf32>
    %117 = vector.extract_strided_slice %3 {offsets = [0, 0], sizes = [16, 1], strides = [1, 1]} : vector<16x8xf32> to vector<16x1xf32>
    %118 = vector.shape_cast %117 : vector<16x1xf32> to vector<1x16x1xf32>
    %119 = vector.extract_strided_slice %116 {offsets = [0, 0, 0], sizes = [4, 16, 64], strides = [1, 1, 1]} : vector<4x16x512xf32> to vector<4x16x64xf32>
    %120 = vector.broadcast %118 : vector<1x16x1xf32> to vector<4x16x64xf32>
    %121 = arith.mulf %120, %119 : vector<4x16x64xf32>
    %122 = vector.extract_strided_slice %3 {offsets = [0, 1], sizes = [16, 1], strides = [1, 1]} : vector<16x8xf32> to vector<16x1xf32>
    %123 = vector.shape_cast %122 : vector<16x1xf32> to vector<1x16x1xf32>
    %124 = vector.extract_strided_slice %116 {offsets = [0, 0, 64], sizes = [4, 16, 64], strides = [1, 1, 1]} : vector<4x16x512xf32> to vector<4x16x64xf32>
    %125 = vector.broadcast %123 : vector<1x16x1xf32> to vector<4x16x64xf32>
    %126 = arith.mulf %125, %124 : vector<4x16x64xf32>
    %127 = arith.addf %121, %126 : vector<4x16x64xf32>
    %128 = vector.extract_strided_slice %3 {offsets = [0, 2], sizes = [16, 1], strides = [1, 1]} : vector<16x8xf32> to vector<16x1xf32>
    %129 = vector.shape_cast %128 : vector<16x1xf32> to vector<1x16x1xf32>
    %130 = vector.extract_strided_slice %116 {offsets = [0, 0, 128], sizes = [4, 16, 64], strides = [1, 1, 1]} : vector<4x16x512xf32> to vector<4x16x64xf32>
    %131 = vector.broadcast %129 : vector<1x16x1xf32> to vector<4x16x64xf32>
    %132 = arith.mulf %131, %130 : vector<4x16x64xf32>
    %133 = arith.addf %127, %132 : vector<4x16x64xf32>
    %134 = vector.extract_strided_slice %3 {offsets = [0, 3], sizes = [16, 1], strides = [1, 1]} : vector<16x8xf32> to vector<16x1xf32>
    %135 = vector.shape_cast %134 : vector<16x1xf32> to vector<1x16x1xf32>
    %136 = vector.extract_strided_slice %116 {offsets = [0, 0, 192], sizes = [4, 16, 64], strides = [1, 1, 1]} : vector<4x16x512xf32> to vector<4x16x64xf32>
    %137 = vector.broadcast %135 : vector<1x16x1xf32> to vector<4x16x64xf32>
    %138 = arith.mulf %137, %136 : vector<4x16x64xf32>
    %139 = arith.addf %133, %138 : vector<4x16x64xf32>
    %140 = vector.extract_strided_slice %3 {offsets = [0, 4], sizes = [16, 1], strides = [1, 1]} : vector<16x8xf32> to vector<16x1xf32>
    %141 = vector.shape_cast %140 : vector<16x1xf32> to vector<1x16x1xf32>
    %142 = vector.extract_strided_slice %116 {offsets = [0, 0, 256], sizes = [4, 16, 64], strides = [1, 1, 1]} : vector<4x16x512xf32> to vector<4x16x64xf32>
    %143 = vector.broadcast %141 : vector<1x16x1xf32> to vector<4x16x64xf32>
    %144 = arith.mulf %143, %142 : vector<4x16x64xf32>
    %145 = arith.addf %139, %144 : vector<4x16x64xf32>
    %146 = vector.extract_strided_slice %3 {offsets = [0, 5], sizes = [16, 1], strides = [1, 1]} : vector<16x8xf32> to vector<16x1xf32>
    %147 = vector.shape_cast %146 : vector<16x1xf32> to vector<1x16x1xf32>
    %148 = vector.extract_strided_slice %116 {offsets = [0, 0, 320], sizes = [4, 16, 64], strides = [1, 1, 1]} : vector<4x16x512xf32> to vector<4x16x64xf32>
    %149 = vector.broadcast %147 : vector<1x16x1xf32> to vector<4x16x64xf32>
    %150 = arith.mulf %149, %148 : vector<4x16x64xf32>
    %151 = arith.addf %145, %150 : vector<4x16x64xf32>
    %152 = vector.extract_strided_slice %3 {offsets = [0, 6], sizes = [16, 1], strides = [1, 1]} : vector<16x8xf32> to vector<16x1xf32>
    %153 = vector.shape_cast %152 : vector<16x1xf32> to vector<1x16x1xf32>
    %154 = vector.extract_strided_slice %116 {offsets = [0, 0, 384], sizes = [4, 16, 64], strides = [1, 1, 1]} : vector<4x16x512xf32> to vector<4x16x64xf32>
    %155 = vector.broadcast %153 : vector<1x16x1xf32> to vector<4x16x64xf32>
    %156 = arith.mulf %155, %154 : vector<4x16x64xf32>
    %157 = arith.addf %151, %156 : vector<4x16x64xf32>
    %158 = vector.extract_strided_slice %3 {offsets = [0, 7], sizes = [16, 1], strides = [1, 1]} : vector<16x8xf32> to vector<16x1xf32>
    %159 = vector.shape_cast %158 : vector<16x1xf32> to vector<1x16x1xf32>
    %160 = vector.extract_strided_slice %116 {offsets = [0, 0, 448], sizes = [4, 16, 64], strides = [1, 1, 1]} : vector<4x16x512xf32> to vector<4x16x64xf32>
    %161 = vector.broadcast %159 : vector<1x16x1xf32> to vector<4x16x64xf32>
    %162 = arith.mulf %161, %160 : vector<4x16x64xf32>
    %163 = arith.addf %157, %162 : vector<4x16x64xf32>
    %164 = vector.shape_cast %5 : vector<16x64xf32> to vector<1x16x64xf32>
    %165 = vector.broadcast %164 : vector<1x16x64xf32> to vector<4x16x64xf32>
    %166 = arith.addf %163, %165 : vector<4x16x64xf32>
    %167 = math.tanh %166 : vector<4x16x64xf32>
    %168 = arith.mulf %103, %1 : vector<4x16x64xf32>
    %cst_52 = arith.constant 1.000000e+00 : f32
    %169 = vector.broadcast %cst_52 : f32 to vector<4x16x64xf32>
    %170 = arith.subf %169, %103 : vector<4x16x64xf32>
    %171 = arith.mulf %170, %167 : vector<4x16x64xf32>
    %172 = arith.addf %168, %171 : vector<4x16x64xf32>
    %c0_53 = arith.constant 0 : index
    %c0_54 = arith.constant 0 : index
    %c0_55 = arith.constant 0 : index
    %173 = vector.load %arg11[%c0_53, %c0_54, %c0_55] : memref<4x16x64xf32, #tpu.memory_space<vmem>>, vector<4x16x64xf32>
    tpu.vector_store %arg11[%c0_53, %c0_54, %c0_55], %172 {strides = array<i32>} : memref<4x16x64xf32, #tpu.memory_space<vmem>>, vector<4x16x64xf32>,
    return
  }
  func.func @transform_0(%arg0: i32) -> (i32, i32, i32) {
    %c0_i32 = arith.constant 0 : i32
    %c0_i32_0 = arith.constant 0 : i32
    %c0_i32_1 = arith.constant 0 : i32
    return %arg0, %c0_i32, %c0_i32_0 : i32, i32, i32
  }
  func.func @transform_1(%arg0: i32) -> (i32, i32, i32) {
    %c0_i32 = arith.constant 0 : i32
    %c0_i32_0 = arith.constant 0 : i32
    %c0_i32_1 = arith.constant 0 : i32
    return %arg0, %c0_i32, %c0_i32_0 : i32, i32, i32
  }
  func.func @transform_2(%arg0: i32) -> (i32, i32, i32) {
    %c0_i32 = arith.constant 0 : i32
    %c0_i32_0 = arith.constant 0 : i32
    %c0_i32_1 = arith.constant 0 : i32
    return %arg0, %c0_i32, %c0_i32_0 : i32, i32, i32
  }
  func.func @transform_3(%arg0: i32) -> (i32, i32) {
    %c0_i32 = arith.constant 0 : i32
    %c0_i32_0 = arith.constant 0 : i32
    %c0_i32_1 = arith.constant 0 : i32
    return %c0_i32, %c0_i32_0 : i32, i32
  }
  func.func @transform_4(%arg0: i32) -> (i32, i32, i32) {
    %c0_i32 = arith.constant 0 : i32
    %c0_i32_0 = arith.constant 0 : i32
    %c0_i32_1 = arith.constant 0 : i32
    %c0_i32_2 = arith.constant 0 : i32
    return %c0_i32, %c0_i32_0, %c0_i32_1 : i32, i32, i32
  }
  func.func @transform_5(%arg0: i32) -> (i32, i32, i32) {
    %c0_i32 = arith.constant 0 : i32
    %c0_i32_0 = arith.constant 0 : i32
    %c0_i32_1 = arith.constant 0 : i32
    %c0_i32_2 = arith.constant 0 : i32
    return %c0_i32, %c0_i32_0, %c0_i32_1 : i32, i32, i32
  }
  func.func @transform_6(%arg0: i32) -> (i32, i32) {
    %c0_i32 = arith.constant 0 : i32
    %c0_i32_0 = arith.constant 0 : i32
    %c0_i32_1 = arith.constant 0 : i32
    return %c0_i32, %c0_i32_0 : i32, i32
  }
  func.func @transform_7(%arg0: i32) -> (i32, i32, i32) {
    %c0_i32 = arith.constant 0 : i32
    %c0_i32_0 = arith.constant 0 : i32
    %c0_i32_1 = arith.constant 0 : i32
    %c0_i32_2 = arith.constant 0 : i32
    return %c0_i32, %c0_i32_0, %c0_i32_1 : i32, i32, i32
  }
  func.func @transform_8(%arg0: i32) -> (i32, i32, i32) {
    %c0_i32 = arith.constant 0 : i32
    %c0_i32_0 = arith.constant 0 : i32
    %c0_i32_1 = arith.constant 0 : i32
    %c0_i32_2 = arith.constant 0 : i32
    return %c0_i32, %c0_i32_0, %c0_i32_1 : i32, i32, i32
  }
  func.func @transform_9(%arg0: i32) -> (i32, i32) {
    %c0_i32 = arith.constant 0 : i32
    %c0_i32_0 = arith.constant 0 : i32
    %c0_i32_1 = arith.constant 0 : i32
    return %c0_i32, %c0_i32_0 : i32, i32
  }
  func.func @transform_10(%arg0: i32) -> (i32, i32, i32) {
    %c0_i32 = arith.constant 0 : i32
    %c0_i32_0 = arith.constant 0 : i32
    %c0_i32_1 = arith.constant 0 : i32
    return %arg0, %c0_i32, %c0_i32_0 : i32, i32, i32
  }
}

</mosaic_0001>

<bundles_post_ra>
// kernel: tpu_custom_call.1
= control target key start
LH: loop header
LB: loop body
LE: loop exit
PB: predicated region body
PF: predicated region fallthrough
CT: control target
= control target key end

     0   :  { %s10226_s0 = inlined_call_operand.hbm [shape: f32[8,16,18], index: 0, kind: input, shape index: {}]   ;;  %s10227_s1 = inlined_call_operand.hbm [shape: f32[8,16,64], index: 1, kind: input, shape index: {}]   ;;  %s10228_s2 = inlined_call_operand.hbm [shape: f32[8,16,16], index: 2, kind: input, shape index: {}]   ;;  %s10229_s3 = inlined_call_operand.vmem [shape: f32[16,8], index: 3, kind: input, shape index: {}]   ;;  %s10230_s4 = inlined_call_operand.vmem [shape: f32[2,18,1024], index: 4, kind: input, shape index: {}]   ;;  %s10231_s5 = inlined_call_operand.vmem [shape: f32[2,64,1024], index: 5, kind: input, shape index: {}]   ;;  %s10232_s6 = inlined_call_operand.vmem [shape: f32[16,128], index: 6, kind: input, shape index: {}]   ;;  %s10233_s7 = inlined_call_operand.vmem [shape: f32[2,18,512], index: 7, kind: input, shape index: {}]   ;;  %s10234_s8 = inlined_call_operand.hbm [shape: f32[2,64,512], index: 8, kind: input, shape index: {}]   ;;  %s10235_s9 = inlined_call_operand.hbm [shape: f32[16,64], index: 9, kind: input, shape index: {}]   ;;  %s10236_s10 = inlined_call_operand.hbm [shape: f32[8,16,64], index: 10, kind: output, shape index: {}]  }
   0x1   :  { %10303 = sst [smem:[#allocation137_spill]] %s10226_s0 }
   0x2   :  { %10304 = sst [smem:[#allocation138_spill]] %s10227_s1 }
   0x3   :  { %10305 = sst [smem:[#allocation139_spill]] %s10234_s8 }
   0x4   :  { %10306 = sst [smem:[#allocation140_spill]] %s10236_s10 }
   0x5   :  { %15 = vsyncpa [#allocation3], 0 }
   0x6   :  { %17 = vsyncpa [#allocation3 + $0x1], 0 }
   0x7   :  { %18 = vsyncpa [#allocation6], 0 }
   0x8   :  { %20 = vsyncpa [#allocation6 + $0x1], 0 }
   0x9   :  { %21 = vsyncpa [#allocation9], 0 }
   0xa   :  { %22 = vsyncpa [#allocation4], 0 }
   0xb   :  { %24 = vsyncpa [#allocation4 + $0x1], 0  ;;  %s7053_s13 = smov 0   ;;  %s7055_s14 = smov 0  }
   0xc   :  { %s7057_s15 = smov 0   ;;  %s7059_s16 = smov 0  }
   0xd LB: > { %10307 = sst [smem:[#allocation16_spill]] %s6962_s13  ;;  %s7074_s17 = sadd.s32 4294967295, %s6974_s16   ;;  %s6974_s16 = sphi %s7059_s16, %s10656_s16   ;;  %s6970_s15 = sphi %s7057_s15, %s10660_s15   ;;  %s6966_s14 = sphi %s7055_s14, %s10659_s14   ;;  %s6962_s13 = sphi %s7053_s13, %s10658_s13  }
   0xe   : > { %10308 = sst [smem:[#allocation17_spill]] %s6974_s16  ;;  %s5985_s18 = sadd.s32 4294967294, %s6974_s16  }
   0xf   : > { %s7078_s19 = sadd.s32 1, %s6974_s16   ;;  %s37_s20 = sadd.s32 1, %s6970_s15 }
  0x10   : > { %10309 = sst [smem:[#allocation18_spill]] %s7078_s19  ;;  %s34_s21 = ssub.s32 %s6974_s16, %s7078_s19 }
  0x11   : > { %p44_p0 = scmp.ne.s32.totalorder %s6970_s15, %s6966_s14  ;;  %p35_p1 = scmp.eq.s32.totalorder %s34_s21, 0 }
  0x12   : > { %p45_p2 = scmp.eq.s32.totalorder %s6974_s16, 0  ;;  %p50_p3 = scmp.ne.s32.totalorder %s6966_s14, %s6962_s13 }
  0x13   : > { %p10247_p4 = scmp.eq.s32.totalorder %s7074_s17, 0  ;;  %p273_p7 = scmp.eq.s32.totalorder %s7074_s17, 1 }
  0x14   : > { %s7090_s22 = scalar_select %p35_p1, %s6970_s15, %s37_s20  }
  0x15   : > { %p7092_p5 = por %p45_p2, %p44_p0  ;;  %p7098_p6 = por %p10247_p4, %p50_p3 }
  0x16   : > { %10310 = sst [smem:[#allocation19_spill]] %s7090_s22  ;;  %p279_p8 = scmp.eq.s32.totalorder %s5985_s18, 1 }
  0x17   : > { %s10312_s24 = scalar_select %p7098_p6, 1, 0 }
  0x18   : > { %p5986_p9 = scmp.ge.s32.totalorder %s6974_s16, 1  ;;  %p286_p10 = scmp.lt.s32.totalorder %s6974_s16, 3 }
  0x19   : > { %p7105_p11 = por %p273_p7, %p44_p0  ;;  %p7109_p12 = por %p279_p8, %p50_p3 }
  0x1a   : > { %p7113_p13 = pnand %p5986_p9, %p286_p10  ;;  %s6976_s28 = smov [#allocation8]  }
  0x1b   : > { %s10313_s25 = scalar_select %p7105_p11, 1, 0 }
  0x1c   : > { %s10314_s26 = scalar_select %p7109_p12, 1, 0 }
  0x1d   : > { %s10316_s27 = scalar_select %p7113_p13, 1, 0 }
  0x1e   : > { %10315 = sst [smem:[#allocation20_spill]] %s10314_s26  ;;  %p6579_p1 = pneg %p7113_p13 }
  0x1f   : > { %s313_s29 = sshll.u32 %s6976_s28, 4  ;;  %p6602_p3 = scmp.lt.s32.totalorder %s6974_s16, 2  ;;  %s314_s29 = int_to_ptr.vmem [resolvable:$true] %s313_s29 }
  0x20   : > { %p7121_p2 = pnand %p6579_p1, %p10247_p4  ;;  %s6777_s11 = scalar_lea.vmem %s314_s29, 8192 }
  0x21   : > { %p6778_p8 = scmp.ne.s32.totalorder %s314_s29, %s6777_s11  ;;  %p6785_p12 = scmp.lt.s32.totalorder %s314_s29, %s314_s29 }
  0x22   : > { %s10317_s30 = scalar_select %p7121_p2, 1, 0 }
  0x23   : > { %p10248_p7 = pneg %p7121_p2  ;;  %p6786_p11 = scmp.lt.s32.totalorder %s6777_s11, %s6777_s11 }
  0x25   : > { %p6780_p9 = pnand %p6778_p8, %p10248_p7  ;;  %p6787_p6 = por %p6786_p11, %p6785_p12 }
  0x27   : > { %p6781_p10 = pneg %p6780_p9 }
  0x29   : > { %p6788_p13 = pnand %p6787_p6, %p6781_p10 }
  0x2b   : > { %6791 = shalt.err (!%p6788_p13)
}
  0x2c   : > { %s6977_s12 = smov 512   ;;  %s6978_s18 = smov 32  }
  0x2d   : > { %s10318_s8 = sld [smem:[#allocation139_spill]]  ;;  %s10245_s28 = sand.u32 1, %s6970_s15  }
  0x2e   : > { %s7139_s22 = sshll.u32 %s6974_s16, 10  ;;  %s7143_s11 = sshll.u32 %s10245_s28, 6 }
  0x2f   : > { %p7149_p6 = pnand %p6602_p3, %p7092_p5  ;;  %s362_s26 = sand.u32 1, %s6974_s16  }
  0x30   : > { %s10320_s1 = sld [smem:[#allocation138_spill]]  ;;  %s7163_s23 = scalar_lea.sflag [#allocation6], %s362_s26 }
  0x31   : > { %p7169_p11 = pneg %p7149_p6 }
  0x33   : > { %6582 = dma.hbm_to_vmem [thread:$0]  (!%p7121_p2), %s10318_s8, 8192, %s314_s29, [#allocation9], %s6977_s12, %s6977_s12, %s6978_s18  }
  0x34   : > { %s366_s12 = scalar_lea.vmem [#allocation5], %s7143_s11 }
  0x35   : > { %s374_s18 = sshll.u32 %s366_s12, 4  ;;  %s7161_s18 = int_to_ptr.vmem [resolvable:$true] %s374_s18 }
  0x36   : > { %s7158_s29 = scalar_lea.hbm %s10320_s1, %s7139_s22  ;;  %s6797_s28 = scalar_lea.hbm %s10320_s1, 2048 }
  0x37   : > { %s6792_s20 = scalar_lea.hbm %s7158_s29, 1024  ;;  %p6798_p1 = scmp.lt.s32.totalorder %s7158_s29, %s10320_s1 }
  0x38   : > { %p6793_p5 = scmp.ne.s32.totalorder %s7158_s29, %s6792_s20  ;;  %p6799_p3 = scmp.lt.s32.totalorder %s6797_s28, %s6792_s20 }
  0x3a   : > { %p6795_p12 = pnand %p7169_p11, %p6793_p5  ;;  %p6800_p8 = por %p6799_p3, %p6798_p1 }
  0x3c   : > { %p6796_p13 = pneg %p6795_p12 }
  0x3e   : > { %p6801_p9 = pnand %p6800_p8, %p6796_p13 }
  0x40   : > { %6804 = shalt.err (!%p6801_p9)
}
  0x41   : > { %s6805_s26 = scalar_lea.vmem %s7161_s18, 1024  ;;  %s6979_s16 = smov [#allocation5]  }
  0x42   : > { %p6806_p10 = scmp.ne.s32.totalorder %s7161_s18, %s6805_s26  ;;  %s6810_s10 = sshll.u32 %s6979_s16, 4  ;;  %s6811_s10 = int_to_ptr.vmem [resolvable:$false] %s6810_s10 }
  0x43   : > { %s6812_s13 = scalar_lea.vmem %s6811_s10, 2048  ;;  %p6813_p0 = scmp.lt.s32.totalorder %s7161_s18, %s6811_s10 }
  0x44   : > { %p6808_p5 = pnand %p6806_p10, %p7169_p11  ;;  %p6814_p4 = scmp.lt.s32.totalorder %s6812_s13, %s6805_s26 }
  0x46   : > { %p6809_p12 = pneg %p6808_p5  ;;  %p6815_p7 = por %p6814_p4, %p6813_p0 }
  0x48   : > { %p6816_p2 = pnand %p6815_p7, %p6809_p12 }
  0x4a   : > { %6819 = shalt.err (!%p6816_p2)
}
  0x4b   : > { %s10251_s8 = smov 128   ;;  %s6981_s28 = smov 8  }
  0x4c   : > { %6592 = dma.hbm_to_vmem [thread:$0]  (!%p7149_p6), %s7158_s29, 1024, %s7161_s18, %s7163_s23, %s10251_s8, %s10251_s8, %s6981_s28  }
  0x4d   : > { %s6982_s16 = smov [#allocation10]   ;;  %p10322_p4 = scmp.ne.s32.totalorder %s10317_s30, 0 }
  0x4e   : > { %s326_s20 = sshll.u32 %s6982_s16, 4  ;;  %s327_s20 = int_to_ptr.vmem [resolvable:$true] %s326_s20 }
  0x4f   : > { %s6831_s12 = scalar_lea.vmem %s327_s20, 256  ;;  %p10323_p0 = pneg %p10322_p4 }
  0x50   : > { %p6832_p13 = scmp.ne.s32.totalorder %s327_s20, %s6831_s12  ;;  %p6839_p1 = scmp.lt.s32.totalorder %s327_s20, %s327_s20 }
  0x51   : > { %p6840_p3 = scmp.lt.s32.totalorder %s6831_s12, %s6831_s12 }
  0x52   : > { %p6834_p2 = pnand %p6832_p13, %p10323_p0 }
  0x53   : > { %p6841_p8 = por %p6840_p3, %p6839_p1 }
  0x54   : > { %p6835_p7 = pneg %p6834_p2 }
  0x56   : > { %p6842_p9 = pnand %p6841_p8, %p6835_p7 }
  0x58   : > { %6845 = shalt.err (!%p6842_p9)
}
  0x59   : > { %6585 = dma.hbm_to_vmem [thread:$0]  (!%p10322_p4), %s10235_s9, 256, %s327_s20, [#allocation9], %s10251_s8, %s10251_s8, %s6981_s28  }
  0x5a   : > { %s10324_s0 = sld [smem:[#allocation137_spill]]  ;;  %s344_s30 = scalar_lea.vmem [#allocation2], %s7143_s11 }
  0x5b   : > { %s352_s16 = sshll.u32 %s344_s30, 4  ;;  %s10325_s12 = sand.u32 1, %s6970_s15   ;;  %s7213_s16 = int_to_ptr.vmem [resolvable:$true] %s352_s16 }
  0x5c   : > { %s341_s1 = scalar_lea.sflag [#allocation3], %s10325_s12 }
  0x60   : > { %s7210_s13 = scalar_lea.hbm %s10324_s0, %s7139_s22  ;;  %s6851_s26 = scalar_lea.hbm %s10324_s0, 2048 }
  0x61   : > { %s6846_s29 = scalar_lea.hbm %s7210_s13, 1024  ;;  %p6852_p13 = scmp.lt.s32.totalorder %s7210_s13, %s10324_s0 }
  0x62   : > { %p6847_p10 = scmp.ne.s32.totalorder %s7210_s13, %s6846_s29  ;;  %p6853_p4 = scmp.lt.s32.totalorder %s6851_s26, %s6846_s29 }
  0x64   : > { %p6849_p5 = pnand %p6847_p10, %p7169_p11  ;;  %p6854_p0 = por %p6853_p4, %p6852_p13 }
  0x66   : > { %p6850_p12 = pneg %p6849_p5 }
  0x68   : > { %p6855_p2 = pnand %p6854_p0, %p6850_p12 }
  0x6a   : > { %6858 = shalt.err (!%p6855_p2)
}
  0x6b   : > { %s6859_s30 = scalar_lea.vmem %s7213_s16, 1024  ;;  %s6983_s12 = smov [#allocation2]  }
  0x6c   : > { %p6860_p7 = scmp.ne.s32.totalorder %s7213_s16, %s6859_s30  ;;  %s6864_s20 = sshll.u32 %s6983_s12, 4  ;;  %s6865_s20 = int_to_ptr.vmem [resolvable:$false] %s6864_s20 }
  0x6d   : > { %s6866_s18 = scalar_lea.vmem %s6865_s20, 2048  ;;  %p6867_p8 = scmp.lt.s32.totalorder %s7213_s16, %s6865_s20 }
  0x6e   : > { %p6862_p1 = pnand %p6860_p7, %p7169_p11  ;;  %p6868_p9 = scmp.lt.s32.totalorder %s6866_s18, %s6859_s30 }
  0x70   : > { %p6863_p3 = pneg %p6862_p1  ;;  %p6869_p10 = por %p6868_p9, %p6867_p8 }
  0x72   : > { %p6870_p5 = pnand %p6869_p10, %p6863_p3 }
  0x74   : > { %6873 = shalt.err (!%p6870_p5)
}
  0x75   : > { %s10326_s8 = smov 128   ;;  %s7244_s10 = scalar_lea.hbm %s10228_s2, %s7139_s22 }
  0x76   : > { %6589 = dma.hbm_to_vmem [thread:$0]  (!%p7149_p6), %s7210_s13, 1024, %s7213_s16, %s341_s1, %s10326_s8, %s10326_s8, %s6981_s28  }
  0x77   : > { %s388_s30 = scalar_lea.vmem [#allocation7], %s7143_s11  ;;  %s6874_s20 = scalar_lea.hbm %s7244_s10, 1024 }
  0x78   : > { %s396_s12 = sshll.u32 %s388_s30, 4  ;;  %p6875_p12 = scmp.ne.s32.totalorder %s7244_s10, %s6874_s20  ;;  %s397_s12 = int_to_ptr.vmem [resolvable:$true] %s396_s12 }
  0x79   : > { %s6879_s1 = scalar_lea.hbm %s10228_s2, 2048  ;;  %p6880_p0 = scmp.lt.s32.totalorder %s7244_s10, %s10228_s2 }
  0x7a   : > { %p6877_p13 = pnand %p6875_p12, %p7169_p11  ;;  %p6881_p2 = scmp.lt.s32.totalorder %s6879_s1, %s6874_s20 }
  0x7c   : > { %p6878_p4 = pneg %p6877_p13  ;;  %p6882_p7 = por %p6881_p2, %p6880_p0 }
  0x7e   : > { %p6883_p1 = pnand %p6882_p7, %p6878_p4 }
  0x80   : > { %6886 = shalt.err (!%p6883_p1)
}
  0x81   : > { %s6887_s22 = scalar_lea.vmem %s397_s12, 1024  ;;  %s6984_s11 = smov [#allocation7]  }
  0x82   : > { %p6888_p3 = scmp.ne.s32.totalorder %s397_s12, %s6887_s22  ;;  %s6892_s29 = sshll.u32 %s6984_s11, 4  ;;  %s6893_s29 = int_to_ptr.vmem [resolvable:$false] %s6892_s29 }
  0x83   : > { %s6894_s26 = scalar_lea.vmem %s6893_s29, 2048  ;;  %p6895_p10 = scmp.lt.s32.totalorder %s397_s12, %s6893_s29 }
  0x84   : > { %p6890_p8 = pnand %p6888_p3, %p7169_p11  ;;  %p6896_p5 = scmp.lt.s32.totalorder %s6894_s26, %s6887_s22 }
  0x86   : > { %p6891_p9 = pneg %p6890_p8  ;;  %p6897_p12 = por %p6896_p5, %p6895_p10 }
  0x88   : > { %p6898_p13 = pnand %p6897_p12, %p6891_p9 }
  0x8a   : > { %6901 = shalt.err (!%p6898_p13)
}
  0x8b   : > { %6595 = dma.hbm_to_vmem [thread:$0]  (!%p7149_p6), %s7244_s10, 1024, %s397_s12, %s7163_s23, %s10326_s8, %s10326_s8, %s6981_s28  }
  0x8c   : > { %p10327_p11 = scmp.ne.s32.totalorder %s10316_s27, 0 }
  0x8e   : > { %408 = sbr.rel (%p10327_p11) target bundleno = 2075 (0x81b), region = 60 }
  0x93   : > { %s7270_s0 = sand.u32 1, %s6966_s14   ;;  %p10328_p4 = scmp.ne.s32.totalorder %s10312_s24, 0 }
  0x94   : > { %s7273_s21 = sshll.u32 %s7270_s0, 6  ;;  %s411_s30 = scalar_lea.sflag [#allocation3], %s7270_s0 }
  0x95   : > { %s7277_s19 = scalar_lea.vmem [#allocation2], %s7273_s21 }
  0x96   : > { %6945 = dma.done.wait (%p10328_p4), %s411_s30, 1024  }
  0x97   : > { %6947 = vsyncadd (%p10328_p4), %s411_s30, 4294966272  ;;  %s419_s27 = sand.u32 1, %s7074_s17   ;;  %s7285_s28 = scalar_lea.vmem [#allocation5], %s7273_s21 }
  0x98   : > { %s420_s23 = scalar_lea.sflag [#allocation6], %s419_s27 }
  0x99   : > { %6949 = dma.done.wait (%p10328_p4), %s420_s23, 2048  }
  0x9a   : > { %6951 = vsyncadd (%p10328_p4), %s420_s23, 4294965248  ;;  %s432_s8 = scalar_lea.vmem [#allocation7], %s7273_s21  ;;  %p10329_p6 = scmp.eq.s32.totalorder %s7074_s17, 0 }
  0x9c   : > { %6953 = dma.done.wait (%p10329_p6), [#allocation9], 8448   ;;  %p10330_p0 = pmov %p10329_p6 }
  0x9d   : > { %vm521_vm0 = vcmask 130048   ;;  %v508_v0 = vld [vmem:[%s432_s8 + $0x8] sm:$0xff]  ;;  %v507_v1 = vld [vmem:[%s432_s8] sm:$0xff]  ;;  %v510_v2 = vld [vmem:[%s432_s8 + $0x18] sm:$0xff]  ;;  %vm1654_vm1 = vcmask 523264   ;;  %vm2156_vm2 = vcmask 1041408  }
  0x9e   : > { %6955 = vsyncadd (%p10330_p0), [#allocation9], 4294958848  ;;  %6451 = vmatprep.subr.msk.mxu0 %vm521_vm0, %v508_v0  ;;  %6458 = vmatprep.subr.msk.mxu1 %vm521_vm0, %v510_v2  ;;  %v509_v3 = vld [vmem:[%s432_s8 + $0x10] sm:$0xff]  ;;  %v512_v4 = vld [vmem:[%s432_s8 + $0x28] sm:$0xff]  ;;  %vm2131_vm3 = vcmask 146432   ;;  %s6994_s16 = smov 64  }
  0x9f   : > { %6452 = vmatpush3.xpose.msk.msra.mxu0 %vm521_vm0, %v508_v0  ;;  %6459 = vmatpush3.xpose.msk.msra.mxu1 %vm521_vm0, %v510_v2  ;;  %v514_v5 = vld [vmem:[%s432_s8 + $0x38] sm:$0xff]  ;;  %v511_v6 = vld [vmem:[%s432_s8 + $0x20] sm:$0xff]  ;;  %v513_v7 = vld [vmem:[%s432_s8 + $0x30] sm:$0xff]  ;;  %s6386_s22 = sshll.u32 %s7074_s17, 10  ;;  %s10649_s26 = sld [smem:[#allocation140_spill]] }
  0xa0   : > { %6453 = vmatprep.subr.msk.mxu0 %vm521_vm0, %v507_v1  ;;  %6455 = vmatprep.mubr.msk.f32.mxu0 %vm521_vm0, %v507_v1  ;;  %s5836_s27 = scalar_lea.sflag [#allocation4], %s7270_s0  ;;  %p10650_p7 = scmp.ne.s32.totalorder %s10313_s25, 0 }
  0xa1   : > { %6460 = vmatprep.subr.msk.mxu1 %vm521_vm0, %v509_v3  ;;  %6462 = vmatprep.mubr.msk.f32.mxu1 %vm521_vm0, %v509_v3  ;;  %s6995_s17 = smov [#allocation11]  }
  0xa2   : > { %s6906_s8 = sshll.u32 %s6995_s17, 4  ;;  %s6907_s8 = int_to_ptr.vmem [resolvable:$false] %s6906_s8 }
  0xa3   : > { %6454 = vmatpush3.xpose.msk.msra.mxu0 %vm521_vm0, %v507_v1  ;;  %6461 = vmatpush3.xpose.msk.msra.mxu1 %vm521_vm0, %v509_v3  ;;  %s6908_s24 = scalar_lea.vmem %s6907_s8, 2048 }
  0xa4   : > { %6465 = vmatprep.subr.msk.mxu0 %vm521_vm0, %v512_v4  ;;  %6472 = vmatprep.subr.msk.mxu1 %vm521_vm0, %v514_v5 }
  0xa5   : > { %s10182_s30 = scalar_lea.hbm %s10649_s26, %s6386_s22 }
  0xa6   : > { %6456 = vmatmul.mubr.msk.f32.vlgmr.msra.gmra.mxu0 %vm521_vm0, %v508_v0  ;;  %6463 = vmatmul.mubr.msk.f32.vlgmr.msra.gmra.mxu1 %vm521_vm0, %v510_v2 }
  0xa7   : > { %6466 = vmatpush3.xpose.msk.msra.mxu0 %vm521_vm0, %v512_v4  ;;  %6473 = vmatpush3.xpose.msk.msra.mxu1 %vm521_vm0, %v514_v5 }
  0xa8   : > { %6467 = vmatprep.subr.msk.mxu0 %vm521_vm0, %v511_v6  ;;  %6469 = vmatprep.mubr.msk.f32.mxu0 %vm521_vm0, %v511_v6 }
  0xa9   : > { %6474 = vmatprep.subr.msk.mxu1 %vm521_vm0, %v513_v7  ;;  %6476 = vmatprep.mubr.msk.f32.mxu1 %vm521_vm0, %v513_v7 }
  0xab   : > { %6468 = vmatpush3.xpose.msk.msra.mxu0 %vm521_vm0, %v511_v6  ;;  %6475 = vmatpush3.xpose.msk.msra.mxu1 %vm521_vm0, %v513_v7 }
  0xae   : > { %6470 = vmatmul.mubr.msk.f32.vlgmr.msra.gmra.mxu0 %vm521_vm0, %v512_v4  ;;  %6477 = vmatmul.mubr.msk.f32.vlgmr.msra.gmra.mxu1 %vm521_vm0, %v514_v5 }
 0x166   : > { %v6457_v8 = vpop.f32.mrf.mxu0  ;;  %v6464_v9 = vpop.f32.mrf.mxu1 }
 0x167   : > { %v847_v13 = vmax.f32 %v6457_v8, 0.0  ;;  %v849_v27 = vmax.f32 %v6464_v9, 0.0  ;;  %v7352_v8 = vld [vmem:[%s7277_s19 + $0x8] sm:$0xff]  ;;  %v7356_v9 = vld [vmem:[%s7277_s19] sm:$0xff] }
 0x168   : > { %v594_v10 = vpop.f32.mrf.mxu0  ;;  %v675_v12 = vpop.f32.mrf.mxu1  ;;  %6479 = vmatprep.subr.mxu0 %v7352_v8 }
 0x169   : > { %v846_v11 = vmax.f32 %v594_v10, 0.0  ;;  %v848_v15 = vmax.f32 %v675_v12, 0.0  ;;  %v857_v18 = vsel %vm521_vm0, %v847_v13, -inf  ;;  %v863_v30 = vsel %vm521_vm0, %v849_v27, -inf  ;;  %6480 = vmatpush3.msra.mxu0 %v7352_v8  ;;  %v7362_v10 = vld [vmem:[%s7277_s19 + $0x28] sm:$0xff]  ;;  %v7371_v12 = vld [vmem:[%s7277_s19 + $0x10] sm:$0xff] }
 0x16a   : > { %6481 = vmatprep.subr.mxu0 %v7356_v9 }
 0x16b   : > { %v854_v14 = vsel %vm521_vm0, %v846_v11, -inf  ;;  %v860_v22 = vsel %vm521_vm0, %v848_v15, -inf  ;;  %6482 = vmatpush3.msra.mxu0 %v7356_v9 }
 0x16c   : > { %855 = vmax.xlane.f32.xlu0 %v854_v14  ;;  %6493 = vmatprep.subr.mxu0 %v7362_v10 }
 0x16e   : > { %v6471_v16 = vpop.f32.mrf.mxu0  ;;  %v6478_v17 = vpop.f32.mrf.mxu1 }
 0x16f   : > { %v851_v24 = vmax.f32 %v6471_v16, 0.0  ;;  %v853_v29 = vmax.f32 %v6478_v17, 0.0 }
 0x170   : > { %858 = vmax.xlane.f32.xlu0 %v857_v18  ;;  %v756_v19 = vpop.f32.mrf.mxu0  ;;  %v837_v20 = vpop.f32.mrf.mxu1 }
 0x171   : > { %v852_v21 = vmax.f32 %v837_v20, 0.0  ;;  %v850_v23 = vmax.f32 %v756_v19, 0.0  ;;  %v869_v28 = vsel %vm521_vm0, %v851_v24, -inf  ;;  %v875_v31 = vsel %vm521_vm0, %v853_v29, -inf }
 0x173   : > { %v866_v25 = vsel %vm521_vm0, %v850_v23, -inf  ;;  %v872_v26 = vsel %vm521_vm0, %v852_v21, -inf }
 0x174   : > { %861 = vmax.xlane.f32.xlu0 %v860_v22  ;;  %867 = vmax.xlane.f32.xlu1 %v866_v25  ;;  %v7386_v25 = vld [vmem:[%s7277_s19 + $0x20] sm:$0xff] }
 0x178   : > { %873 = vmax.xlane.f32.xlu0 %v872_v26  ;;  %870 = vmax.xlane.f32.xlu1 %v869_v28 }
 0x17c   : > { %864 = vmax.xlane.f32.xlu1 %v863_v30 }
 0x180   : > { %876 = vmax.xlane.f32.xlu1 %v875_v31 }
 0x1f5   : > { %v856_v32 = vpop.xlane.xlu0 %855 }
 0x1f6   : > { %v878_v33 = vsub.f32 %v846_v11, %v856_v32  ;;  %v7366_v11 = vld [vmem:[%s7277_s19 + $0x18] sm:$0xff] }
 0x1f7   : > { %6486 = vmatprep.subr.mxu1 %v7366_v11 }
 0x1f8   : > { %v886_v34 = vmul.f32 1.442695, %v878_v33  ;;  %6487 = vmatpush3.msra.mxu1 %v7366_v11 }
 0x1f9   : > { %v859_v35 = vpop.xlane.xlu0 %858  ;;  %6488 = vmatprep.subr.mxu1 %v7371_v12 }
 0x1fa   : > { %6669 = vpow2.f32 %v886_v34  ;;  %v879_v36 = vsub.f32 %v847_v13, %v859_v35  ;;  %6489 = vmatpush3.msra.mxu1 %v7371_v12  ;;  %v7376_v13 = vld [vmem:[%s7277_s19 + $0x38] sm:$0xff]  ;;  %v7410_v34 = vld [vmem:[%s7285_s28] sm:$0xff] }
 0x1fb   : > { %6500 = vmatprep.subr.mxu1 %v7376_v13 }
 0x1fc   : > { %v888_v37 = vmul.f32 1.442695, %v879_v36 }
 0x1fd   : > { %v862_v38 = vpop.xlane.xlu0 %861  ;;  %v868_v39 = vpop.xlane.xlu1 %867 }
 0x1fe   : > { %6671 = vpow2.f32 %v888_v37  ;;  %v880_v40 = vsub.f32 %v848_v15, %v862_v38  ;;  %v882_v41 = vsub.f32 %v850_v23, %v868_v39  ;;  %v7418_v37 = vld [vmem:[%s7285_s28 + $0x28] sm:$0xff]  ;;  %v7426_v39 = vld [vmem:[%s7277_s19 + $0x30] sm:$0xff] }
 0x200   : > { %v894_v42 = vmul.f32 1.442695, %v882_v41  ;;  %v890_v43 = vmul.f32 1.442695, %v880_v40 }
 0x201   : > { %v874_v44 = vpop.xlane.xlu0 %873  ;;  %v871_v45 = vpop.xlane.xlu1 %870 }
 0x202   : > { %v884_v46 = vsub.f32 %v852_v21, %v874_v44  ;;  %v883_v47 = vsub.f32 %v851_v24, %v871_v45  ;;  %6673 = vpow2.f32 %v894_v42  ;;  %v7435_v42 = vld [vmem:[%s7285_s28 + $0x20] sm:$0xff]  ;;  %v1647_v45 = vld [vmem:[%s10231_s5 + $0x1c8] sm:$0xff] }
 0x203   : > { %6675 = vpow2.f32 %v890_v43  ;;  %v7443_v43 = vld [vmem:[%s7285_s28 + $0x18] sm:$0xff] }
 0x204   : > { %v896_v48 = vmul.f32 1.442695, %v883_v47  ;;  %v898_v49 = vmul.f32 1.442695, %v884_v46  ;;  %v1646_v46 = vld [vmem:[%s10231_s5 + $0x1c0] sm:$0xff]  ;;  %v7463_v47 = vld [vmem:[%s7285_s28 + $0x10] sm:$0xff] }
 0x205   : > { %v865_v50 = vpop.xlane.xlu1 %864 }
 0x206   : > { %v881_v51 = vsub.f32 %v849_v27, %v865_v50  ;;  %6677 = vpow2.f32 %v896_v48  ;;  %v7392_v27 = vld [vmem:[%s7285_s28 + $0x8] sm:$0xff]  ;;  %v7478_v50 = vld [vmem:[%s7285_s28 + $0x38] sm:$0xff] }
 0x207   : > { %v6670_v52 = vpop.eup %6669  ;;  %6679 = vpow2.f32 %v898_v49  ;;  %v1639_v48 = vld [vmem:[%s10231_s5 + $0x188] sm:$0xff]  ;;  %v1638_v49 = vld [vmem:[%s10231_s5 + $0x180] sm:$0xff] }
 0x208   : > { %v892_v53 = vmul.f32 1.442695, %v881_v51  ;;  %v902_v54 = vsel %vm521_vm0, %v6670_v52, 0.0  ;;  %v1631_v51 = vld [vmem:[%s10231_s5 + $0x148] sm:$0xff] }
 0x209   : > { %903 = vadd.xlane.f32.xlu0 %v902_v54  ;;  %v877_v55 = vpop.xlane.xlu1 %876  ;;  %v1623_v54 = vld [vmem:[%s10231_s5 + $0x108] sm:$0xff] }
 0x20a   : > { %6681 = vpow2.f32 %v892_v53  ;;  %v885_v56 = vsub.f32 %v853_v29, %v877_v55  ;;  %v7491_v53 = vld [vmem:[%s7285_s28 + $0x30] sm:$0xff]  ;;  %v1622_v55 = vld [vmem:[%s10231_s5 + $0x100] sm:$0xff] }
 0x20b   : > { %v6672_v57 = vpop.eup %6671 }
 0x20c   : > { %v900_v58 = vmul.f32 1.442695, %v885_v56  ;;  %v905_v59 = vsel %vm521_vm0, %v6672_v57, 0.0  ;;  %v1615_v56 = vld [vmem:[%s10231_s5 + $0xc8] sm:$0xff] }
 0x20d   : > { %906 = vadd.xlane.f32.xlu1 %v905_v59  ;;  %v1648_v59 = vld [vmem:[%s10231_s5 + $0x1d0] sm:$0xff] }
 0x20e   : > { %6683 = vpow2.f32 %v900_v58  ;;  %v1614_v58 = vld [vmem:[%s10231_s5 + $0xc0] sm:$0xff] }
 0x20f   : > { %v6674_v60 = vpop.eup %6673 }
 0x210   : > { %v914_v61 = vsel %vm521_vm0, %v6674_v60, 0.0  ;;  %v7331_v62 = vpop.eup %6675 }
 0x211   : > { %915 = vadd.xlane.f32.xlu0 %v914_v61  ;;  %v908_v0 = vsel %vm521_vm0, %v7331_v62, 0.0  ;;  %v1641_v61 = vld [vmem:[%s10231_s5 + $0x198] sm:$0xff] }
 0x213   : > { %v7333_v63 = vpop.eup %6677 }
 0x214   : > { %v917_v1 = vsel %vm521_vm0, %v7333_v63, 0.0  ;;  %v7339_v2 = vpop.eup %6679 }
 0x215   : > { %909 = vadd.xlane.f32.xlu0 %v908_v0  ;;  %918 = vadd.xlane.f32.xlu1 %v917_v1  ;;  %v920_v5 = vsel %vm521_vm0, %v7339_v2, 0.0  ;;  %v1599_v0 = vld [vmem:[%s10231_s5 + $0x48] sm:$0xff]  ;;  %v1633_v1 = vld [vmem:[%s10231_s5 + $0x158] sm:$0xff] }
 0x217   : > { %v7341_v3 = vpop.eup %6681 }
 0x218   : > { %v911_v4 = vsel %vm521_vm0, %v7341_v3, 0.0 }
 0x219   : > { %921 = vadd.xlane.f32.xlu0 %v920_v5  ;;  %912 = vadd.xlane.f32.xlu1 %v911_v4  ;;  %v1591_v4 = vld [vmem:[%s10231_s5 + $0x8] sm:$0xff]  ;;  %v1625_v5 = vld [vmem:[%s10231_s5 + $0x118] sm:$0xff] }
 0x21b   : > { %v7347_v6 = vpop.eup %6683 }
 0x21c   : > { %v923_v7 = vsel %vm521_vm0, %v7347_v6, 0.0 }
 0x21d   : > { %924 = vadd.xlane.f32.xlu1 %v923_v7  ;;  %v1624_v7 = vld [vmem:[%s10231_s5 + $0x110] sm:$0xff] }
 0x292   : > { %v904_v14 = vpop.xlane.xlu0 %903 }
 0x293   : > { %6685 = vrcp.f32 %v904_v14  ;;  %v1617_v14 = vld [vmem:[%s10231_s5 + $0xd8] sm:$0xff] }
 0x296   : > { %v907_v15 = vpop.xlane.xlu1 %906 }
 0x297   : > { %6687 = vrcp.f32 %v907_v15  ;;  %v1616_v15 = vld [vmem:[%s10231_s5 + $0xd0] sm:$0xff] }
 0x29a   : > { %v916_v16 = vpop.xlane.xlu0 %915 }
 0x29b   : > { %6689 = vrcp.f32 %v916_v16  ;;  %v10256_v16 = vmov 0.0  }
 0x29e   : > { %v910_v17 = vpop.xlane.xlu0 %909  ;;  %v919_v18 = vpop.xlane.xlu1 %918 }
 0x29f   : > { %6691 = vrcp.f32 %v910_v17  ;;  %v1609_v17 = vld [vmem:[%s10231_s5 + $0x98] sm:$0xff] }
 0x2a0   : > { %v6686_v19 = vpop.eup %6685  ;;  %6693 = vrcp.f32 %v919_v18  ;;  %v1608_v18 = vld [vmem:[%s10231_s5 + $0x90] sm:$0xff] }
 0x2a1   : > { %v7379_v20 = vmul.f32 %v6686_v19, %v6670_v52  ;;  %v1630_v52 = vld [vmem:[%s10231_s5 + $0x140] sm:$0xff]  ;;  %v1651_v19 = vld [vmem:[%s10231_s5 + $0x1e8] sm:$0xff] }
 0x2a2   : > { %v922_v21 = vpop.xlane.xlu0 %921  ;;  %v913_v22 = vpop.xlane.xlu1 %912 }
 0x2a3   : > { %6483 = vmatprep.mubr.msk.f32.mxu0 %vm521_vm0, %v7379_v20  ;;  %6695 = vrcp.f32 %v922_v21  ;;  %v1601_v21 = vld [vmem:[%s10231_s5 + $0x58] sm:$0xff] }
 0x2a4   : > { %v6688_v23 = vpop.eup %6687  ;;  %6697 = vrcp.f32 %v913_v22  ;;  %v1600_v22 = vld [vmem:[%s10231_s5 + $0x50] sm:$0xff] }
 0x2a5   : > { %v7383_v24 = vmul.f32 %v6688_v23, %v6672_v57  ;;  %v1649_v57 = vld [vmem:[%s10231_s5 + $0x1d8] sm:$0xff] }
 0x2a6   : > { %v925_v26 = vpop.xlane.xlu1 %924  ;;  %v1593_v23 = vld [vmem:[%s10231_s5 + $0x18] sm:$0xff] }
 0x2a7   : > { %10331 = vst [vmem:[#allocation21_spill] sm:$0xff] %v7383_v24  ;;  %6484 = vmatmul.mubr.msk.f32.vlgmr.msra.gmra.mxu0 %vm521_vm0, %v7383_v24  ;;  %6699 = vrcp.f32 %v925_v26  ;;  %v1650_v26 = vld [vmem:[%s10231_s5 + $0x1e0] sm:$0xff] }
 0x2a8   : > { %6494 = vmatpush3.msra.mxu0 %v7362_v10  ;;  %v6690_v28 = vpop.eup %6689 }
 0x2a9   : > { %6495 = vmatprep.subr.mxu0 %v7386_v25  ;;  %v7395_v29 = vmul.f32 %v6690_v28, %v6674_v60  ;;  %v1607_v60 = vld [vmem:[%s10231_s5 + $0x88] sm:$0xff]  ;;  %v1592_v28 = vld [vmem:[%s10231_s5 + $0x10] sm:$0xff] }
 0x2aa   : > { %6496 = vmatpush3.msra.mxu0 %v7386_v25 }
 0x2ab   : > { %10332 = vst [vmem:[#allocation22_spill] sm:$0xff] %v7395_v29  ;;  %6507 = vmatprep.subr.mxu0 %v7392_v27  ;;  %6497 = vmatprep.mubr.msk.f32.mxu0 %vm521_vm0, %v7395_v29 }
 0x2ac   : > { %v6692_v30 = vpop.eup %6691 }
 0x2ad   : > { %v6694_v31 = vpop.eup %6693  ;;  %v7402_v32 = vmul.f32 %v6692_v30, %v7331_v62  ;;  %v1606_v62 = vld [vmem:[%s10231_s5 + $0x80] sm:$0xff]  ;;  %v1643_v30 = vld [vmem:[%s10231_s5 + $0x1a8] sm:$0xff] }
 0x2ae   : > { %v7405_v33 = vmul.f32 %v6694_v31, %v7333_v63  ;;  %v1640_v63 = vld [vmem:[%s10231_s5 + $0x190] sm:$0xff]  ;;  %v1642_v31 = vld [vmem:[%s10231_s5 + $0x1a0] sm:$0xff] }
 0x2af   : > { %6490 = vmatprep.mubr.msk.f32.mxu1 %vm521_vm0, %v7402_v32 }
 0x2b0   : > { %10333 = vst [vmem:[#allocation23_spill] sm:$0xff] %v7405_v33  ;;  %v6696_v35 = vpop.eup %6695  ;;  %6498 = vmatmul.mubr.msk.f32.vlgmr.msra.gmra.mxu0 %vm521_vm0, %v7405_v33 }
 0x2b1   : > { %v6698_v36 = vpop.eup %6697  ;;  %6508 = vmatpush3.msra.mxu0 %v7392_v27  ;;  %6511 = vmatprep.mubr.msk.f32.mxu0 %vm521_vm0, %v7379_v20  ;;  %v7429_v40 = vmul.f32 %v6696_v35, %v7339_v2  ;;  %v1598_v2 = vld [vmem:[%s10231_s5 + $0x40] sm:$0xff]  ;;  %v1653_v35 = vld [vmem:[%s10231_s5 + $0x1f8] sm:$0xff] }
 0x2b2   : > { %6509 = vmatprep.subr.mxu0 %v7410_v34  ;;  %v7422_v38 = vmul.f32 %v6698_v36, %v7341_v3  ;;  %v1632_v3 = vld [vmem:[%s10231_s5 + $0x150] sm:$0xff]  ;;  %v1635_v36 = vld [vmem:[%s10231_s5 + $0x168] sm:$0xff] }
 0x2b3   : > { %6510 = vmatpush3.msra.mxu0 %v7410_v34  ;;  %10335 = vst [vmem:[#allocation25_spill] sm:$0xff] %v7429_v40 }
 0x2b4   : > { %10334 = vst [vmem:[#allocation24_spill] sm:$0xff] %v7422_v38  ;;  %v6700_v41 = vpop.eup %6699  ;;  %6521 = vmatprep.subr.mxu0 %v7418_v37  ;;  %6491 = vmatmul.mubr.msk.f32.vlgmr.msra.gmra.mxu1 %vm521_vm0, %v7422_v38 }
 0x2b5   : > { %6501 = vmatpush3.msra.mxu1 %v7376_v13  ;;  %6512 = vmatmul.mubr.msk.f32.vlgmr.msra.gmra.mxu0 %vm521_vm0, %v7383_v24  ;;  %v7446_v44 = vmul.f32 %v6700_v41, %v7347_v6  ;;  %v1590_v6 = vld [vmem:[%s10231_s5] sm:$0xff]  ;;  %v1652_v41 = vld [vmem:[%s10231_s5 + $0x1f0] sm:$0xff] }
 0x2b6   : > { %6522 = vmatpush3.msra.mxu0 %v7418_v37  ;;  %6502 = vmatprep.subr.mxu1 %v7426_v39  ;;  %v6125_v24 = vld [vmem:[%s10230_s4 + $0x120] sm:$0xff] }
 0x2b7   : > { %10336 = vst [vmem:[#allocation26_spill] sm:$0xff] %v7446_v44  ;;  %6504 = vmatprep.mubr.msk.f32.mxu1 %vm521_vm0, %v7429_v40  ;;  %6523 = vmatprep.subr.mxu0 %v7435_v42 }
 0x2b8   : > { %6525 = vmatprep.mubr.msk.f32.mxu0 %vm521_vm0, %v7395_v29  ;;  %6503 = vmatpush3.msra.mxu1 %v7426_v39 }
 0x2b9   : > { %6524 = vmatpush3.msra.mxu0 %v7435_v42  ;;  %6514 = vmatprep.subr.mxu1 %v7443_v43 }
 0x2ba   : > { %1695 = vmatprep.subr.mxu0 %v1647_v45  ;;  %6505 = vmatmul.mubr.msk.f32.vlgmr.msra.gmra.mxu1 %vm521_vm0, %v7446_v44  ;;  %v1634_v45 = vld [vmem:[%s10231_s5 + $0x160] sm:$0xff] }
 0x2bb   : > { %6515 = vmatpush3.msra.mxu1 %v7443_v43  ;;  %6526 = vmatmul.mubr.msk.f32.vlgmr.msra.gmra.mxu0 %vm521_vm0, %v7405_v33  ;;  %v6128_v33 = vld [vmem:[%s10230_s4 + $0x138] sm:$0xff] }
 0x2bc   : > { %1696 = vmatpush1.msra.mxu0 %v1646_v46  ;;  %6516 = vmatprep.subr.mxu1 %v7463_v47  ;;  %v1645_v46 = vld [vmem:[%s10231_s5 + $0x1b8] sm:$0xff] }
 0x2bd   : > { %6518 = vmatprep.mubr.msk.f32.mxu1 %vm521_vm0, %v7402_v32  ;;  %1697 = vmatprep.subr.mxu0 %v1639_v48  ;;  %v1627_v48 = vld [vmem:[%s10231_s5 + $0x128] sm:$0xff] }
 0x2be   : > { %6517 = vmatpush3.msra.mxu1 %v7463_v47  ;;  %1698 = vmatpush1.msra.mxu0 %v1638_v49  ;;  %v1644_v49 = vld [vmem:[%s10231_s5 + $0x1b0] sm:$0xff] }
 0x2bf   : > { %6528 = vmatprep.subr.mxu1 %v7478_v50  ;;  %1699 = vmatprep.subr.mxu0 %v1631_v51  ;;  %v1626_v51 = vld [vmem:[%s10231_s5 + $0x120] sm:$0xff] }
 0x2c0   : > { %6519 = vmatmul.mubr.msk.f32.vlgmr.msra.gmra.mxu1 %vm521_vm0, %v7422_v38  ;;  %1700 = vmatpush1.msra.mxu0 %v1630_v52  ;;  %v1637_v52 = vld [vmem:[%s10231_s5 + $0x178] sm:$0xff] }
 0x2c1   : > { %6529 = vmatpush3.msra.mxu1 %v7478_v50  ;;  %6532 = vmatprep.mubr.msk.f32.mxu1 %vm521_vm0, %v7429_v40  ;;  %v10349_v40 = vmov 0.0  }
 0x2c2   : > { %6530 = vmatprep.subr.mxu1 %v7491_v53  ;;  %1701 = vmatprep.subr.mxu0 %v1623_v54  ;;  %v1619_v54 = vld [vmem:[%s10231_s5 + $0xe8] sm:$0xff] }
 0x2c3   : > { %6531 = vmatpush3.msra.mxu1 %v7491_v53  ;;  %1702 = vmatpush1.msra.mxu0 %v1622_v55  ;;  %v1636_v55 = vld [vmem:[%s10231_s5 + $0x170] sm:$0xff] }
 0x2c4   : > { %1703 = vmatprep.subr.mxu0 %v1615_v56  ;;  %1808 = vmatprep.subr.mxu1 %v1649_v57  ;;  %v1618_v56 = vld [vmem:[%s10231_s5 + $0xe0] sm:$0xff]  ;;  %v1629_v57 = vld [vmem:[%s10231_s5 + $0x138] sm:$0xff] }
 0x2c5   : > { %6533 = vmatmul.mubr.msk.f32.vlgmr.msra.gmra.mxu1 %vm521_vm0, %v7446_v44  ;;  %1704 = vmatpush1.msra.mxu0 %v1614_v58  ;;  %v1611_v58 = vld [vmem:[%s10231_s5 + $0xa8] sm:$0xff] }
 0x2c6   : > { %1809 = vmatpush1.msra.mxu1 %v1648_v59  ;;  %1705 = vmatprep.subr.mxu0 %v1607_v60  ;;  %v1628_v59 = vld [vmem:[%s10231_s5 + $0x130] sm:$0xff]  ;;  %v1610_v60 = vld [vmem:[%s10231_s5 + $0xa0] sm:$0xff] }
 0x2c7   : > { %1810 = vmatprep.subr.mxu1 %v1641_v61  ;;  %1706 = vmatpush1.msra.mxu0 %v1606_v62  ;;  %v1621_v61 = vld [vmem:[%s10231_s5 + $0xf8] sm:$0xff]  ;;  %v1603_v62 = vld [vmem:[%s10231_s5 + $0x68] sm:$0xff] }
 0x2c8   : > { %1811 = vmatpush1.msra.mxu1 %v1640_v63  ;;  %1707 = vmatprep.subr.mxu0 %v1599_v0  ;;  %v1620_v63 = vld [vmem:[%s10231_s5 + $0xf0] sm:$0xff]  ;;  %v1602_v0 = vld [vmem:[%s10231_s5 + $0x60] sm:$0xff] }
 0x2c9   : > { %1812 = vmatprep.subr.mxu1 %v1633_v1  ;;  %1708 = vmatpush1.msra.mxu0 %v1598_v2  ;;  %v1595_v1 = vld [vmem:[%s10231_s5 + $0x28] sm:$0xff]  ;;  %v1594_v2 = vld [vmem:[%s10231_s5 + $0x20] sm:$0xff] }
 0x2ca   : > { %1813 = vmatpush1.msra.mxu1 %v1632_v3  ;;  %1709 = vmatprep.subr.mxu0 %v1591_v4  ;;  %v1613_v3 = vld [vmem:[%s10231_s5 + $0xb8] sm:$0xff]  ;;  %v1612_v4 = vld [vmem:[%s10231_s5 + $0xb0] sm:$0xff] }
 0x2cb   : > { %1814 = vmatprep.subr.mxu1 %v1625_v5  ;;  %1710 = vmatpush1.msra.mxu0 %v1590_v6  ;;  %v1583_v5 = vld [vmem:[%s10230_s4 + $0x88] sm:$0x3]  ;;  %v1605_v6 = vld [vmem:[%s10231_s5 + $0x78] sm:$0xff] }
 0x2cc   : > { %1743 = vmatprep.mubr.f32.mxu0 %v10256_v16  ;;  %1815 = vmatpush1.msra.mxu1 %v1624_v7  ;;  %v1582_v7 = vld [vmem:[%s10230_s4 + $0x80] sm:$0x3] }
 0x2cd   : > { %6041 = vmatmul.mubr.msk.f32.vlgmr.msra.gmra.mxu0 %vm1654_vm1, %v7410_v34  ;;  %1816 = vmatprep.subr.mxu1 %v1617_v14  ;;  %v1604_v14 = vld [vmem:[%s10231_s5 + $0x70] sm:$0xff] }
 0x2ce   : > { %1817 = vmatpush1.msra.mxu1 %v1616_v15  ;;  %1749 = vmatprep.mubr.f32.mxu0 %v10256_v16  ;;  %v1597_v15 = vld [vmem:[%s10231_s5 + $0x38] sm:$0xff] }
 0x2cf   : > { %1818 = vmatprep.subr.mxu1 %v1609_v17  ;;  %1856 = vmatprep.mubr.f32.mxu1 %v10256_v16  ;;  %v1596_v17 = vld [vmem:[%s10231_s5 + $0x30] sm:$0xff] }
 0x2d0   : > { %1819 = vmatpush1.msra.mxu1 %v1608_v18  ;;  %1921 = vmatprep.subr.mxu0 %v1651_v19  ;;  %v1575_v18 = vld [vmem:[%s10230_s4 + $0x48] sm:$0xff]  ;;  %v1574_v19 = vld [vmem:[%s10230_s4 + $0x40] sm:$0xff] }
 0x2d1   : > { %6042 = vmatmul.mubr.msk.f32.gmra.mxu0 %vm1654_vm1, %v7392_v27  ;;  %1820 = vmatprep.subr.mxu1 %v1601_v21  ;;  %v1585_v21 = vld [vmem:[%s10230_s4 + $0x98] sm:$0x3] }
 0x2d2   : > { %1821 = vmatpush1.msra.mxu1 %v1600_v22  ;;  %1755 = vmatprep.mubr.f32.mxu0 %v10256_v16  ;;  %v1567_v22 = vld [vmem:[%s10230_s4 + $0x8] sm:$0xff] }
 0x2d3   : > { %1822 = vmatprep.subr.mxu1 %v1593_v23  ;;  %1922 = vmatpush1.msra.mxu0 %v1650_v26  ;;  %v1584_v23 = vld [vmem:[%s10230_s4 + $0x90] sm:$0x3]  ;;  %v1577_v26 = vld [vmem:[%s10230_s4 + $0x58] sm:$0xff] }
 0x2d4   : > { %1823 = vmatpush1.msra.mxu1 %v1592_v28  ;;  %1923 = vmatprep.subr.mxu0 %v1643_v30  ;;  %v1576_v28 = vld [vmem:[%s10230_s4 + $0x50] sm:$0xff]  ;;  %v1587_v30 = vld [vmem:[%s10230_s4 + $0xa8] sm:$0x3] }
 0x2d5   : > { %6043 = vmatmul.mubr.msk.f32.gmra.mxu0 %vm1654_vm1, %v7463_v47  ;;  %6049 = vmatmul.mubr.msk.f32.vlgmr.msra.gmra.mxu1 %vm1654_vm1, %v7410_v34 }
 0x2d6   : > { %1761 = vmatprep.mubr.f32.mxu0 %v10256_v16  ;;  %1862 = vmatprep.mubr.f32.mxu1 %v10256_v16 }
 0x2d7   : > { %1924 = vmatpush1.msra.mxu0 %v1642_v31  ;;  %2034 = vmatprep.subr.mxu1 %v1653_v35  ;;  %v1569_v31 = vld [vmem:[%s10230_s4 + $0x18] sm:$0xff] }
 0x2d8   : > { %1925 = vmatprep.subr.mxu0 %v1635_v36  ;;  %2035 = vmatpush1.msra.mxu1 %v1652_v41  ;;  %v1589_v35 = vld [vmem:[%s10230_s4 + $0xb8] sm:$0x3]  ;;  %v6194_v41 = vld [vmem:[%s10231_s5 + $0x3c8] sm:$0xff] }
 0x2d9   : > { %6044 = vmatmul.mubr.msk.f32.gmra.mxu0 %vm1654_vm1, %v7443_v43  ;;  %6050 = vmatmul.mubr.msk.f32.gmra.mxu1 %vm1654_vm1, %v7392_v27  ;;  %v1581_v36 = vld [vmem:[%s10230_s4 + $0x78] sm:$0xff] }
 0x2da   : > { %1767 = vmatprep.mubr.f32.mxu0 %v10256_v16  ;;  %1868 = vmatprep.mubr.f32.mxu1 %v10256_v16 }
 0x2db   : > { %1926 = vmatpush1.msra.mxu0 %v1634_v45  ;;  %2036 = vmatprep.subr.mxu1 %v1645_v46  ;;  %v1580_v45 = vld [vmem:[%s10230_s4 + $0x70] sm:$0xff]  ;;  %v1573_v46 = vld [vmem:[%s10230_s4 + $0x38] sm:$0xff] }
 0x2dc   : > { %1927 = vmatprep.subr.mxu0 %v1627_v48  ;;  %2037 = vmatpush1.msra.mxu1 %v1644_v49  ;;  %v1572_v48 = vld [vmem:[%s10230_s4 + $0x30] sm:$0xff]  ;;  %v6196_v49 = vld [vmem:[%s10231_s5 + $0x3d8] sm:$0xff] }
 0x2dd   : > { %6045 = vmatmul.mubr.msk.f32.gmra.mxu0 %vm1654_vm1, %v7435_v42  ;;  %6051 = vmatmul.mubr.msk.f32.gmra.mxu1 %vm1654_vm1, %v7463_v47 }
 0x2de   : > { %1773 = vmatprep.mubr.f32.mxu0 %v10256_v16  ;;  %1874 = vmatprep.mubr.f32.mxu1 %v10256_v16 }
 0x2df   : > { %1928 = vmatpush1.msra.mxu0 %v1626_v51  ;;  %2038 = vmatprep.subr.mxu1 %v1637_v52  ;;  %v6193_v51 = vld [vmem:[%s10231_s5 + $0x3c0] sm:$0xff]  ;;  %v6186_v52 = vld [vmem:[%s10231_s5 + $0x388] sm:$0xff] }
 0x2e0   : > { %1929 = vmatprep.subr.mxu0 %v1619_v54  ;;  %2039 = vmatpush1.msra.mxu1 %v1636_v55  ;;  %v6185_v54 = vld [vmem:[%s10231_s5 + $0x380] sm:$0xff]  ;;  %v6178_v55 = vld [vmem:[%s10231_s5 + $0x348] sm:$0xff] }
 0x2e1   : > { %6046 = vmatmul.mubr.msk.f32.gmra.mxu0 %vm1654_vm1, %v7418_v37  ;;  %6052 = vmatmul.mubr.msk.f32.gmra.mxu1 %vm1654_vm1, %v7443_v43 }
 0x2e2   : > { %1779 = vmatprep.mubr.f32.mxu0 %v10256_v16  ;;  %1880 = vmatprep.mubr.f32.mxu1 %v10256_v16 }
 0x2e3   : > { %1930 = vmatpush1.msra.mxu0 %v1618_v56  ;;  %2040 = vmatprep.subr.mxu1 %v1629_v57  ;;  %v6195_v56 = vld [vmem:[%s10231_s5 + $0x3d0] sm:$0xff]  ;;  %v6177_v57 = vld [vmem:[%s10231_s5 + $0x340] sm:$0xff] }
 0x2e4   : > { %1931 = vmatprep.subr.mxu0 %v1611_v58  ;;  %2041 = vmatpush1.msra.mxu1 %v1628_v59  ;;  %v6188_v58 = vld [vmem:[%s10231_s5 + $0x398] sm:$0xff]  ;;  %v6170_v59 = vld [vmem:[%s10231_s5 + $0x308] sm:$0xff] }
 0x2e5   : > { %6047 = vmatmul.mubr.msk.f32.gmra.mxu0 %vm1654_vm1, %v7491_v53  ;;  %6053 = vmatmul.mubr.msk.f32.gmra.mxu1 %vm1654_vm1, %v7435_v42 }
 0x2e6   : > { %1785 = vmatprep.mubr.f32.mxu0 %v10256_v16  ;;  %1886 = vmatprep.mubr.f32.mxu1 %v10256_v16 }
 0x2e7   : > { %1932 = vmatpush1.msra.mxu0 %v1610_v60  ;;  %2042 = vmatprep.subr.mxu1 %v1621_v61  ;;  %v6187_v60 = vld [vmem:[%s10231_s5 + $0x390] sm:$0xff]  ;;  %v6180_v61 = vld [vmem:[%s10231_s5 + $0x358] sm:$0xff] }
 0x2e8   : > { %1933 = vmatprep.subr.mxu0 %v1603_v62  ;;  %2043 = vmatpush1.msra.mxu1 %v1620_v63  ;;  %v6162_v62 = vld [vmem:[%s10231_s5 + $0x2c8] sm:$0xff]  ;;  %v6179_v63 = vld [vmem:[%s10231_s5 + $0x350] sm:$0xff] }
 0x2e9   : > { %6048 = vmatmul.mubr.msk.f32.gmra.mxu0 %vm1654_vm1, %v7478_v50  ;;  %6054 = vmatmul.mubr.msk.f32.gmra.mxu1 %vm1654_vm1, %v7418_v37 }
 0x2ea   : > { %1934 = vmatpush1.msra.mxu0 %v1602_v0  ;;  %1892 = vmatprep.mubr.f32.mxu1 %v10256_v16  ;;  %v6172_v0 = vld [vmem:[%s10231_s5 + $0x318] sm:$0xff] }
 0x2eb   : > { %1935 = vmatprep.subr.mxu0 %v1595_v1  ;;  %1969 = vmatprep.mubr.f32.mxu0 %v10256_v16  ;;  %v6154_v1 = vld [vmem:[%s10231_s5 + $0x288] sm:$0xff] }
 0x2ec   : > { %1936 = vmatpush1.msra.mxu0 %v1594_v2  ;;  %2044 = vmatprep.subr.mxu1 %v1613_v3  ;;  %v6171_v2 = vld [vmem:[%s10231_s5 + $0x310] sm:$0xff]  ;;  %v6164_v3 = vld [vmem:[%s10231_s5 + $0x2d8] sm:$0xff] }
 0x2ed   : > { %6055 = vmatmul.mubr.msk.f32.gmra.mxu1 %vm1654_vm1, %v7491_v53  ;;  %6057 = vmatmul.mubr.msk.f32.vlgmr.msra.gmra.mxu0 %vm1654_vm1, %v7410_v34 }
 0x2ee   : > { %1898 = vmatprep.mubr.f32.mxu1 %v10256_v16  ;;  %1975 = vmatprep.mubr.f32.mxu0 %v10256_v16 }
 0x2ef   : > { %2045 = vmatpush1.msra.mxu1 %v1612_v4  ;;  %6073 = vmatprep.subr.msk.mxu0 %vm2156_vm2, %v1583_v5  ;;  %v6146_v4 = vld [vmem:[%s10231_s5 + $0x248] sm:$0xff]  ;;  %v6163_v5 = vld [vmem:[%s10231_s5 + $0x2d0] sm:$0xff] }
 0x2f0   : > { %2046 = vmatprep.subr.mxu1 %v1605_v6  ;;  %6074 = vmatpush1.msk.msra.mxu0 %vm2156_vm2, %v1582_v7  ;;  %v6156_v6 = vld [vmem:[%s10231_s5 + $0x298] sm:$0xff]  ;;  %v6138_v7 = vld [vmem:[%s10231_s5 + $0x208] sm:$0xff] }
 0x2f1   : > { %6056 = vmatmul.mubr.msk.f32.gmra.mxu1 %vm1654_vm1, %v7478_v50  ;;  %6058 = vmatmul.mubr.msk.f32.gmra.mxu0 %vm1654_vm1, %v7392_v27 }
 0x2f2   : > { %2047 = vmatpush1.msra.mxu1 %v1604_v14  ;;  %1981 = vmatprep.mubr.f32.mxu0 %v10256_v16  ;;  %v6155_v14 = vld [vmem:[%s10231_s5 + $0x290] sm:$0xff] }
 0x2f3   : > { %2048 = vmatprep.subr.mxu1 %v1597_v15  ;;  %2082 = vmatprep.mubr.f32.mxu1 %v10256_v16  ;;  %v6137_v15 = vld [vmem:[%s10231_s5 + $0x200] sm:$0xff] }
 0x2f4   : > { %2049 = vmatpush1.msra.mxu1 %v1596_v17  ;;  %2209 = vmatprep.subr.mxu0 %v1575_v18  ;;  %v6147_v17 = vld [vmem:[%s10231_s5 + $0x250] sm:$0xff]  ;;  %v6140_v18 = vld [vmem:[%s10231_s5 + $0x218] sm:$0xff] }
 0x2f5   : > { %6059 = vmatmul.mubr.msk.f32.gmra.mxu0 %vm1654_vm1, %v7463_v47  ;;  %6065 = vmatmul.mubr.msk.f32.vlgmr.msra.gmra.mxu1 %vm1654_vm1, %v7410_v34  ;;  %v1566_v34 = vld [vmem:[%s10230_s4] sm:$0xff] }
 0x2f6   : > { %1987 = vmatprep.mubr.f32.mxu0 %v10256_v16  ;;  %2088 = vmatprep.mubr.f32.mxu1 %v10256_v16 }
 0x2f7   : > { %2210 = vmatpush1.msra.mxu0 %v1574_v19  ;;  %6083 = vmatprep.subr.msk.mxu1 %vm2156_vm2, %v1585_v21  ;;  %v6139_v19 = vld [vmem:[%s10231_s5 + $0x210] sm:$0xff]  ;;  %v6200_v21 = vld [vmem:[%s10231_s5 + $0x3f8] sm:$0xff] }
 0x2f8   : > { %2211 = vmatprep.subr.mxu0 %v1567_v22  ;;  %6084 = vmatpush1.msk.msra.mxu1 %vm2156_vm2, %v1584_v23  ;;  %v6986_v23 = vmov 1  }
 0x2f9   : > { %6060 = vmatmul.mubr.msk.f32.gmra.mxu0 %vm1654_vm1, %v7443_v43  ;;  %6066 = vmatmul.mubr.msk.f32.gmra.mxu1 %vm1654_vm1, %v7392_v27  ;;  %v1568_v27 = vld [vmem:[%s10230_s4 + $0x10] sm:$0xff] }
 0x2fa   : > { %1993 = vmatprep.mubr.f32.mxu0 %v10256_v16  ;;  %2094 = vmatprep.mubr.f32.mxu1 %v10256_v16 }
 0x2fb   : > { %2212 = vmatpush1.msra.mxu0 %v1566_v34  ;;  %2322 = vmatprep.subr.mxu1 %v1577_v26  ;;  %v8057_v34 = vld [vmem:[%s10229_s3 + $0x8] sm:$0xff] }
 0x2fc   : > { %2323 = vmatpush1.msra.mxu1 %v1576_v28  ;;  %6093 = vmatprep.subr.msk.mxu0 %vm2156_vm2, %v1587_v30  ;;  %v6987_v28 = vmov 0  }
 0x2fd   : > { %6061 = vmatmul.mubr.msk.f32.gmra.mxu0 %vm1654_vm1, %v7435_v42  ;;  %6067 = vmatmul.mubr.msk.f32.gmra.mxu1 %vm1654_vm1, %v7463_v47  ;;  %v1571_v47 = vld [vmem:[%s10230_s4 + $0x28] sm:$0xff] }
 0x2fe   : > { %1999 = vmatprep.mubr.f32.mxu0 %v10256_v16  ;;  %2100 = vmatprep.mubr.f32.mxu1 %v10256_v16 }
 0x2ff   : > { %2324 = vmatprep.subr.mxu1 %v1569_v31  ;;  %6657 = vset.pattern.permute.xlu1 %v6986_v23 }
 0x300   : > { %2325 = vmatpush1.msra.mxu1 %v1568_v27  ;;  %4287 = vperm.xlu1 %6657, %v8057_v34  }
 0x301   : > { %6062 = vmatmul.mubr.msk.f32.gmra.mxu0 %vm1654_vm1, %v7418_v37  ;;  %6068 = vmatmul.mubr.msk.f32.gmra.mxu1 %vm1654_vm1, %v7443_v43  ;;  %v1586_v43 = vld [vmem:[%s10230_s4 + $0xa0] sm:$0x3] }
 0x302   : > { %2005 = vmatprep.mubr.f32.mxu0 %v10256_v16  ;;  %2106 = vmatprep.mubr.f32.mxu1 %v10256_v16 }
 0x303   : > { %6103 = vmatprep.subr.msk.mxu1 %vm2156_vm2, %v1589_v35  ;;  %6656 = vset.pattern.permute.xlu0 %v6987_v28 }
 0x304   : > { %6658 = vset.pattern.permute.xlu1 %v6987_v28  ;;  %4271 = vperm.xlu0 %6656, %v8057_v34  }
 0x305   : > { %6063 = vmatmul.mubr.msk.f32.gmra.mxu0 %vm1654_vm1, %v7491_v53  ;;  %6069 = vmatmul.mubr.msk.f32.gmra.mxu1 %vm1654_vm1, %v7435_v42  ;;  %v1579_v42 = vld [vmem:[%s10230_s4 + $0x68] sm:$0xff] }
 0x306   : > { %2011 = vmatprep.mubr.f32.mxu0 %v10256_v16  ;;  %2112 = vmatprep.mubr.f32.mxu1 %v10256_v16 }
 0x309   : > { %6064 = vmatmul.mubr.msk.f32.gmra.mxu0 %vm1654_vm1, %v7478_v50  ;;  %6070 = vmatmul.mubr.msk.f32.gmra.mxu1 %vm1654_vm1, %v7418_v37  ;;  %v1578_v37 = vld [vmem:[%s10230_s4 + $0x60] sm:$0xff] }
 0x30a   : > { %2118 = vmatprep.mubr.f32.mxu1 %v10256_v16  ;;  %2245 = vmatprep.mubr.f32.mxu0 %v10256_v16 }
 0x30d   : > { %6071 = vmatmul.mubr.msk.f32.gmra.mxu1 %vm1654_vm1, %v7491_v53  ;;  %6075 = vmatmul.mubr.msk.f32.vlgmr.msra.gmra.mxu0 %vm2131_vm3, %v7356_v9  ;;  %v1570_v53 = vld [vmem:[%s10230_s4 + $0x20] sm:$0xff] }
 0x30e   : > { %2124 = vmatprep.mubr.f32.mxu1 %v10256_v16  ;;  %2251 = vmatprep.mubr.f32.mxu0 %v10256_v16 }
 0x30f   : > { %6094 = vmatpush1.msk.msra.mxu0 %vm2156_vm2, %v1586_v43 }
 0x310   : > { %2435 = vmatprep.subr.mxu0 %v1579_v42  ;;  %v6197_v42 = vld [vmem:[%s10231_s5 + $0x3e0] sm:$0xff] }
 0x311   : > { %6072 = vmatmul.mubr.msk.f32.gmra.mxu1 %vm1654_vm1, %v7478_v50  ;;  %6076 = vmatmul.mubr.msk.f32.gmra.mxu0 %vm2131_vm3, %v7352_v8  ;;  %v1588_v50 = vld [vmem:[%s10230_s4 + $0xb0] sm:$0x3] }
 0x312   : > { %2257 = vmatprep.mubr.f32.mxu0 %v10256_v16  ;;  %2358 = vmatprep.mubr.f32.mxu1 %v10256_v16 }
 0x313   : > { %2436 = vmatpush1.msra.mxu0 %v1578_v37  ;;  %v6199_v37 = vld [vmem:[%s10231_s5 + $0x3f0] sm:$0xff] }
 0x314   : > { %2437 = vmatprep.subr.mxu0 %v1571_v47  ;;  %v6190_v47 = vld [vmem:[%s10231_s5 + $0x3a8] sm:$0xff] }
 0x315   : > { %6077 = vmatmul.mubr.msk.f32.gmra.mxu0 %vm2131_vm3, %v7371_v12  ;;  %6085 = vmatmul.mubr.msk.f32.vlgmr.msra.gmra.mxu1 %vm2131_vm3, %v7356_v9 }
 0x316   : > { %2263 = vmatprep.mubr.f32.mxu0 %v10256_v16  ;;  %2364 = vmatprep.mubr.f32.mxu1 %v10256_v16 }
 0x317   : > { %2438 = vmatpush1.msra.mxu0 %v1570_v53  ;;  %6104 = vmatpush1.msk.msra.mxu1 %vm2156_vm2, %v1588_v50  ;;  %v6192_v53 = vld [vmem:[%s10231_s5 + $0x3b8] sm:$0xff] }
 0x318   : > { %2548 = vmatprep.subr.mxu1 %v1581_v36  ;;  %2775 = vmatprep.subr.mxu0 %v6194_v41  ;;  %v6189_v36 = vld [vmem:[%s10231_s5 + $0x3a0] sm:$0xff]  ;;  %v6191_v41 = vld [vmem:[%s10231_s5 + $0x3b0] sm:$0xff] }
 0x319   : > { %6078 = vmatmul.mubr.msk.f32.gmra.mxu0 %vm2131_vm3, %v7366_v11  ;;  %6086 = vmatmul.mubr.msk.f32.gmra.mxu1 %vm2131_vm3, %v7352_v8 }
 0x31a   : > { %2269 = vmatprep.mubr.f32.mxu0 %v10256_v16  ;;  %2370 = vmatprep.mubr.f32.mxu1 %v10256_v16 }
 0x31b   : > { %2549 = vmatpush1.msra.mxu1 %v1580_v45 }
 0x31c   : > { %2550 = vmatprep.subr.mxu1 %v1573_v46  ;;  %v6182_v46 = vld [vmem:[%s10231_s5 + $0x368] sm:$0xff] }
 0x31d   : > { %6079 = vmatmul.mubr.msk.f32.gmra.mxu0 %vm2131_vm3, %v7386_v25  ;;  %6087 = vmatmul.mubr.msk.f32.gmra.mxu1 %vm2131_vm3, %v7371_v12 }
 0x31e   : > { %2275 = vmatprep.mubr.f32.mxu0 %v10256_v16  ;;  %2376 = vmatprep.mubr.f32.mxu1 %v10256_v16 }
 0x31f   : > { %2551 = vmatpush1.msra.mxu1 %v1572_v48  ;;  %v6184_v48 = vld [vmem:[%s10231_s5 + $0x378] sm:$0xff] }
 0x320   : > { %2888 = vmatprep.subr.mxu1 %v6196_v49  ;;  %v6181_v49 = vld [vmem:[%s10231_s5 + $0x360] sm:$0xff] }
 0x321   : > { %6080 = vmatmul.mubr.msk.f32.gmra.mxu0 %vm2131_vm3, %v7362_v10  ;;  %6088 = vmatmul.mubr.msk.f32.gmra.mxu1 %vm2131_vm3, %v7366_v11 }
 0x322   : > { %2281 = vmatprep.mubr.f32.mxu0 %v10256_v16  ;;  %2382 = vmatprep.mubr.f32.mxu1 %v10256_v16 }
 0x325   : > { %6081 = vmatmul.mubr.msk.f32.gmra.mxu0 %vm2131_vm3, %v7426_v39  ;;  %6089 = vmatmul.mubr.msk.f32.gmra.mxu1 %vm2131_vm3, %v7386_v25 }
 0x326   : > { %2287 = vmatprep.mubr.f32.mxu0 %v10256_v16  ;;  %2388 = vmatprep.mubr.f32.mxu1 %v10256_v16 }
 0x329   : > { %6082 = vmatmul.mubr.msk.f32.gmra.mxu0 %vm2131_vm3, %v7376_v13  ;;  %6090 = vmatmul.mubr.msk.f32.gmra.mxu1 %vm2131_vm3, %v7362_v10 }
 0x32a   : > { %2394 = vmatprep.mubr.f32.mxu1 %v10256_v16  ;;  %2471 = vmatprep.mubr.f32.mxu0 %v10256_v16 }
 0x32d   : > { %6091 = vmatmul.mubr.msk.f32.gmra.mxu1 %vm2131_vm3, %v7426_v39  ;;  %6095 = vmatmul.mubr.msk.f32.vlgmr.msra.gmra.mxu0 %vm2131_vm3, %v7356_v9 }
 0x32e   : > { %2400 = vmatprep.mubr.f32.mxu1 %v10256_v16  ;;  %2477 = vmatprep.mubr.f32.mxu0 %v10256_v16 }
 0x32f   : > { %2776 = vmatpush1.msra.mxu0 %v6193_v51  ;;  %v6183_v51 = vld [vmem:[%s10231_s5 + $0x370] sm:$0xff] }
 0x330   : > { %2777 = vmatprep.subr.mxu0 %v6186_v52  ;;  %v6174_v52 = vld [vmem:[%s10231_s5 + $0x328] sm:$0xff] }
 0x331   : > { %6092 = vmatmul.mubr.msk.f32.gmra.mxu1 %vm2131_vm3, %v7376_v13  ;;  %6096 = vmatmul.mubr.msk.f32.gmra.mxu0 %vm2131_vm3, %v7352_v8 }
 0x332   : > { %2483 = vmatprep.mubr.f32.mxu0 %v10256_v16  ;;  %2584 = vmatprep.mubr.f32.mxu1 %v10256_v16 }
 0x333   : > { %2778 = vmatpush1.msra.mxu0 %v6185_v54  ;;  %v6176_v54 = vld [vmem:[%s10231_s5 + $0x338] sm:$0xff] }
 0x334   : > { %2779 = vmatprep.subr.mxu0 %v6178_v55  ;;  %v6173_v55 = vld [vmem:[%s10231_s5 + $0x320] sm:$0xff] }
 0x335   : > { %6097 = vmatmul.mubr.msk.f32.gmra.mxu0 %vm2131_vm3, %v7371_v12  ;;  %6105 = vmatmul.mubr.msk.f32.vlgmr.msra.gmra.mxu1 %vm2131_vm3, %v7356_v9  ;;  %v6169_v9 = vld [vmem:[%s10231_s5 + $0x300] sm:$0xff] }
 0x336   : > { %2489 = vmatprep.mubr.f32.mxu0 %v10256_v16  ;;  %2590 = vmatprep.mubr.f32.mxu1 %v10256_v16 }
 0x337   : > { %2889 = vmatpush1.msra.mxu1 %v6195_v56  ;;  %2780 = vmatpush1.msra.mxu0 %v6177_v57  ;;  %v6175_v56 = vld [vmem:[%s10231_s5 + $0x330] sm:$0xff] }
 0x338   : > { %2890 = vmatprep.subr.mxu1 %v6188_v58  ;;  %2781 = vmatprep.subr.mxu0 %v6170_v59  ;;  %v6166_v59 = vld [vmem:[%s10231_s5 + $0x2e8] sm:$0xff] }
 0x339   : > { %6098 = vmatmul.mubr.msk.f32.gmra.mxu0 %vm2131_vm3, %v7366_v11  ;;  %6106 = vmatmul.mubr.msk.f32.gmra.mxu1 %vm2131_vm3, %v7352_v8  ;;  %v6161_v8 = vld [vmem:[%s10231_s5 + $0x2c0] sm:$0xff] }
 0x33a   : > { %2495 = vmatprep.mubr.f32.mxu0 %v10256_v16  ;;  %2596 = vmatprep.mubr.f32.mxu1 %v10256_v16 }
 0x33b   : > { %2891 = vmatpush1.msra.mxu1 %v6187_v60  ;;  %2782 = vmatpush1.msra.mxu0 %v6169_v9  ;;  %v6168_v60 = vld [vmem:[%s10231_s5 + $0x2f8] sm:$0xff]  ;;  %v6165_v9 = vld [vmem:[%s10231_s5 + $0x2e0] sm:$0xff] }
 0x33c   : > { %2892 = vmatprep.subr.mxu1 %v6180_v61  ;;  %2783 = vmatprep.subr.mxu0 %v6162_v62  ;;  %v6167_v61 = vld [vmem:[%s10231_s5 + $0x2f0] sm:$0xff] }
 0x33d   : > { %6099 = vmatmul.mubr.msk.f32.gmra.mxu0 %vm2131_vm3, %v7386_v25  ;;  %6107 = vmatmul.mubr.msk.f32.gmra.mxu1 %vm2131_vm3, %v7371_v12  ;;  %v6153_v12 = vld [vmem:[%s10231_s5 + $0x280] sm:$0xff] }
 0x33e   : > { %2501 = vmatprep.mubr.f32.mxu0 %v10256_v16  ;;  %2602 = vmatprep.mubr.f32.mxu1 %v10256_v16 }
 0x33f   : > { %2893 = vmatpush1.msra.mxu1 %v6179_v63  ;;  %2784 = vmatpush1.msra.mxu0 %v6161_v8  ;;  %v6158_v63 = vld [vmem:[%s10231_s5 + $0x2a8] sm:$0xff]  ;;  %v6160_v8 = vld [vmem:[%s10231_s5 + $0x2b8] sm:$0xff] }
 0x340   : > { %2894 = vmatprep.subr.mxu1 %v6172_v0  ;;  %2785 = vmatprep.subr.mxu0 %v6154_v1  ;;  %v6157_v0 = vld [vmem:[%s10231_s5 + $0x2a0] sm:$0xff]  ;;  %v6159_v1 = vld [vmem:[%s10231_s5 + $0x2b0] sm:$0xff] }
 0x341   : > { %6100 = vmatmul.mubr.msk.f32.gmra.mxu0 %vm2131_vm3, %v7362_v10  ;;  %6108 = vmatmul.mubr.msk.f32.gmra.mxu1 %vm2131_vm3, %v7366_v11  ;;  %v6145_v11 = vld [vmem:[%s10231_s5 + $0x240] sm:$0xff] }
 0x342   : > { %2507 = vmatprep.mubr.f32.mxu0 %v10256_v16  ;;  %2608 = vmatprep.mubr.f32.mxu1 %v10256_v16 }
 0x343   : > { %2895 = vmatpush1.msra.mxu1 %v6171_v2  ;;  %2786 = vmatpush1.msra.mxu0 %v6153_v12  ;;  %v6150_v12 = vld [vmem:[%s10231_s5 + $0x268] sm:$0xff] }
 0x344   : > { %2896 = vmatprep.subr.mxu1 %v6164_v3  ;;  %2787 = vmatprep.subr.mxu0 %v6146_v4  ;;  %v6152_v3 = vld [vmem:[%s10231_s5 + $0x278] sm:$0xff]  ;;  %v6149_v4 = vld [vmem:[%s10231_s5 + $0x260] sm:$0xff] }
 0x345   : > { %6101 = vmatmul.mubr.msk.f32.gmra.mxu0 %vm2131_vm3, %v7426_v39  ;;  %6109 = vmatmul.mubr.msk.f32.gmra.mxu1 %vm2131_vm3, %v7386_v25  ;;  %v6148_v25 = vld [vmem:[%s10231_s5 + $0x258] sm:$0xff] }
 0x346   : > { %2513 = vmatprep.mubr.f32.mxu0 %v10256_v16  ;;  %2614 = vmatprep.mubr.f32.mxu1 %v10256_v16 }
 0x347   : > { %2897 = vmatpush1.msra.mxu1 %v6163_v5  ;;  %2788 = vmatpush1.msra.mxu0 %v6145_v11  ;;  %v6151_v5 = vld [vmem:[%s10231_s5 + $0x270] sm:$0xff] }
 0x348   : > { %2898 = vmatprep.subr.mxu1 %v6156_v6  ;;  %2789 = vmatprep.subr.mxu0 %v6138_v7  ;;  %v6142_v7 = vld [vmem:[%s10231_s5 + $0x228] sm:$0xff] }
 0x349   : > { %6102 = vmatmul.mubr.msk.f32.gmra.mxu0 %vm2131_vm3, %v7376_v13  ;;  %6110 = vmatmul.mubr.msk.f32.gmra.mxu1 %vm2131_vm3, %v7362_v10  ;;  %v6198_v10 = vld [vmem:[%s10231_s5 + $0x3e8] sm:$0xff] }
 0x34a   : > { %2620 = vmatprep.mubr.f32.mxu1 %v10256_v16  ;;  %2899 = vmatpush1.msra.mxu1 %v6155_v14  ;;  %v6144_v14 = vld [vmem:[%s10231_s5 + $0x238] sm:$0xff] }
 0x34b   : > { %2900 = vmatprep.subr.mxu1 %v6148_v25  ;;  %2790 = vmatpush1.msra.mxu0 %v6137_v15  ;;  %v6141_v15 = vld [vmem:[%s10231_s5 + $0x220] sm:$0xff] }
 0x34c   : > { %2901 = vmatpush1.msra.mxu1 %v6147_v17  ;;  %2823 = vmatprep.mubr.f32.mxu0 %v10256_v16  ;;  %v6143_v17 = vld [vmem:[%s10231_s5 + $0x230] sm:$0xff] }
 0x34d   : > { %6111 = vmatmul.mubr.msk.f32.gmra.mxu1 %vm2131_vm3, %v7426_v39  ;;  %2902 = vmatprep.subr.mxu1 %v6140_v18 }
 0x34e   : > { %2626 = vmatprep.mubr.f32.mxu1 %v10256_v16  ;;  %2903 = vmatpush1.msra.mxu1 %v6139_v19 }
 0x34f   : > { %3001 = vmatprep.subr.mxu0 %v6198_v10  ;;  %3114 = vmatprep.subr.mxu1 %v6200_v21  ;;  %v6130_v10 = vld [vmem:[%s10230_s4 + $0x148] sm:$0x3]  ;;  %v6132_v21 = vld [vmem:[%s10230_s4 + $0x158] sm:$0x3] }
 0x351   : > { %6112 = vmatmul.mubr.msk.f32.gmra.mxu1 %vm2131_vm3, %v7376_v13  ;;  %v8067_v13 = vld [vmem:[%s10229_s3] sm:$0xff] }
 0x352   : > { %2936 = vmatprep.mubr.f32.mxu1 %v10256_v16  ;;  %4266 = vperm.xlu1 %6658, %v8067_v13  }
 0x356   : > { %6659 = vset.pattern.permute.xlu1 %v6986_v23 }
 0x357   : > { %4283 = vperm.xlu1 %6659, %v8067_v13  }
 0x367   : > { %v8052_v22 = vpop.f32.mrf.mxu0 }
 0x369   : > { %v8060_v39 = vpop.f32.mrf.mxu0 }
 0x370   : > { %v8062_v26 = vpop.f32.mrf.mxu0 }
 0x372   : > { %v8071_v30 = vpop.f32.mrf.mxu0 }
 0x374   : > { %v8073_v31 = vpop.f32.mrf.mxu1 }
 0x375   : > { %v8075_v27 = vpop.f32.mrf.mxu0 }
 0x376   : > { %v8077_v35 = vpop.f32.mrf.mxu1 }
 0x377   : > { %v8080_v43 = vpop.f32.mrf.mxu0 }
 0x378   : > { %6201 = vmatmul.mubr.msk.f32.vlgmr.msra.gmra.mxu0 %vm1654_vm1, %v8080_v43  ;;  %6209 = vmatmul.mubr.msk.f32.vlgmr.msra.gmra.mxu1 %vm1654_vm1, %v8080_v43 }
 0x379   : > { %2829 = vmatprep.mubr.f32.mxu0 %v10256_v16  ;;  %2942 = vmatprep.mubr.f32.mxu1 %v10256_v16 }
 0x37a   : > { %v8100_v50 = vpop.f32.mrf.mxu1  ;;  %3002 = vmatpush1.msra.mxu0 %v6197_v42  ;;  %3115 = vmatpush1.msra.mxu1 %v6199_v37  ;;  %v6988_v37 = vmov 2  }
 0x37b   : > { %3003 = vmatprep.subr.mxu0 %v6190_v47  ;;  %3116 = vmatprep.subr.mxu1 %v6192_v53  ;;  %v8162_v62 = vpop.f32.mrf.mxu0  ;;  %v6989_v47 = vmov 4  }
 0x37c   : > { %v8108_v45 = vpop.f32.mrf.mxu1  ;;  %6202 = vmatmul.mubr.msk.f32.gmra.mxu0 %vm1654_vm1, %v8075_v27  ;;  %6210 = vmatmul.mubr.msk.f32.gmra.mxu1 %vm1654_vm1, %v8075_v27 }
 0x37d   : > { %2835 = vmatprep.mubr.f32.mxu0 %v10256_v16  ;;  %2948 = vmatprep.mubr.f32.mxu1 %v10256_v16  ;;  %v8182_v2 = vpop.f32.mrf.mxu0 }
 0x37e   : > { %3004 = vmatpush1.msra.mxu0 %v6189_v36  ;;  %3117 = vmatpush1.msra.mxu1 %v6191_v41 }
 0x37f   : > { %3005 = vmatprep.subr.mxu0 %v6182_v46  ;;  %3118 = vmatprep.subr.mxu1 %v6184_v48  ;;  %v6129_v48 = vld [vmem:[%s10230_s4 + $0x140] sm:$0x3] }
 0x380   : > { %v8140_v57 = vpop.f32.mrf.mxu1  ;;  %3006 = vmatpush1.msra.mxu0 %v6181_v49  ;;  %3119 = vmatpush1.msra.mxu1 %v6183_v51  ;;  %v6131_v49 = vld [vmem:[%s10230_s4 + $0x150] sm:$0x3] }
 0x381   : > { %3007 = vmatprep.subr.mxu0 %v6174_v52  ;;  %3120 = vmatprep.subr.mxu1 %v6176_v54  ;;  %v6122_v54 = vld [vmem:[%s10230_s4 + $0x108] sm:$0xff] }
 0x382   : > { %v8142_v58 = vpop.f32.mrf.mxu1  ;;  %3008 = vmatpush1.msra.mxu0 %v6173_v55  ;;  %3121 = vmatpush1.msra.mxu1 %v6175_v56  ;;  %v6124_v55 = vld [vmem:[%s10230_s4 + $0x118] sm:$0xff] }
 0x383   : > { %6203 = vmatmul.mubr.msk.f32.gmra.mxu0 %vm1654_vm1, %v8142_v58  ;;  %6211 = vmatmul.mubr.msk.f32.gmra.mxu1 %vm1654_vm1, %v8142_v58 }
 0x384   : > { %2841 = vmatprep.mubr.f32.mxu0 %v10256_v16  ;;  %2954 = vmatprep.mubr.f32.mxu1 %v10256_v16 }
 0x385   : > { %3009 = vmatprep.subr.mxu0 %v6166_v59  ;;  %3122 = vmatprep.subr.mxu1 %v6168_v60  ;;  %v8204_v6 = vpop.f32.mrf.mxu1  ;;  %v6123_v60 = vld [vmem:[%s10230_s4 + $0x110] sm:$0xff] }
 0x386   : > { %3010 = vmatpush1.msra.mxu0 %v6165_v9  ;;  %3123 = vmatpush1.msra.mxu1 %v6167_v61 }
 0x387   : > { %6204 = vmatmul.mubr.msk.f32.gmra.mxu0 %vm1654_vm1, %v8140_v57  ;;  %6212 = vmatmul.mubr.msk.f32.gmra.mxu1 %vm1654_vm1, %v8140_v57  ;;  %v8228_v19 = vpop.f32.mrf.mxu1 }
 0x388   : > { %2847 = vmatprep.mubr.f32.mxu0 %v10256_v16  ;;  %2960 = vmatprep.mubr.f32.mxu1 %v10256_v16 }
 0x389   : > { %3011 = vmatprep.subr.mxu0 %v6158_v63  ;;  %3124 = vmatprep.subr.mxu1 %v6160_v8  ;;  %v6114_v63 = vld [vmem:[%s10230_s4 + $0xc8] sm:$0xff]  ;;  %v6116_v8 = vld [vmem:[%s10230_s4 + $0xd8] sm:$0xff] }
 0x38a   : > { %3012 = vmatpush1.msra.mxu0 %v6157_v0  ;;  %3125 = vmatpush1.msra.mxu1 %v6159_v1 }
 0x38b   : > { %6205 = vmatmul.mubr.msk.f32.gmra.mxu0 %vm1654_vm1, %v8182_v2  ;;  %6213 = vmatmul.mubr.msk.f32.gmra.mxu1 %vm1654_vm1, %v8182_v2 }
 0x38c   : > { %2853 = vmatprep.mubr.f32.mxu0 %v10256_v16  ;;  %2966 = vmatprep.mubr.f32.mxu1 %v10256_v16 }
 0x38d   : > { %v8202_v11 = vpop.f32.mrf.mxu0  ;;  %3013 = vmatprep.subr.mxu0 %v6150_v12  ;;  %3126 = vmatprep.subr.mxu1 %v6152_v3  ;;  %v6115_v12 = vld [vmem:[%s10230_s4 + $0xd0] sm:$0xff] }
 0x38e   : > { %3014 = vmatpush1.msra.mxu0 %v6149_v4  ;;  %3127 = vmatpush1.msra.mxu1 %v6151_v5  ;;  %v6134_v5 = vld [vmem:[%s10230_s4 + $0x168] sm:$0x3] }
 0x38f   : > { %v8212_v25 = vpop.f32.mrf.mxu0  ;;  %6206 = vmatmul.mubr.msk.f32.gmra.mxu0 %vm1654_vm1, %v8162_v62  ;;  %6214 = vmatmul.mubr.msk.f32.gmra.mxu1 %vm1654_vm1, %v8162_v62 }
 0x390   : > { %2859 = vmatprep.mubr.f32.mxu0 %v10256_v16  ;;  %2972 = vmatprep.mubr.f32.mxu1 %v10256_v16 }
 0x391   : > { %v8226_v18 = vpop.f32.mrf.mxu0  ;;  %3015 = vmatprep.subr.mxu0 %v6142_v7  ;;  %3128 = vmatprep.subr.mxu1 %v6144_v14  ;;  %v6136_v7 = vld [vmem:[%s10230_s4 + $0x178] sm:$0x3] }
 0x392   : > { %3016 = vmatpush1.msra.mxu0 %v6141_v15  ;;  %3129 = vmatpush1.msra.mxu1 %v6143_v17 }
 0x393   : > { %v8236_v23 = vpop.f32.mrf.mxu0  ;;  %6207 = vmatmul.mubr.msk.f32.gmra.mxu0 %vm1654_vm1, %v8228_v19  ;;  %6215 = vmatmul.mubr.msk.f32.gmra.mxu1 %vm1654_vm1, %v8228_v19 }
 0x394   : > { %2865 = vmatprep.mubr.f32.mxu0 %v10256_v16  ;;  %2978 = vmatprep.mubr.f32.mxu1 %v10256_v16 }
 0x395   : > { %v8244_v28 = vpop.f32.mrf.mxu0  ;;  %v8246_v42 = vpop.f32.mrf.mxu1  ;;  %6233 = vmatprep.subr.msk.mxu0 %vm2156_vm2, %v6130_v10  ;;  %6243 = vmatprep.subr.msk.mxu1 %vm2156_vm2, %v6132_v21 }
 0x396   : > { %6660 = vset.pattern.permute.xlu1 %v6988_v37  ;;  %6663 = vset.pattern.permute.xlu0 %v6989_v47  ;;  %v10254_v37 = vmov 6  }
 0x397   : > { %v8251_v53 = vpop.f32.mrf.mxu0  ;;  %v8253_v36 = vpop.f32.mrf.mxu1  ;;  %6208 = vmatmul.mubr.msk.f32.gmra.mxu0 %vm1654_vm1, %v8204_v6  ;;  %6216 = vmatmul.mubr.msk.f32.gmra.mxu1 %vm1654_vm1, %v8204_v6 }
 0x398   : > { %3049 = vmatprep.mubr.f32.mxu0 %v10256_v16  ;;  %3162 = vmatprep.mubr.f32.mxu1 %v10256_v16 }
 0x399   : > { %v8261_v41 = vpop.f32.mrf.mxu0  ;;  %v8263_v46 = vpop.f32.mrf.mxu1  ;;  %4311 = vperm.xlu1 %6660, %v8057_v34   ;;  %4355 = vperm.xlu0 %6663, %v8067_v13  }
 0x39b   : > { %v8273_v51 = vpop.f32.mrf.mxu0  ;;  %v8275_v52 = vpop.f32.mrf.mxu1  ;;  %6217 = vmatmul.mubr.msk.f32.vlgmr.msra.gmra.mxu0 %vm1654_vm1, %v8080_v43  ;;  %6225 = vmatmul.mubr.msk.f32.vlgmr.msra.gmra.mxu1 %vm1654_vm1, %v8080_v43  ;;  %v6121_v43 = vld [vmem:[%s10230_s4 + $0x100] sm:$0xff] }
 0x39c   : > { %3055 = vmatprep.mubr.f32.mxu0 %v10256_v16  ;;  %3168 = vmatprep.mubr.f32.mxu1 %v10256_v16 }
 0x39d   : > { %v8289_v56 = vpop.f32.mrf.mxu0  ;;  %v8291_v59 = vpop.f32.mrf.mxu1  ;;  %6234 = vmatpush1.msk.msra.mxu0 %vm2156_vm2, %v6129_v48  ;;  %6244 = vmatpush1.msk.msra.mxu1 %vm2156_vm2, %v6131_v49 }
 0x39e   : > { %3287 = vmatprep.subr.mxu0 %v6122_v54  ;;  %3400 = vmatprep.subr.mxu1 %v6124_v55  ;;  %v6991_v55 = vmov 3  }
 0x39f   : > { %v8301_v9 = vpop.f32.mrf.mxu0  ;;  %v8303_v61 = vpop.f32.mrf.mxu1  ;;  %6218 = vmatmul.mubr.msk.f32.gmra.mxu0 %vm1654_vm1, %v8075_v27  ;;  %6226 = vmatmul.mubr.msk.f32.gmra.mxu1 %vm1654_vm1, %v8075_v27  ;;  %v6113_v27 = vld [vmem:[%s10230_s4 + $0xc0] sm:$0xff] }
 0x3a0   : > { %3061 = vmatprep.mubr.f32.mxu0 %v10256_v16  ;;  %3174 = vmatprep.mubr.f32.mxu1 %v10256_v16 }
 0x3a1   : > { %v8317_v0 = vpop.f32.mrf.mxu0  ;;  %v8319_v1 = vpop.f32.mrf.mxu1  ;;  %3288 = vmatpush1.msra.mxu0 %v6121_v43  ;;  %3401 = vmatpush1.msra.mxu1 %v6123_v60  ;;  %v10253_v43 = vmov 7  }
 0x3a2   : > { %3289 = vmatprep.subr.mxu0 %v6114_v63  ;;  %3402 = vmatprep.subr.mxu1 %v6116_v8 }
 0x3a3   : > { %v8327_v3 = vpop.f32.mrf.mxu0  ;;  %v8329_v4 = vpop.f32.mrf.mxu1  ;;  %6219 = vmatmul.mubr.msk.f32.gmra.mxu0 %vm1654_vm1, %v8142_v58  ;;  %6227 = vmatmul.mubr.msk.f32.gmra.mxu1 %vm1654_vm1, %v8142_v58 }
 0x3a4   : > { %3067 = vmatprep.mubr.f32.mxu0 %v10256_v16  ;;  %3180 = vmatprep.mubr.f32.mxu1 %v10256_v16 }
 0x3a5   : > { %v8343_v14 = vpop.f32.mrf.mxu0  ;;  %v8345_v15 = vpop.f32.mrf.mxu1  ;;  %3290 = vmatpush1.msra.mxu0 %v6113_v27  ;;  %3403 = vmatpush1.msra.mxu1 %v6115_v12 }
 0x3a6   : > { %6253 = vmatprep.subr.msk.mxu0 %vm2156_vm2, %v6134_v5  ;;  %6263 = vmatprep.subr.msk.mxu1 %vm2156_vm2, %v6136_v7 }
 0x3a7   : > { %v8349_v58 = vpop.f32.mrf.mxu0  ;;  %v8351_v17 = vpop.f32.mrf.mxu1  ;;  %6220 = vmatmul.mubr.msk.f32.gmra.mxu0 %vm1654_vm1, %v8140_v57  ;;  %6228 = vmatmul.mubr.msk.f32.gmra.mxu1 %vm1654_vm1, %v8140_v57 }
 0x3a8   : > { %10337 = vst [vmem:[#allocation27_spill] sm:$0xff] %v8349_v58  ;;  %10338 = vst [vmem:[#allocation28_spill] sm:$0xff] %v8351_v17  ;;  %3073 = vmatprep.mubr.f32.mxu0 %v10256_v16  ;;  %3186 = vmatprep.mubr.f32.mxu1 %v10256_v16 }
 0x3a9   : > { %v8359_v10 = vpop.f32.mrf.mxu0  ;;  %v8361_v21 = vpop.f32.mrf.mxu1  ;;  %4307 = vperm.xlu1 %6660, %v8067_v13   ;;  %6665 = vset.pattern.permute.xlu0 %v10254_v37  ;;  %v6135_v37 = vld [vmem:[%s10230_s4 + $0x170] sm:$0x3] }
 0x3aa   : > { %4407 = vperm.xlu0 %6665, %v8057_v34  }
 0x3ab   : > { %v8366_v48 = vpop.f32.mrf.mxu0  ;;  %v8368_v49 = vpop.f32.mrf.mxu1  ;;  %6221 = vmatmul.mubr.msk.f32.gmra.mxu0 %vm1654_vm1, %v8182_v2  ;;  %6229 = vmatmul.mubr.msk.f32.gmra.mxu1 %vm1654_vm1, %v8182_v2 }
 0x3ac   : > { %10339 = vst [vmem:[#allocation29_spill] sm:$0xff] %v8366_v48  ;;  %10340 = vst [vmem:[#allocation30_spill] sm:$0xff] %v8368_v49  ;;  %3079 = vmatprep.mubr.f32.mxu0 %v10256_v16  ;;  %3192 = vmatprep.mubr.f32.mxu1 %v10256_v16 }
 0x3ad   : > { %v8376_v57 = vpop.f32.mrf.mxu1  ;;  %v8378_v54 = vpop.f32.mrf.mxu0  ;;  %6661 = vset.pattern.permute.xlu1 %v6991_v55 }
 0x3ae   : > { %4335 = vperm.xlu1 %6661, %v8057_v34   ;;  %6668 = vset.pattern.permute.xlu0 %v10253_v43 }
 0x3af   : > { %v8382_v60 = vpop.f32.mrf.mxu1  ;;  %v8384_v63 = vpop.f32.mrf.mxu0  ;;  %6222 = vmatmul.mubr.msk.f32.gmra.mxu0 %vm1654_vm1, %v8162_v62  ;;  %6230 = vmatmul.mubr.msk.f32.gmra.mxu1 %vm1654_vm1, %v8162_v62 }
 0x3b0   : > { %10341 = vst [vmem:[#allocation31_spill] sm:$0xff] %v8382_v60  ;;  %10342 = vst [vmem:[#allocation32_spill] sm:$0xff] %v8384_v63  ;;  %3085 = vmatprep.mubr.f32.mxu0 %v10256_v16  ;;  %3198 = vmatprep.mubr.f32.mxu1 %v10256_v16 }
 0x3b1   : > { %v8392_v2 = vpop.f32.mrf.mxu1  ;;  %v8394_v8 = vpop.f32.mrf.mxu0  ;;  %4427 = vperm.xlu0 %6668, %v8067_v13  }
 0x3b2   : > { %4331 = vperm.xlu1 %6661, %v8067_v13  }
 0x3b3   : > { %v8398_v27 = vpop.f32.mrf.mxu1  ;;  %v8400_v12 = vpop.f32.mrf.mxu0  ;;  %6223 = vmatmul.mubr.msk.f32.gmra.mxu0 %vm1654_vm1, %v8228_v19  ;;  %6231 = vmatmul.mubr.msk.f32.gmra.mxu1 %vm1654_vm1, %v8228_v19 }
 0x3b4   : > { %10343 = vst [vmem:[#allocation33_spill] sm:$0xff] %v8398_v27  ;;  %10344 = vst [vmem:[#allocation34_spill] sm:$0xff] %v8400_v12  ;;  %3091 = vmatprep.mubr.f32.mxu0 %v10256_v16  ;;  %3204 = vmatprep.mubr.f32.mxu1 %v10256_v16 }
 0x3b5   : > { %v8408_v62 = vpop.f32.mrf.mxu0  ;;  %v8410_v5 = vpop.f32.mrf.mxu1 }
 0x3b6   : > { %6662 = vset.pattern.permute.xlu1 %v6989_v47  ;;  %v6133_v47 = vld [vmem:[%s10230_s4 + $0x160] sm:$0x3] }
 0x3b7   : > { %v8413_v7 = vpop.f32.mrf.mxu0  ;;  %v8415_v55 = vpop.f32.mrf.mxu1  ;;  %6224 = vmatmul.mubr.msk.f32.gmra.mxu0 %vm1654_vm1, %v8204_v6  ;;  %6232 = vmatmul.mubr.msk.f32.gmra.mxu1 %vm1654_vm1, %v8204_v6 }
 0x3b8   : > { %10345 = vst [vmem:[#allocation35_spill] sm:$0xff] %v8413_v7  ;;  %10346 = vst [vmem:[#allocation36_spill] sm:$0xff] %v8415_v55  ;;  %3323 = vmatprep.mubr.f32.mxu0 %v10256_v16  ;;  %3436 = vmatprep.mubr.f32.mxu1 %v10256_v16  ;;  %v6126_v16 = vld [vmem:[%s10230_s4 + $0x128] sm:$0xff] }
 0x3b9   : > { %v8423_v19 = vpop.f32.mrf.mxu0  ;;  %v8425_v43 = vpop.f32.mrf.mxu1  ;;  %4359 = vperm.xlu1 %6662, %v8057_v34  }
 0x3bb   : > { %v8434_v44 = vpop.f32.mrf.mxu0  ;;  %v8436_v6 = vpop.f32.mrf.mxu1  ;;  %6235 = vmatmul.mubr.msk.f32.vlgmr.msra.gmra.mxu0 %vm2131_vm3, %v8060_v39  ;;  %6245 = vmatmul.mubr.msk.f32.vlgmr.msra.gmra.mxu1 %vm2131_vm3, %v8060_v39 }
 0x3bc   : > { %10347 = vst [vmem:[#allocation37_spill] sm:$0xff] %v8434_v44  ;;  %10348 = vst [vmem:[#allocation38_spill] sm:$0xff] %v8436_v6  ;;  %3329 = vmatprep.mubr.f32.mxu0 %v10349_v40  ;;  %3442 = vmatprep.mubr.f32.mxu1 %v10349_v40  ;;  %v6127_v6 = vld [vmem:[%s10230_s4 + $0x130] sm:$0xff] }
 0x3bd   : > { %v8450_v38 = vpop.f32.mrf.mxu0  ;;  %v8452_v29 = vpop.f32.mrf.mxu1  ;;  %6254 = vmatpush1.msk.msra.mxu0 %vm2156_vm2, %v6133_v47  ;;  %6264 = vmatpush1.msk.msra.mxu1 %vm2156_vm2, %v6135_v37 }
 0x3be   : > { %3513 = vmatprep.subr.mxu0 %v6126_v16  ;;  %3626 = vmatprep.subr.mxu1 %v6128_v33  ;;  %v6118_v33 = vld [vmem:[%s10230_s4 + $0xe8] sm:$0xff]  ;;  %v6120_v16 = vld [vmem:[%s10230_s4 + $0xf8] sm:$0xff] }
 0x3bf   : > { %v8462_v44 = vpop.f32.mrf.mxu0  ;;  %v8464_v55 = vpop.f32.mrf.mxu1  ;;  %6236 = vmatmul.mubr.msk.f32.gmra.mxu0 %vm2131_vm3, %v8052_v22  ;;  %6246 = vmatmul.mubr.msk.f32.gmra.mxu1 %vm2131_vm3, %v8052_v22 }
 0x3c0   : > { %10350 = vst [vmem:[#allocation39_spill] sm:$0xff] %v8462_v44  ;;  %10351 = vst [vmem:[#allocation40_spill] sm:$0xff] %v8464_v55  ;;  %3335 = vmatprep.mubr.f32.mxu0 %v10349_v40  ;;  %3448 = vmatprep.mubr.f32.mxu1 %v10349_v40  ;;  %v6117_v55 = vld [vmem:[%s10230_s4 + $0xe0] sm:$0xff]  ;;  %v6119_v44 = vld [vmem:[%s10230_s4 + $0xf0] sm:$0xff] }
 0x3c1   : > { %v8478_v37 = vpop.f32.mrf.mxu0  ;;  %v8480_v47 = vpop.f32.mrf.mxu1  ;;  %3514 = vmatpush1.msra.mxu0 %v6125_v24  ;;  %3627 = vmatpush1.msra.mxu1 %v6127_v6  ;;  %v6282_v24 = vld [vmem:[%s10233_s7 + $0xa8] sm:$0x3]  ;;  %v6284_v6 = vld [vmem:[%s10233_s7 + $0xb8] sm:$0x3] }
 0x3c2   : > { %3515 = vmatprep.subr.mxu0 %v6118_v33  ;;  %3628 = vmatprep.subr.mxu1 %v6120_v16 }
 0x3c3   : > { %v8488_v7 = vpop.f32.mrf.mxu0  ;;  %v8490_v12 = vpop.f32.mrf.mxu1  ;;  %6237 = vmatmul.mubr.msk.f32.gmra.mxu0 %vm2131_vm3, %v8077_v35  ;;  %6247 = vmatmul.mubr.msk.f32.gmra.mxu1 %vm2131_vm3, %v8077_v35 }
 0x3c4   : > { %10352 = vst [vmem:[#allocation41_spill] sm:$0xff] %v8488_v7  ;;  %10353 = vst [vmem:[#allocation42_spill] sm:$0xff] %v8490_v12  ;;  %3341 = vmatprep.mubr.f32.mxu0 %v10349_v40  ;;  %3454 = vmatprep.mubr.f32.mxu1 %v10349_v40 }
 0x3c5   : > { %v8504_v33 = vpop.f32.mrf.mxu0  ;;  %v8506_v16 = vpop.f32.mrf.mxu1  ;;  %3516 = vmatpush1.msra.mxu0 %v6117_v55  ;;  %3629 = vmatpush1.msra.mxu1 %v6119_v44 }
 0x3c6   : > { %6285 = vmatprep.subr.msk.mxu0 %vm2156_vm2, %v6282_v24  ;;  %6295 = vmatprep.subr.msk.mxu1 %vm2156_vm2, %v6284_v6  ;;  %v6993_v24 = vmov 5  }
 0x3c7   : > { %v8510_v12 = vpop.f32.mrf.mxu0  ;;  %v8512_v7 = vpop.f32.mrf.mxu1  ;;  %6238 = vmatmul.mubr.msk.f32.gmra.mxu0 %vm2131_vm3, %v8073_v31  ;;  %6248 = vmatmul.mubr.msk.f32.gmra.mxu1 %vm2131_vm3, %v8073_v31 }
 0x3c8   : > { %10354 = vst [vmem:[#allocation43_spill] sm:$0xff] %v8510_v12  ;;  %10355 = vst [vmem:[#allocation44_spill] sm:$0xff] %v8512_v7  ;;  %3347 = vmatprep.mubr.f32.mxu0 %v10349_v40  ;;  %3460 = vmatprep.mubr.f32.mxu1 %v10349_v40 }
 0x3c9   : > { %v8520_v55 = vpop.f32.mrf.mxu0  ;;  %v8522_v44 = vpop.f32.mrf.mxu1  ;;  %6664 = vset.pattern.permute.xlu1 %v6993_v24 }
 0x3ca   : > { %4383 = vperm.xlu1 %6664, %v8057_v34  }
 0x3cb   : > { %v8525_v6 = vpop.f32.mrf.mxu0  ;;  %v8527_v7 = vpop.f32.mrf.mxu1  ;;  %6239 = vmatmul.mubr.msk.f32.gmra.mxu0 %vm2131_vm3, %v8071_v30  ;;  %6249 = vmatmul.mubr.msk.f32.gmra.mxu1 %vm2131_vm3, %v8071_v30 }
 0x3cc   : > { %10356 = vst [vmem:[#allocation45_spill] sm:$0xff] %v8525_v6  ;;  %10357 = vst [vmem:[#allocation46_spill] sm:$0xff] %v8527_v7  ;;  %3353 = vmatprep.mubr.f32.mxu0 %v10349_v40  ;;  %3466 = vmatprep.mubr.f32.mxu1 %v10349_v40 }
 0x3cd   : > { %v8535_v12 = vpop.f32.mrf.mxu1  ;;  %v2247_v27 = vpop.f32.mrf.mxu0 }
 0x3ce   : > { %v8538_v24 = vadd.f32 %v2247_v27, %v8202_v11  ;;  %4379 = vperm.xlu1 %6664, %v8067_v13  }
 0x3cf   : > { %v8541_v6 = vpop.f32.mrf.mxu1  ;;  %v8543_v7 = vpop.f32.mrf.mxu0  ;;  %6240 = vmatmul.mubr.msk.f32.gmra.mxu0 %vm2131_vm3, %v8062_v26  ;;  %6250 = vmatmul.mubr.msk.f32.gmra.mxu1 %vm2131_vm3, %v8062_v26 }
 0x3d0   : > { %10358 = vst [vmem:[#allocation47_spill] sm:$0xff] %v8538_v24  ;;  %10359 = vst [vmem:[#allocation48_spill] sm:$0xff] %v8541_v6  ;;  %3359 = vmatprep.mubr.f32.mxu0 %v10349_v40  ;;  %3472 = vmatprep.mubr.f32.mxu1 %v10349_v40  ;;  %v10361_v24 = vmov 6  }
 0x3d1   : > { %v8551_v63 = vpop.f32.mrf.mxu1  ;;  %v2253_v11 = vpop.f32.mrf.mxu0 }
 0x3d2   : > { %v8554_v27 = vadd.f32 %v2253_v11, %v8226_v18  ;;  %6666 = vset.pattern.permute.xlu1 %v10361_v24 }
 0x3d3   : > { %v8557_v6 = vpop.f32.mrf.mxu1  ;;  %v8559_v60 = vpop.f32.mrf.mxu0  ;;  %6241 = vmatmul.mubr.msk.f32.gmra.mxu0 %vm2131_vm3, %v8108_v45  ;;  %6251 = vmatmul.mubr.msk.f32.gmra.mxu1 %vm2131_vm3, %v8108_v45 }
 0x3d4   : > { %10360 = vst [vmem:[#allocation49_spill] sm:$0xff] %v8554_v27  ;;  %10362 = vst [vmem:[#allocation50_spill] sm:$0xff] %v8557_v6  ;;  %3365 = vmatprep.mubr.f32.mxu0 %v10349_v40  ;;  %3478 = vmatprep.mubr.f32.mxu1 %v10349_v40  ;;  %v6283_v27 = vld [vmem:[%s10233_s7 + $0xb0] sm:$0x3] }
 0x3d5   : > { %v2259_v49 = vpop.f32.mrf.mxu0  ;;  %v2360_v48 = vpop.f32.mrf.mxu1  ;;  %4403 = vperm.xlu1 %6666, %v8067_v13  }
 0x3d6   : > { %v8569_v18 = vadd.f32 %v2259_v49, %v8244_v28  ;;  %v8572_v24 = vadd.f32 %v2360_v48, %v8246_v42  ;;  %v10365_v49 = vmov 7  }
 0x3d7   : > { %v8574_v11 = vpop.f32.mrf.mxu0  ;;  %v8576_v6 = vpop.f32.mrf.mxu1  ;;  %6242 = vmatmul.mubr.msk.f32.gmra.mxu0 %vm2131_vm3, %v8100_v50  ;;  %6252 = vmatmul.mubr.msk.f32.gmra.mxu1 %vm2131_vm3, %v8100_v50 }
 0x3d8   : > { %10363 = vst [vmem:[#allocation51_spill] sm:$0xff] %v8569_v18  ;;  %10364 = vst [vmem:[#allocation52_spill] sm:$0xff] %v8572_v24  ;;  %3549 = vmatprep.mubr.f32.mxu0 %v10349_v40  ;;  %3662 = vmatprep.mubr.f32.mxu1 %v10349_v40  ;;  %v6281_v18 = vld [vmem:[%s10233_s7 + $0xa0] sm:$0x3] }
 0x3d9   : > { %v2265_v13 = vpop.f32.mrf.mxu0  ;;  %v2366_v28 = vpop.f32.mrf.mxu1  ;;  %6667 = vset.pattern.permute.xlu1 %v10365_v49 }
 0x3da   : > { %v8586_v42 = vadd.f32 %v2265_v13, %v8261_v41  ;;  %v8589_v48 = vadd.f32 %v2366_v28, %v8263_v46  ;;  %4431 = vperm.xlu1 %6667, %v8057_v34   ;;  %v6278_v41 = vld [vmem:[%s10233_s7 + $0x88] sm:$0xff]  ;;  %v6280_v46 = vld [vmem:[%s10233_s7 + $0x98] sm:$0xff] }
 0x3db   : > { %v8598_v24 = vpop.f32.mrf.mxu0  ;;  %v8600_v17 = vpop.f32.mrf.mxu1  ;;  %6255 = vmatmul.mubr.msk.f32.vlgmr.msra.gmra.mxu0 %vm2131_vm3, %v8060_v39  ;;  %6265 = vmatmul.mubr.msk.f32.vlgmr.msra.gmra.mxu1 %vm2131_vm3, %v8060_v39 }
 0x3dc   : > { %10366 = vst [vmem:[#allocation53_spill] sm:$0xff] %v8586_v42  ;;  %10367 = vst [vmem:[#allocation54_spill] sm:$0xff] %v8589_v48  ;;  %3555 = vmatprep.mubr.f32.mxu0 %v10349_v40  ;;  %3668 = vmatprep.mubr.f32.mxu1 %v10349_v40  ;;  %v6277_v42 = vld [vmem:[%s10233_s7 + $0x80] sm:$0xff]  ;;  %v6279_v48 = vld [vmem:[%s10233_s7 + $0x90] sm:$0xff] }
 0x3dd   : > { %v2271_v34 = vpop.f32.mrf.mxu0  ;;  %v2372_v13 = vpop.f32.mrf.mxu1  ;;  %6286 = vmatpush1.msk.msra.mxu0 %vm2156_vm2, %v6281_v18  ;;  %6296 = vmatpush1.msk.msra.mxu1 %vm2156_vm2, %v6283_v27 }
 0x3de   : > { %v8617_v28 = vadd.f32 %v2271_v34, %v8289_v56  ;;  %v8620_v49 = vadd.f32 %v2372_v13, %v8291_v59  ;;  %3764 = vmatprep.subr.mxu0 %v6278_v41  ;;  %3877 = vmatprep.subr.mxu1 %v6280_v46  ;;  %v6274_v56 = vld [vmem:[%s10233_s7 + $0x68] sm:$0xff]  ;;  %v6276_v59 = vld [vmem:[%s10233_s7 + $0x78] sm:$0xff]  ;;  %v6273_v13 = vld [vmem:[%s10233_s7 + $0x60] sm:$0xff] }
 0x3df   : > { %v8628_v58 = vpop.f32.mrf.mxu0  ;;  %v8630_v18 = vpop.f32.mrf.mxu1  ;;  %6256 = vmatmul.mubr.msk.f32.gmra.mxu0 %vm2131_vm3, %v8052_v22  ;;  %6266 = vmatmul.mubr.msk.f32.gmra.mxu1 %vm2131_vm3, %v8052_v22 }
 0x3e0   : > { %10368 = vst [vmem:[#allocation55_spill] sm:$0xff] %v8617_v28  ;;  %10369 = vst [vmem:[#allocation56_spill] sm:$0xff] %v8620_v49  ;;  %3561 = vmatprep.mubr.f32.mxu0 %v10349_v40  ;;  %3674 = vmatprep.mubr.f32.mxu1 %v10349_v40  ;;  %v6275_v28 = vld [vmem:[%s10233_s7 + $0x70] sm:$0xff] }
 0x3e1   : > { %v2277_v27 = vpop.f32.mrf.mxu0  ;;  %v2378_v41 = vpop.f32.mrf.mxu1  ;;  %3765 = vmatpush1.msra.mxu0 %v6277_v42  ;;  %3878 = vmatpush1.msra.mxu1 %v6279_v48 }
 0x3e2   : > { %v8645_v46 = vadd.f32 %v2277_v27, %v8317_v0  ;;  %v8648_v34 = vadd.f32 %v2378_v41, %v8319_v1  ;;  %3766 = vmatprep.subr.mxu0 %v6274_v56  ;;  %3879 = vmatprep.subr.mxu1 %v6276_v59  ;;  %v2642_v0 = vld [vmem:[%s10233_s7 + $0x48] sm:$0x3]  ;;  %v2644_v1 = vld [vmem:[%s10233_s7 + $0x58] sm:$0x3] }
 0x3e3   : > { %v8656_v49 = vpop.f32.mrf.mxu0  ;;  %v8658_v42 = vpop.f32.mrf.mxu1  ;;  %6257 = vmatmul.mubr.msk.f32.gmra.mxu0 %vm2131_vm3, %v8077_v35  ;;  %6267 = vmatmul.mubr.msk.f32.gmra.mxu1 %vm2131_vm3, %v8077_v35 }
 0x3e4   : > { %10370 = vst [vmem:[#allocation57_spill] sm:$0xff] %v8645_v46  ;;  %10371 = vst [vmem:[#allocation58_spill] sm:$0xff] %v8648_v34  ;;  %3567 = vmatprep.mubr.f32.mxu0 %v10349_v40  ;;  %3680 = vmatprep.mubr.f32.mxu1 %v10349_v40 }
 0x3e5   : > { %v2283_v48 = vpop.f32.mrf.mxu0  ;;  %v2384_v56 = vpop.f32.mrf.mxu1  ;;  %3767 = vmatpush1.msra.mxu0 %v6273_v13  ;;  %3880 = vmatpush1.msra.mxu1 %v6275_v28 }
 0x3e6   : > { %v8673_v59 = vadd.f32 %v2283_v48, %v8343_v14  ;;  %v8676_v27 = vadd.f32 %v2384_v56, %v8345_v15  ;;  %6305 = vmatprep.subr.msk.mxu0 %vm2156_vm2, %v2642_v0  ;;  %6315 = vmatprep.subr.msk.mxu1 %vm2156_vm2, %v2644_v1 }
 0x3e7   : > { %v8680_v41 = vpop.f32.mrf.mxu0  ;;  %v8682_v46 = vpop.f32.mrf.mxu1  ;;  %6258 = vmatmul.mubr.msk.f32.gmra.mxu0 %vm2131_vm3, %v8073_v31  ;;  %6268 = vmatmul.mubr.msk.f32.gmra.mxu1 %vm2131_vm3, %v8073_v31 }
 0x3e8   : > { %10372 = vst [vmem:[#allocation59_spill] sm:$0xff] %v8673_v59  ;;  %10373 = vst [vmem:[#allocation60_spill] sm:$0xff] %v8676_v27  ;;  %3573 = vmatprep.mubr.f32.mxu0 %v10349_v40  ;;  %3686 = vmatprep.mubr.f32.mxu1 %v10349_v40 }
 0x3e9   : > { %v2289_v14 = vpop.f32.mrf.mxu0  ;;  %v2390_v15 = vpop.f32.mrf.mxu1 }
 0x3ea   : > { %v8691_v28 = vadd.f32 %v2289_v14, %v8359_v10  ;;  %v8694_v13 = vadd.f32 %v2390_v15, %v8361_v21 }
 0x3eb   : > { %v8696_v0 = vpop.f32.mrf.mxu0  ;;  %v8698_v1 = vpop.f32.mrf.mxu1  ;;  %6259 = vmatmul.mubr.msk.f32.gmra.mxu0 %vm2131_vm3, %v8071_v30  ;;  %6269 = vmatmul.mubr.msk.f32.gmra.mxu1 %vm2131_vm3, %v8071_v30 }
 0x3ec   : > { %10374 = vst [vmem:[#allocation61_spill] sm:$0xff] %v8691_v28  ;;  %10375 = vst [vmem:[#allocation62_spill] sm:$0xff] %v8694_v13  ;;  %3579 = vmatprep.mubr.f32.mxu0 %v10349_v40  ;;  %3692 = vmatprep.mubr.f32.mxu1 %v10349_v40  ;;  %v2639_v13 = vld [vmem:[%s10233_s7 + $0x30] sm:$0xff] }
 0x3ed   : > { %v2396_v48 = vpop.f32.mrf.mxu1  ;;  %v2473_v10 = vpop.f32.mrf.mxu0 }
 0x3ee   : > { %v8707_v56 = vadd.f32 %v2396_v48, %v8376_v57  ;;  %v8710_v21 = vadd.f32 %v2473_v10, %v8378_v54 }
 0x3ef   : > { %v8712_v14 = vpop.f32.mrf.mxu1  ;;  %v8714_v15 = vpop.f32.mrf.mxu0  ;;  %6260 = vmatmul.mubr.msk.f32.gmra.mxu0 %vm2131_vm3, %v8062_v26  ;;  %6270 = vmatmul.mubr.msk.f32.gmra.mxu1 %vm2131_vm3, %v8062_v26 }
 0x3f0   : > { %10376 = vst [vmem:[#allocation63_spill] sm:$0xff] %v8707_v56  ;;  %10377 = vst [vmem:[#allocation64_spill] sm:$0xff] %v8710_v21  ;;  %3585 = vmatprep.mubr.f32.mxu0 %v10349_v40  ;;  %3698 = vmatprep.mubr.f32.mxu1 %v10349_v40 }
 0x3f1   : > { %v2402_v28 = vpop.f32.mrf.mxu1  ;;  %v2479_v57 = vpop.f32.mrf.mxu0 }
 0x3f2   : > { %v8723_v48 = vadd.f32 %v2402_v28, %v8392_v2  ;;  %v8726_v54 = vadd.f32 %v2479_v57, %v8394_v8 }
 0x3f3   : > { %v8728_v10 = vpop.f32.mrf.mxu1  ;;  %v8730_v21 = vpop.f32.mrf.mxu0  ;;  %6261 = vmatmul.mubr.msk.f32.gmra.mxu0 %vm2131_vm3, %v8108_v45  ;;  %6271 = vmatmul.mubr.msk.f32.gmra.mxu1 %vm2131_vm3, %v8108_v45 }
 0x3f4   : > { %10378 = vst [vmem:[#allocation65_spill] sm:$0xff] %v8723_v48  ;;  %10379 = vst [vmem:[#allocation66_spill] sm:$0xff] %v8726_v54  ;;  %3591 = vmatprep.mubr.f32.mxu0 %v10349_v40  ;;  %3704 = vmatprep.mubr.f32.mxu1 %v10349_v40 }
 0x3f5   : > { %v2485_v56 = vpop.f32.mrf.mxu0  ;;  %v2586_v2 = vpop.f32.mrf.mxu1 }
 0x3f6   : > { %v8739_v28 = vadd.f32 %v2485_v56, %v8408_v62  ;;  %v8742_v8 = vadd.f32 %v2586_v2, %v8410_v5  ;;  %v2641_v2 = vld [vmem:[%s10233_s7 + $0x40] sm:$0x3] }
 0x3f7   : > { %v8744_v57 = vpop.f32.mrf.mxu0  ;;  %v8746_v54 = vpop.f32.mrf.mxu1  ;;  %6262 = vmatmul.mubr.msk.f32.gmra.mxu0 %vm2131_vm3, %v8100_v50  ;;  %6272 = vmatmul.mubr.msk.f32.gmra.mxu1 %vm2131_vm3, %v8100_v50 }
 0x3f8   : > { %10380 = vst [vmem:[#allocation67_spill] sm:$0xff] %v8739_v28  ;;  %10381 = vst [vmem:[#allocation68_spill] sm:$0xff] %v8742_v8  ;;  %3800 = vmatprep.mubr.f32.mxu0 %v10349_v40  ;;  %3913 = vmatprep.mubr.f32.mxu1 %v10349_v40  ;;  %v2643_v28 = vld [vmem:[%s10233_s7 + $0x50] sm:$0x3] }
 0x3f9   : > { %v2491_v48 = vpop.f32.mrf.mxu0  ;;  %v2592_v62 = vpop.f32.mrf.mxu1 }
 0x3fa   : > { %v8755_v56 = vadd.f32 %v2491_v48, %v8423_v19  ;;  %v8758_v5 = vadd.f32 %v2592_v62, %v8425_v43  ;;  %v2638_v43 = vld [vmem:[%s10233_s7 + $0x28] sm:$0xff]  ;;  %v2640_v19 = vld [vmem:[%s10233_s7 + $0x38] sm:$0xff] }
 0x3fb   : > { %v8766_v8 = vpop.f32.mrf.mxu0  ;;  %v8768_v59 = vpop.f32.mrf.mxu1  ;;  %6287 = vmatmul.mubr.msk.f32.vlgmr.msra.gmra.mxu0 %vm2131_vm3, %v8060_v39  ;;  %6297 = vmatmul.mubr.msk.f32.vlgmr.msra.gmra.mxu1 %vm2131_vm3, %v8060_v39 }
 0x3fc   : > { %10382 = vst [vmem:[#allocation69_spill] sm:$0xff] %v8755_v56  ;;  %10383 = vst [vmem:[#allocation70_spill] sm:$0xff] %v8758_v5  ;;  %3806 = vmatprep.mubr.f32.mxu0 %v10349_v40  ;;  %3919 = vmatprep.mubr.f32.mxu1 %v10349_v40  ;;  %v2637_v5 = vld [vmem:[%s10233_s7 + $0x20] sm:$0xff] }
 0x3fd   : > { %v2497_v48 = vpop.f32.mrf.mxu0  ;;  %v2598_v62 = vpop.f32.mrf.mxu1  ;;  %6306 = vmatpush1.msk.msra.mxu0 %vm2156_vm2, %v2641_v2  ;;  %6316 = vmatpush1.msk.msra.mxu1 %vm2156_vm2, %v2643_v28 }
 0x3fe   : > { %v8785_v39 = vadd.f32 %v2497_v48, %v8450_v38  ;;  %v8788_v56 = vadd.f32 %v2598_v62, %v8452_v29  ;;  %4066 = vmatprep.subr.mxu0 %v2638_v43  ;;  %4179 = vmatprep.subr.mxu1 %v2640_v19  ;;  %v2634_v29 = vld [vmem:[%s10233_s7 + $0x8] sm:$0xff]  ;;  %v2636_v38 = vld [vmem:[%s10233_s7 + $0x18] sm:$0xff]  ;;  %v2633_v48 = vld [vmem:[%s10233_s7] sm:$0xff] }
 0x3ff   : > { %v8796_v27 = vpop.f32.mrf.mxu0  ;;  %v8798_v2 = vpop.f32.mrf.mxu1  ;;  %6288 = vmatmul.mubr.msk.f32.gmra.mxu0 %vm2131_vm3, %v8052_v22  ;;  %6298 = vmatmul.mubr.msk.f32.gmra.mxu1 %vm2131_vm3, %v8052_v22  ;;  %v2635_v62 = vld [vmem:[%s10233_s7 + $0x10] sm:$0xff] }
 0x400   : > { %10384 = vst [vmem:[#allocation71_spill] sm:$0xff] %v8785_v39  ;;  %10385 = vst [vmem:[#allocation72_spill] sm:$0xff] %v8788_v56  ;;  %3812 = vmatprep.mubr.f32.mxu0 %v10349_v40  ;;  %3925 = vmatprep.mubr.f32.mxu1 %v10349_v40 }
 0x401   : > { %v2503_v28 = vpop.f32.mrf.mxu0  ;;  %v2604_v43 = vpop.f32.mrf.mxu1  ;;  %4067 = vmatpush1.msra.mxu0 %v2637_v5  ;;  %4180 = vmatpush1.msra.mxu1 %v2639_v13 }
 0x402   : > { %v8813_v19 = vadd.f32 %v2503_v28, %v8478_v37  ;;  %v8816_v22 = vadd.f32 %v2604_v43, %v8480_v47  ;;  %4068 = vmatprep.subr.mxu0 %v2634_v29  ;;  %4181 = vmatprep.subr.mxu1 %v2636_v38 }
 0x403   : > { %v8824_v39 = vpop.f32.mrf.mxu0  ;;  %v8826_v5 = vpop.f32.mrf.mxu1  ;;  %6289 = vmatmul.mubr.msk.f32.gmra.mxu0 %vm2131_vm3, %v8077_v35  ;;  %6299 = vmatmul.mubr.msk.f32.gmra.mxu1 %vm2131_vm3, %v8077_v35 }
 0x404   : > { %10386 = vst [vmem:[#allocation73_spill] sm:$0xff] %v8813_v19  ;;  %10387 = vst [vmem:[#allocation74_spill] sm:$0xff] %v8816_v22  ;;  %3818 = vmatprep.mubr.f32.mxu0 %v10349_v40  ;;  %3931 = vmatprep.mubr.f32.mxu1 %v10349_v40 }
 0x405   : > { %v2509_v37 = vpop.f32.mrf.mxu0  ;;  %v2610_v47 = vpop.f32.mrf.mxu1  ;;  %4069 = vmatpush1.msra.mxu0 %v2633_v48  ;;  %4182 = vmatpush1.msra.mxu1 %v2635_v62 }
 0x406   : > { %v8835_v13 = vadd.f32 %v2509_v37, %v8504_v33  ;;  %v8838_v29 = vadd.f32 %v2610_v47, %v8506_v16  ;;  %v6754_v37 = vld [vmem:[%s7277_s19 + $0x28] sm:$0xff]  ;;  %v6755_v47 = vld [vmem:[%s7277_s19 + $0x30] sm:$0xff] }
 0x407   : > { %v8840_v38 = vpop.f32.mrf.mxu0  ;;  %v8842_v28 = vpop.f32.mrf.mxu1  ;;  %6290 = vmatmul.mubr.msk.f32.gmra.mxu0 %vm2131_vm3, %v8073_v31  ;;  %6300 = vmatmul.mubr.msk.f32.gmra.mxu1 %vm2131_vm3, %v8073_v31 }
 0x408   : > { %10388 = vst [vmem:[#allocation75_spill] sm:$0xff] %v8835_v13  ;;  %10389 = vst [vmem:[#allocation76_spill] sm:$0xff] %v8838_v29  ;;  %3824 = vmatprep.mubr.f32.mxu0 %v10349_v40  ;;  %3937 = vmatprep.mubr.f32.mxu1 %v10349_v40 }
 0x409   : > { %v2515_v35 = vpop.f32.mrf.mxu0  ;;  %v2616_v33 = vpop.f32.mrf.mxu1 }
 0x40a   : > { %v8851_v43 = vadd.f32 %v2515_v35, %v8520_v55  ;;  %v8854_v16 = vadd.f32 %v2616_v33, %v8522_v44 }
 0x40b   : > { %v8856_v48 = vpop.f32.mrf.mxu1  ;;  %6291 = vmatmul.mubr.msk.f32.gmra.mxu0 %vm2131_vm3, %v8071_v30  ;;  %6301 = vmatmul.mubr.msk.f32.gmra.mxu1 %vm2131_vm3, %v8071_v30  ;;  %v8925_v35 = vpop.f32.mrf.mxu0 }
 0x40c   : > { %10390 = vst [vmem:[#allocation77_spill] sm:$0xff] %v8851_v43  ;;  %10391 = vst [vmem:[#allocation78_spill] sm:$0xff] %v8854_v16  ;;  %3830 = vmatprep.mubr.f32.mxu0 %v10349_v40  ;;  %3943 = vmatprep.mubr.f32.mxu1 %v10349_v40 }
 0x40d   : > { %v2622_v31 = vpop.f32.mrf.mxu1 }
 0x40e   : > { %v8865_v62 = vadd.f32 %v2622_v31, %v8535_v12  ;;  %v6753_v12 = vld [vmem:[%s7277_s19 + $0x20] sm:$0xff]  ;;  %v6756_v31 = vld [vmem:[%s7277_s19 + $0x38] sm:$0xff] }
 0x40f   : > { %v8867_v55 = vpop.f32.mrf.mxu1  ;;  %6292 = vmatmul.mubr.msk.f32.gmra.mxu0 %vm2131_vm3, %v8062_v26  ;;  %6302 = vmatmul.mubr.msk.f32.gmra.mxu1 %vm2131_vm3, %v8062_v26  ;;  %v6749_v26 = vld [vmem:[%s7277_s19] sm:$0xff] }
 0x410   : > { %10392 = vst [vmem:[#allocation79_spill] sm:$0xff] %v8865_v62  ;;  %10393 = vst [vmem:[#allocation80_spill] sm:$0xff] %v8867_v55  ;;  %3836 = vmatprep.mubr.f32.mxu0 %v10349_v40  ;;  %3949 = vmatprep.mubr.f32.mxu1 %v10349_v40 }
 0x411   : > { %v2628_v30 = vpop.f32.mrf.mxu1 }
 0x412   : > { %v8876_v44 = vadd.f32 %v2628_v30, %v8551_v63  ;;  %v6752_v63 = vld [vmem:[%s7277_s19 + $0x18] sm:$0xff] }
 0x413   : > { %6293 = vmatmul.mubr.msk.f32.gmra.mxu0 %vm2131_vm3, %v8108_v45  ;;  %6303 = vmatmul.mubr.msk.f32.gmra.mxu1 %vm2131_vm3, %v8108_v45  ;;  %v6750_v45 = vld [vmem:[%s7277_s19 + $0x8] sm:$0xff]  ;;  %v8927_v33 = vpop.f32.mrf.mxu1 }
 0x414   : > { %10394 = vst [vmem:[#allocation81_spill] sm:$0xff] %v8876_v44  ;;  %3842 = vmatprep.mubr.f32.mxu0 %v10349_v40  ;;  %3955 = vmatprep.mubr.f32.mxu1 %v10349_v40  ;;  %10395 = vst [vmem:[#allocation82_spill] sm:$0xff] %v8927_v33 }
 0x417   : > { %6294 = vmatmul.mubr.msk.f32.gmra.mxu0 %vm2131_vm3, %v8100_v50  ;;  %6304 = vmatmul.mubr.msk.f32.gmra.mxu1 %vm2131_vm3, %v8100_v50  ;;  %v6751_v50 = vld [vmem:[%s7277_s19 + $0x10] sm:$0xff] }
 0x418   : > { %4102 = vmatprep.mubr.f32.mxu0 %v10349_v40  ;;  %4215 = vmatprep.mubr.f32.mxu1 %v10349_v40 }
 0x41b   : > { %6307 = vmatmul.mubr.msk.f32.vlgmr.msra.gmra.mxu0 %vm2131_vm3, %v6749_v26  ;;  %6317 = vmatmul.mubr.msk.f32.vlgmr.msra.gmra.mxu1 %vm2131_vm3, %v6749_v26 }
 0x41c   : > { %4108 = vmatprep.mubr.f32.mxu0 %v10349_v40  ;;  %4221 = vmatprep.mubr.f32.mxu1 %v10349_v40 }
 0x41f   : > { %6308 = vmatmul.mubr.msk.f32.gmra.mxu0 %vm2131_vm3, %v6750_v45  ;;  %6318 = vmatmul.mubr.msk.f32.gmra.mxu1 %vm2131_vm3, %v6750_v45 }
 0x420   : > { %4114 = vmatprep.mubr.f32.mxu0 %v10349_v40  ;;  %4227 = vmatprep.mubr.f32.mxu1 %v10349_v40 }
 0x423   : > { %6309 = vmatmul.mubr.msk.f32.gmra.mxu0 %vm2131_vm3, %v6751_v50  ;;  %6319 = vmatmul.mubr.msk.f32.gmra.mxu1 %vm2131_vm3, %v6751_v50 }
 0x424   : > { %4120 = vmatprep.mubr.f32.mxu0 %v10349_v40  ;;  %4233 = vmatprep.mubr.f32.mxu1 %v10349_v40 }
 0x427   : > { %6310 = vmatmul.mubr.msk.f32.gmra.mxu0 %vm2131_vm3, %v6752_v63  ;;  %6320 = vmatmul.mubr.msk.f32.gmra.mxu1 %vm2131_vm3, %v6752_v63 }
 0x428   : > { %4126 = vmatprep.mubr.f32.mxu0 %v10349_v40  ;;  %4239 = vmatprep.mubr.f32.mxu1 %v10349_v40 }
 0x42b   : > { %6311 = vmatmul.mubr.msk.f32.gmra.mxu0 %vm2131_vm3, %v6753_v12  ;;  %6321 = vmatmul.mubr.msk.f32.gmra.mxu1 %vm2131_vm3, %v6753_v12 }
 0x42c   : > { %4132 = vmatprep.mubr.f32.mxu0 %v10349_v40  ;;  %4245 = vmatprep.mubr.f32.mxu1 %v10349_v40 }
 0x42f   : > { %6312 = vmatmul.mubr.msk.f32.gmra.mxu0 %vm2131_vm3, %v6754_v37  ;;  %6322 = vmatmul.mubr.msk.f32.gmra.mxu1 %vm2131_vm3, %v6754_v37 }
 0x430   : > { %4138 = vmatprep.mubr.f32.mxu0 %v10349_v40  ;;  %4251 = vmatprep.mubr.f32.mxu1 %v10349_v40 }
 0x433   : > { %6313 = vmatmul.mubr.msk.f32.gmra.mxu0 %vm2131_vm3, %v6755_v47  ;;  %6323 = vmatmul.mubr.msk.f32.gmra.mxu1 %vm2131_vm3, %v6755_v47 }
 0x434   : > { %4144 = vmatprep.mubr.f32.mxu0 %v10349_v40  ;;  %4257 = vmatprep.mubr.f32.mxu1 %v10349_v40 }
 0x437   : > { %6314 = vmatmul.mubr.msk.f32.gmra.mxu0 %vm2131_vm3, %v6756_v31  ;;  %6324 = vmatmul.mubr.msk.f32.gmra.mxu1 %vm2131_vm3, %v6756_v31 }
 0x438   : > { %6539 = vmatprep.mubr.msk.f32.mxu0 %vm521_vm0, %v7379_v20  ;;  %6546 = vmatprep.mubr.msk.f32.mxu1 %vm521_vm0, %v7402_v32  ;;  %v8936_v30 = vpop.f32.mrf.mxu0  ;;  %v8938_v26 = vpop.f32.mrf.mxu1 }
 0x43a   : > { %v8940_v45 = vpop.f32.mrf.mxu0  ;;  %v8942_v50 = vpop.f32.mrf.mxu1 }
 0x43c   : > { %v8944_v63 = vpop.f32.mrf.mxu0  ;;  %v8946_v12 = vpop.f32.mrf.mxu1 }
 0x43e   : > { %v8948_v37 = vpop.f32.mrf.mxu0  ;;  %v8950_v47 = vpop.f32.mrf.mxu1 }
 0x443   : > { %v8952_v20 = vpop.f32.mrf.mxu0  ;;  %v8954_v31 = vpop.f32.mrf.mxu1 }
 0x445   : > { %v8956_v32 = vpop.f32.mrf.mxu0  ;;  %v8958_v40 = vpop.f32.mrf.mxu1 }
 0x446   : > { %10396 = vst [vmem:[#allocation83_spill] sm:$0xff] %v8958_v40 }
 0x447   : > { %v8960_v44 = vpop.f32.mrf.mxu0  ;;  %v8962_v43 = vpop.f32.mrf.mxu1 }
 0x448   : > { %10397 = vst [vmem:[#allocation84_spill] sm:$0xff] %v8960_v44  ;;  %10398 = vst [vmem:[#allocation85_spill] sm:$0xff] %v8962_v43 }
 0x449   : > { %v8964_v62 = vpop.f32.mrf.mxu0  ;;  %v8966_v13 = vpop.f32.mrf.mxu1 }
 0x44a   : > { %10399 = vst [vmem:[#allocation86_spill] sm:$0xff] %v8964_v62  ;;  %10400 = vst [vmem:[#allocation87_spill] sm:$0xff] %v8966_v13 }
 0x44b   : > { %v8968_v16 = vpop.f32.mrf.mxu0  ;;  %v8970_v19 = vpop.f32.mrf.mxu1 }
 0x44c   : > { %10401 = vst [vmem:[#allocation88_spill] sm:$0xff] %v8968_v16  ;;  %10402 = vst [vmem:[#allocation89_spill] sm:$0xff] %v8970_v19 }
 0x44d   : > { %v8972_v29 = vpop.f32.mrf.mxu0  ;;  %v8974_v22 = vpop.f32.mrf.mxu1 }
 0x44e   : > { %10403 = vst [vmem:[#allocation90_spill] sm:$0xff] %v8972_v29  ;;  %10404 = vst [vmem:[#allocation91_spill] sm:$0xff] %v8974_v22 }
 0x44f   : > { %v8976_v56 = vpop.f32.mrf.mxu0  ;;  %v8978_v34 = vpop.f32.mrf.mxu1 }
 0x450   : > { %10405 = vst [vmem:[#allocation92_spill] sm:$0xff] %v8976_v56  ;;  %10406 = vst [vmem:[#allocation93_spill] sm:$0xff] %v8978_v34 }
 0x451   : > { %v8980_v33 = vpop.f32.mrf.mxu0  ;;  %v8982_v40 = vpop.f32.mrf.mxu1 }
 0x452   : > { %10407 = vst [vmem:[#allocation94_spill] sm:$0xff] %v8980_v33  ;;  %10408 = vst [vmem:[#allocation95_spill] sm:$0xff] %v8982_v40 }
 0x453   : > { %v8984_v43 = vpop.f32.mrf.mxu0  ;;  %v8986_v62 = vpop.f32.mrf.mxu1 }
 0x454   : > { %10409 = vst [vmem:[#allocation96_spill] sm:$0xff] %v8984_v43  ;;  %10410 = vst [vmem:[#allocation97_spill] sm:$0xff] %v8986_v62 }
 0x455   : > { %v8988_v13 = vpop.f32.mrf.mxu0  ;;  %v8990_v16 = vpop.f32.mrf.mxu1 }
 0x456   : > { %10411 = vst [vmem:[#allocation98_spill] sm:$0xff] %v8988_v13  ;;  %10412 = vst [vmem:[#allocation99_spill] sm:$0xff] %v8990_v16 }
 0x457   : > { %v8992_v19 = vpop.f32.mrf.mxu0  ;;  %v8994_v29 = vpop.f32.mrf.mxu1 }
 0x458   : > { %10413 = vst [vmem:[#allocation100_spill] sm:$0xff] %v8992_v19  ;;  %10414 = vst [vmem:[#allocation101_spill] sm:$0xff] %v8994_v29 }
 0x459   : > { %v8996_v22 = vpop.f32.mrf.mxu0  ;;  %v8998_v56 = vpop.f32.mrf.mxu1 }
 0x45a   : > { %10415 = vst [vmem:[#allocation102_spill] sm:$0xff] %v8996_v22  ;;  %10416 = vst [vmem:[#allocation103_spill] sm:$0xff] %v8998_v56  ;;  %v9020_v56 = vpop.permute.xlu1 %4287 }
 0x45b   : > { %v9000_v34 = vpop.f32.mrf.mxu0  ;;  %v9002_v33 = vpop.f32.mrf.mxu1 }
 0x45c   : > { %10417 = vst [vmem:[#allocation104_spill] sm:$0xff] %v9000_v34  ;;  %10418 = vst [vmem:[#allocation105_spill] sm:$0xff] %v9002_v33 }
 0x45d   : > { %v9004_v40 = vpop.f32.mrf.mxu0  ;;  %v9006_v43 = vpop.f32.mrf.mxu1 }
 0x45e   : > { %10419 = vst [vmem:[#allocation106_spill] sm:$0xff] %v9004_v40  ;;  %10420 = vst [vmem:[#allocation107_spill] sm:$0xff] %v9006_v43 }
 0x45f   : > { %v9008_v62 = vpop.f32.mrf.mxu0  ;;  %v9010_v13 = vpop.f32.mrf.mxu1 }
 0x460   : > { %10421 = vst [vmem:[#allocation108_spill] sm:$0xff] %v9008_v62  ;;  %10422 = vst [vmem:[#allocation109_spill] sm:$0xff] %v9010_v13 }
 0x461   : > { %v9012_v16 = vpop.f32.mrf.mxu0  ;;  %v9014_v19 = vpop.f32.mrf.mxu1 }
 0x462   : > { %10423 = vst [vmem:[#allocation110_spill] sm:$0xff] %v9012_v16  ;;  %10424 = vst [vmem:[#allocation111_spill] sm:$0xff] %v9014_v19  ;;  %v9034_v16 = vpop.permute.xlu1 %4266 }
 0x463   : > { %v9016_v29 = vpop.f32.mrf.mxu0  ;;  %v9018_v22 = vpop.f32.mrf.mxu1  ;;  %10433 = vst [vmem:[#allocation120_spill] sm:$0xff] %v9034_v16 }
 0x464   : > { %10425 = vst [vmem:[#allocation112_spill] sm:$0xff] %v9016_v29  ;;  %10426 = vst [vmem:[#allocation113_spill] sm:$0xff] %v9018_v22 }
 0x465   : > { %v9022_v34 = vpop.f32.mrf.mxu0  ;;  %v9024_v33 = vpop.f32.mrf.mxu1 }
 0x466   : > { %10427 = vst [vmem:[#allocation114_spill] sm:$0xff] %v9022_v34  ;;  %10428 = vst [vmem:[#allocation115_spill] sm:$0xff] %v9024_v33 }
 0x467   : > { %v9026_v40 = vpop.f32.mrf.mxu0  ;;  %v9028_v43 = vpop.f32.mrf.mxu1 }
 0x468   : > { %10429 = vst [vmem:[#allocation116_spill] sm:$0xff] %v9026_v40  ;;  %10430 = vst [vmem:[#allocation117_spill] sm:$0xff] %v9028_v43  ;;  %v9048_v40 = vpop.permute.xlu1 %4283 }
 0x469   : > { %v9030_v62 = vpop.f32.mrf.mxu0  ;;  %v9032_v13 = vpop.f32.mrf.mxu1 }
 0x46a   : > { %10431 = vst [vmem:[#allocation118_spill] sm:$0xff] %v9030_v62  ;;  %10432 = vst [vmem:[#allocation119_spill] sm:$0xff] %v9032_v13 }
 0x46b   : > { %v9036_v19 = vpop.f32.mrf.mxu0  ;;  %v9038_v29 = vpop.f32.mrf.mxu1 }
 0x46c   : > { %10434 = vst [vmem:[#allocation121_spill] sm:$0xff] %v9036_v19  ;;  %10435 = vst [vmem:[#allocation122_spill] sm:$0xff] %v9038_v29 }
 0x46d   : > { %v9040_v22 = vpop.f32.mrf.mxu0  ;;  %v9042_v44 = vpop.f32.mrf.mxu1 }
 0x46e   : > { %10436 = vst [vmem:[#allocation123_spill] sm:$0xff] %v9040_v22  ;;  %10437 = vst [vmem:[#allocation124_spill] sm:$0xff] %v9042_v44  ;;  %v9062_v22 = vpop.permute.xlu1 %4311 }
 0x46f   : > { %v9044_v34 = vpop.f32.mrf.mxu0  ;;  %v9046_v33 = vpop.f32.mrf.mxu1  ;;  %10445 = vst [vmem:[#allocation132_spill] sm:$0xff] %v9062_v22 }
 0x470   : > { %10438 = vst [vmem:[#allocation125_spill] sm:$0xff] %v9044_v34  ;;  %10439 = vst [vmem:[#allocation126_spill] sm:$0xff] %v9046_v33  ;;  %v2250_v33 = vadd.f32 %v8543_v7, %v8212_v25  ;;  %v9090_v25 = vadd.f32 %v8600_v17, %v8275_v52  ;;  %v9094_v7 = vadd.f32 %v8628_v58, %v8301_v9  ;;  %v10450_v52 = vld [vmem:[#allocation27_spill] sm:$0xff] }
 0x471   : > { %v9050_v43 = vpop.f32.mrf.mxu0  ;;  %v9052_v62 = vpop.f32.mrf.mxu1  ;;  %v9110_v17 = vadd.f32 %v8680_v41, %v10450_v52 }
 0x472   : > { %10440 = vst [vmem:[#allocation127_spill] sm:$0xff] %v9050_v43  ;;  %10441 = vst [vmem:[#allocation128_spill] sm:$0xff] %v9052_v62  ;;  %v9112_v9 = vpop.permute.xlu1 %4307 }
 0x473   : > { %v9054_v13 = vpop.f32.mrf.mxu0  ;;  %v9056_v55 = vpop.f32.mrf.mxu1  ;;  %10451 = vst [vmem:[#allocation27_spill] sm:$0xff] %v9112_v9 }
 0x474   : > { %10442 = vst [vmem:[#allocation129_spill] sm:$0xff] %v9056_v55  ;;  %v2256_v55 = vadd.f32 %v8559_v60, %v8236_v23  ;;  %v9098_v23 = vadd.f32 %v8630_v18, %v8303_v61  ;;  %v10455_v18 = vld [vmem:[#allocation31_spill] sm:$0xff] }
 0x475   : > { %v9058_v19 = vpop.f32.mrf.mxu0  ;;  %v9060_v29 = vpop.f32.mrf.mxu1 }
 0x476   : > { %10443 = vst [vmem:[#allocation130_spill] sm:$0xff] %v9058_v19  ;;  %10444 = vst [vmem:[#allocation131_spill] sm:$0xff] %v9060_v29  ;;  %v9078_v19 = vadd.f32 %v8574_v11, %v8251_v53  ;;  %v9082_v29 = vadd.f32 %v8576_v6, %v8253_v36  ;;  %v9102_v53 = vadd.f32 %v8656_v49, %v8327_v3  ;;  %v10452_v6 = vld [vmem:[#allocation28_spill] sm:$0xff] }
 0x477   : > { %v9064_v44 = vpop.f32.mrf.mxu0  ;;  %v9066_v34 = vpop.f32.mrf.mxu1  ;;  %v9118_v3 = vadd.f32 %v8682_v46, %v10452_v6  ;;  %v10457_v46 = vld [vmem:[#allocation33_spill] sm:$0xff] }
 0x478   : > { %10446 = vst [vmem:[#allocation133_spill] sm:$0xff] %v9064_v44  ;;  %10447 = vst [vmem:[#allocation134_spill] sm:$0xff] %v9066_v34  ;;  %v9086_v34 = vadd.f32 %v8598_v24, %v8273_v51  ;;  %v9106_v51 = vadd.f32 %v8658_v42, %v8329_v4  ;;  %v10453_v24 = vld [vmem:[#allocation29_spill] sm:$0xff]  ;;  %v10454_v4 = vld [vmem:[#allocation30_spill] sm:$0xff]  ;;  %v9130_v42 = vadd.f32 %v8712_v14, %v10455_v18  ;;  %v9194_v44 = vpop.permute.xlu0 %4271 }
 0x479   : > { %v9070_v43 = vpop.f32.mrf.mxu0  ;;  %v9072_v62 = vpop.f32.mrf.mxu1  ;;  %v9122_v11 = vadd.f32 %v8696_v0, %v10453_v24  ;;  %v9126_v49 = vadd.f32 %v8698_v1, %v10454_v4  ;;  %v10458_v0 = vld [vmem:[#allocation47_spill] sm:$0xff]  ;;  %v10459_v1 = vld [vmem:[#allocation34_spill] sm:$0xff]  ;;  %v10461_v18 = vld [vmem:[#allocation36_spill] sm:$0xff]  ;;  %10471 = vst [vmem:[#allocation28_spill] sm:$0xff] %v9194_v44 }
 0x47a   : > { %10448 = vst [vmem:[#allocation135_spill] sm:$0xff] %v9070_v43  ;;  %10449 = vst [vmem:[#allocation136_spill] sm:$0xff] %v9072_v62  ;;  %v9144_v24 = vadd.f32 %v8730_v21, %v10459_v1  ;;  %v10460_v14 = vld [vmem:[#allocation35_spill] sm:$0xff]  ;;  %v10463_v43 = vld [vmem:[#allocation37_spill] sm:$0xff] }
 0x47b   : > { %v3325_v36 = vpop.f32.mrf.mxu0  ;;  %v3438_v60 = vpop.f32.mrf.mxu1  ;;  %v9148_v4 = vadd.f32 %v8744_v57, %v10460_v14  ;;  %v10466_v1 = vld [vmem:[#allocation40_spill] sm:$0xff] }
 0x47c   : > { %v3326_v58 = vadd.f32 %v3325_v36, %v8936_v30  ;;  %v3439_v61 = vadd.f32 %v3438_v60, %v8938_v26  ;;  %v10456_v36 = vld [vmem:[#allocation32_spill] sm:$0xff]  ;;  %v9138_v60 = vadd.f32 %v8728_v10, %v10457_v46 }
 0x47d   : > { %v3327_v41 = vpop.f32.mrf.mxu0  ;;  %v3440_v30 = vpop.f32.mrf.mxu1  ;;  %v9134_v26 = vadd.f32 %v8714_v15, %v10456_v36  ;;  %v9152_v15 = vadd.f32 %v8746_v54, %v10461_v18  ;;  %v10462_v36 = vld [vmem:[#allocation52_spill] sm:$0xff]  ;;  %v9169_v54 = vadd.f32 %v8798_v2, %v10466_v1 }
 0x47e   : > { %v3962_v52 = vadd.f32 %v3326_v58, %v10458_v0  ;;  %v3328_v6 = vadd.f32 %v3327_v41, %v8940_v45  ;;  %v3964_v62 = vadd.f32 %v3439_v61, %v10462_v36  ;;  %v9157_v58 = vadd.f32 %v8766_v8, %v10463_v43  ;;  %v10464_v45 = vld [vmem:[#allocation38_spill] sm:$0xff]  ;;  %v10465_v41 = vld [vmem:[#allocation39_spill] sm:$0xff]  ;;  %v10467_v61 = vld [vmem:[#allocation41_spill] sm:$0xff] }
 0x47f   : > { %v3331_v10 = vpop.f32.mrf.mxu0  ;;  %v3444_v46 = vpop.f32.mrf.mxu1  ;;  %v9161_v21 = vadd.f32 %v8768_v59, %v10464_v45  ;;  %v9165_v57 = vadd.f32 %v8796_v27, %v10465_v41  ;;  %v9173_v14 = vadd.f32 %v8824_v39, %v10467_v61  ;;  %v10468_v36 = vld [vmem:[#allocation42_spill] sm:$0xff]  ;;  %v10469_v39 = vld [vmem:[#allocation43_spill] sm:$0xff] }
 0x480   : > { %v3963_v0 = vadd.f32 %v3328_v6, %v2250_v33  ;;  %v3332_v8 = vadd.f32 %v3331_v10, %v8944_v63  ;;  %v3445_v43 = vadd.f32 %v3444_v46, %v8946_v12  ;;  %v9179_v45 = vadd.f32 %v8826_v5, %v10468_v36  ;;  %v9182_v33 = vpop.permute.xlu1 %4335  ;;  %v10470_v10 = vld [vmem:[#allocation49_spill] sm:$0xff] }
 0x481   : > { %v3333_v18 = vpop.f32.mrf.mxu0  ;;  %v3446_v59 = vpop.f32.mrf.mxu1  ;;  %v4274_v27 = vmul.f32 %v9034_v16, %v3962_v52  ;;  %v9188_v41 = vadd.f32 %v8840_v38, %v10469_v39  ;;  %v4314_v63 = vmul.f32 %v9112_v9, %v3964_v62  ;;  %v3441_v12 = vadd.f32 %v3440_v30, %v8942_v50  ;;  %v10475_v50 = vld [vmem:[#allocation54_spill] sm:$0xff] }
 0x482   : > { %v4290_v2 = vmul.f32 %v9048_v40, %v3963_v0  ;;  %v3334_v6 = vadd.f32 %v3333_v18, %v8948_v37  ;;  %v3970_v46 = vadd.f32 %v3332_v8, %v10470_v10  ;;  %v3447_v36 = vadd.f32 %v3446_v59, %v8950_v47  ;;  %v10472_v0 = vld [vmem:[#allocation44_spill] sm:$0xff]  ;;  %v10473_v18 = vld [vmem:[#allocation45_spill] sm:$0xff] }
 0x483   : > { %v3337_v5 = vpop.f32.mrf.mxu0  ;;  %v3450_v1 = vpop.f32.mrf.mxu1  ;;  %v9199_v38 = vadd.f32 %v8842_v28, %v10472_v0  ;;  %v9203_v62 = vadd.f32 %v8925_v35, %v10473_v18  ;;  %v3972_v30 = vadd.f32 %v3445_v43, %v10475_v50  ;;  %v3965_v39 = vadd.f32 %v3441_v12, %v9082_v29  ;;  %v10478_v10 = vld [vmem:[#allocation56_spill] sm:$0xff] }
 0x484   : > { %v4298_v61 = vadd.f32 %v4290_v2, %v4274_v27  ;;  %v3971_v52 = vadd.f32 %v3334_v6, %v2256_v55  ;;  %v3338_v37 = vadd.f32 %v3337_v5, %v8952_v20  ;;  %v3451_v8 = vadd.f32 %v3450_v1, %v8954_v31  ;;  %v10476_v2 = vld [vmem:[#allocation46_spill] sm:$0xff]  ;;  %v10477_v6 = vld [vmem:[#allocation51_spill] sm:$0xff]  ;;  %v10479_v1 = vld [vmem:[#allocation48_spill] sm:$0xff] }
 0x485   : > { %10474 = vst [vmem:[#allocation29_spill] sm:$0xff] %v9203_v62  ;;  %v3339_v27 = vpop.f32.mrf.mxu0  ;;  %v3452_v55 = vpop.f32.mrf.mxu1  ;;  %v9209_v47 = vadd.f32 %v8856_v48, %v10476_v2  ;;  %v4275_v31 = vmul.f32 %v9194_v44, %v3970_v46  ;;  %v10480_v18 = vld [vmem:[#allocation80_spill] sm:$0xff]  ;;  %v4315_v12 = vmul.f32 %v9062_v22, %v3972_v30  ;;  %v10488_v62 = vld [vmem:[#allocation53_spill] sm:$0xff] }
 0x486   : > { %v4322_v59 = vadd.f32 %v4314_v63, %v4298_v61  ;;  %v4291_v20 = vmul.f32 %v9020_v56, %v3971_v52  ;;  %v3978_v28 = vadd.f32 %v3338_v37, %v10477_v6  ;;  %v3980_v35 = vadd.f32 %v3451_v8, %v10478_v10  ;;  %v9221_v48 = vpop.permute.xlu1 %4331  ;;  %v10482_v61 = vld [vmem:[#allocation84_spill] sm:$0xff]  ;;  %v10483_v37 = vld [vmem:[#allocation85_spill] sm:$0xff]  ;;  %v10484_v8 = vld [vmem:[#allocation83_spill] sm:$0xff] }
 0x487   : > { %v3340_v5 = vadd.f32 %v3339_v27, %v8956_v32  ;;  %v3343_v43 = vpop.f32.mrf.mxu0  ;;  %v3456_v0 = vpop.f32.mrf.mxu1  ;;  %v9219_v50 = vadd.f32 %v10480_v18, %v10479_v1  ;;  %v3973_v63 = vadd.f32 %v3447_v36, %v9090_v25  ;;  %v3453_v27 = vadd.f32 %v3452_v55, %v10484_v8  ;;  %v10485_v10 = vld [vmem:[#allocation50_spill] sm:$0xff] }
 0x488   : > { %v3344_v52 = vadd.f32 %v3343_v43, %v10482_v61  ;;  %v3457_v29 = vadd.f32 %v3456_v0, %v10483_v37  ;;  %v4299_v6 = vadd.f32 %v4291_v20, %v4275_v31  ;;  %v10486_v1 = vld [vmem:[#allocation82_spill] sm:$0xff]  ;;  %v4276_v0 = vmul.f32 %v9034_v16, %v3978_v28 }
 0x489   : > { %10481 = vst [vmem:[#allocation30_spill] sm:$0xff] %v9219_v50  ;;  %v3979_v32 = vadd.f32 %v3340_v5, %v9078_v19  ;;  %v3345_v2 = vpop.f32.mrf.mxu0  ;;  %v3458_v46 = vpop.f32.mrf.mxu1  ;;  %v9231_v18 = vadd.f32 %v10486_v1, %v10485_v10  ;;  %v10489_v25 = vld [vmem:[#allocation58_spill] sm:$0xff]  ;;  %v4338_v55 = vmul.f32 %v9221_v48, %v3965_v39  ;;  %v4339_v20 = vmul.f32 %v9182_v33, %v3973_v63  ;;  %v10492_v10 = vld [vmem:[#allocation88_spill] sm:$0xff]  ;;  %v10493_v1 = vld [vmem:[#allocation89_spill] sm:$0xff] }
 0x48a   : > { %v3986_v50 = vadd.f32 %v3344_v52, %v10488_v62  ;;  %v3988_v36 = vadd.f32 %v3457_v29, %v10489_v25  ;;  %v10490_v43 = vld [vmem:[#allocation86_spill] sm:$0xff]  ;;  %v4323_v37 = vadd.f32 %v4315_v12, %v4299_v6  ;;  %v4316_v31 = vmul.f32 %v9112_v9, %v3980_v35  ;;  %v10491_v62 = vld [vmem:[#allocation87_spill] sm:$0xff] }
 0x48b   : > { %10487 = vst [vmem:[#allocation31_spill] sm:$0xff] %v9231_v18  ;;  %v3346_v61 = vadd.f32 %v3345_v2, %v10490_v43  ;;  %v4292_v30 = vmul.f32 %v9048_v40, %v3979_v32  ;;  %v3349_v19 = vpop.f32.mrf.mxu0  ;;  %v3462_v5 = vpop.f32.mrf.mxu1  ;;  %v3459_v52 = vadd.f32 %v3458_v46, %v10491_v62  ;;  %v3981_v2 = vadd.f32 %v3453_v27, %v9098_v23  ;;  %v10494_v35 = vld [vmem:[#allocation90_spill] sm:$0xff]  ;;  %v10497_v23 = vld [vmem:[#allocation60_spill] sm:$0xff] }
 0x48c   : > { %v3350_v28 = vadd.f32 %v3349_v19, %v10492_v10  ;;  %v3463_v32 = vadd.f32 %v3462_v5, %v10493_v1  ;;  %v4277_v39 = vmul.f32 %v9194_v44, %v3986_v50  ;;  %v4317_v12 = vmul.f32 %v9062_v22, %v3988_v36  ;;  %v10499_v1 = vld [vmem:[#allocation92_spill] sm:$0xff] }
 0x48d   : > { %v3987_v8 = vadd.f32 %v3346_v61, %v9086_v34  ;;  %v4300_v29 = vadd.f32 %v4292_v30, %v4276_v0  ;;  %v3351_v25 = vpop.f32.mrf.mxu0  ;;  %v3464_v43 = vpop.f32.mrf.mxu1  ;;  %v10496_v61 = vld [vmem:[#allocation55_spill] sm:$0xff]  ;;  %v3989_v50 = vadd.f32 %v3459_v52, %v9106_v51  ;;  %v10501_v51 = vld [vmem:[#allocation57_spill] sm:$0xff] }
 0x48e   : > { %v3352_v6 = vadd.f32 %v3351_v25, %v10494_v35  ;;  %v9250_v34 = vpop.permute.xlu1 %4359  ;;  %v3994_v0 = vadd.f32 %v3350_v28, %v10496_v61  ;;  %v3996_v27 = vadd.f32 %v3463_v32, %v10497_v23  ;;  %v10498_v30 = vld [vmem:[#allocation91_spill] sm:$0xff]  ;;  %v4340_v25 = vmul.f32 %v9221_v48, %v3981_v2  ;;  %v10500_v35 = vld [vmem:[#allocation93_spill] sm:$0xff]  ;;  %v10503_v2 = vld [vmem:[#allocation94_spill] sm:$0xff] }
 0x48f   : > { %v4293_v63 = vmul.f32 %v9020_v56, %v3987_v8  ;;  %10495 = vst [vmem:[#allocation32_spill] sm:$0xff] %v9250_v34  ;;  %v4324_v46 = vadd.f32 %v4316_v31, %v4300_v29  ;;  %v3465_v19 = vadd.f32 %v3464_v43, %v10498_v30  ;;  %v3355_v5 = vpop.f32.mrf.mxu0  ;;  %v3468_v62 = vpop.f32.mrf.mxu1  ;;  %v9260_v28 = vadd.f32 %v4338_v55, %v4322_v59  ;;  %v10504_v30 = vld [vmem:[#allocation95_spill] sm:$0xff] }
 0x490   : > { %v3995_v36 = vadd.f32 %v3352_v6, %v9094_v7  ;;  %v3356_v8 = vadd.f32 %v3355_v5, %v10499_v1  ;;  %v3469_v18 = vadd.f32 %v3468_v62, %v10500_v35  ;;  %v9262_v32 = vadd.f32 %v4339_v20, %v4323_v37  ;;  %v10507_v1 = vld [vmem:[#allocation97_spill] sm:$0xff] }
 0x491   : > { %v4301_v10 = vadd.f32 %v4293_v63, %v4277_v39  ;;  %v3357_v31 = vpop.f32.mrf.mxu0  ;;  %v3470_v29 = vpop.f32.mrf.mxu1  ;;  %v4278_v61 = vmul.f32 %v9034_v16, %v3994_v0  ;;  %v3997_v7 = vadd.f32 %v3465_v19, %v9118_v3  ;;  %v10502_v63 = vld [vmem:[#allocation62_spill] sm:$0xff]  ;;  %v4341_v55 = vmul.f32 %v9182_v33, %v3989_v50 }
 0x492   : > { %v4294_v39 = vmul.f32 %v9048_v40, %v3995_v36  ;;  %v4002_v52 = vadd.f32 %v3356_v8, %v10501_v51  ;;  %v4004_v6 = vadd.f32 %v3469_v18, %v10502_v63  ;;  %v3358_v23 = vadd.f32 %v3357_v31, %v10503_v2  ;;  %v9276_v36 = vpop.permute.xlu0 %4355  ;;  %v10510_v51 = vld [vmem:[#allocation99_spill] sm:$0xff] }
 0x493   : > { %v4325_v43 = vadd.f32 %v4317_v12, %v4301_v10  ;;  %v3471_v5 = vadd.f32 %v3470_v29, %v10504_v30  ;;  %v3361_v62 = vpop.f32.mrf.mxu0  ;;  %v3474_v59 = vpop.f32.mrf.mxu1  ;;  %v4318_v37 = vmul.f32 %v9112_v9, %v3996_v27  ;;  %v10505_v12 = vld [vmem:[#allocation96_spill] sm:$0xff]  ;;  %10506 = vst [vmem:[#allocation33_spill] sm:$0xff] %v9276_v36  ;;  %v9278_v3 = vadd.f32 %v4340_v25, %v4324_v46  ;;  %v10508_v29 = vld [vmem:[#allocation59_spill] sm:$0xff] }
 0x494   : > { %v4302_v20 = vadd.f32 %v4294_v39, %v4278_v61  ;;  %v3362_v0 = vadd.f32 %v3361_v62, %v10505_v12  ;;  %v9274_v10 = vpop.permute.xlu1 %4383  ;;  %v4003_v18 = vadd.f32 %v3358_v23, %v9102_v53  ;;  %v3475_v8 = vadd.f32 %v3474_v59, %v10507_v1  ;;  %v10509_v61 = vld [vmem:[#allocation98_spill] sm:$0xff]  ;;  %v10511_v53 = vld [vmem:[#allocation63_spill] sm:$0xff] }
 0x495   : > { %v4005_v19 = vadd.f32 %v3471_v5, %v9126_v49  ;;  %v3363_v35 = vpop.f32.mrf.mxu0  ;;  %v3476_v31 = vpop.f32.mrf.mxu1  ;;  %v4342_v2 = vmul.f32 %v9221_v48, %v3997_v7  ;;  %v4279_v46 = vmul.f32 %v9194_v44, %v4002_v52  ;;  %v9290_v5 = vadd.f32 %v4341_v55, %v4325_v43  ;;  %v10512_v7 = vld [vmem:[#allocation100_spill] sm:$0xff]  ;;  %v10513_v52 = vld [vmem:[#allocation101_spill] sm:$0xff]  ;;  %v10514_v55 = vld [vmem:[#allocation102_spill] sm:$0xff] }
 0x496   : > { %v4326_v50 = vadd.f32 %v4318_v37, %v4302_v20  ;;  %v4010_v27 = vadd.f32 %v3362_v0, %v10508_v29  ;;  %v3364_v39 = vadd.f32 %v3363_v35, %v10509_v61  ;;  %v3477_v63 = vadd.f32 %v3476_v31, %v10510_v51 }
 0x497   : > { %v4295_v25 = vmul.f32 %v9020_v56, %v4003_v18  ;;  %v4012_v23 = vadd.f32 %v3475_v8, %v10511_v53  ;;  %v3367_v49 = vpop.f32.mrf.mxu0  ;;  %v3480_v30 = vpop.f32.mrf.mxu1  ;;  %v4319_v62 = vmul.f32 %v9062_v22, %v4004_v6  ;;  %v4343_v59 = vmul.f32 %v9182_v33, %v4005_v19  ;;  %v10515_v6 = vld [vmem:[#allocation103_spill] sm:$0xff] }
 0x498   : > { %v4011_v37 = vadd.f32 %v3364_v39, %v9110_v17  ;;  %v4013_v12 = vadd.f32 %v3477_v63, %v9130_v42  ;;  %v3368_v0 = vadd.f32 %v3367_v49, %v10512_v7  ;;  %v3481_v1 = vadd.f32 %v3480_v30, %v10513_v52  ;;  %v9302_v19 = vpop.permute.xlu1 %4379  ;;  %v9304_v17 = vpop.permute.xlu0 %4407  ;;  %v10517_v39 = vld [vmem:[#allocation61_spill] sm:$0xff] }
 0x499   : > { %v4303_v20 = vadd.f32 %v4295_v25, %v4279_v46  ;;  %v3369_v18 = vpop.f32.mrf.mxu0  ;;  %v3482_v35 = vpop.f32.mrf.mxu1  ;;  %v4280_v8 = vmul.f32 %v9034_v16, %v4010_v27  ;;  %10516 = vst [vmem:[#allocation47_spill] sm:$0xff] %v9304_v17  ;;  %v4320_v42 = vmul.f32 %v9112_v9, %v4012_v23  ;;  %v10518_v63 = vld [vmem:[#allocation65_spill] sm:$0xff]  ;;  %v9312_v52 = vadd.f32 %v4342_v2, %v4326_v50  ;;  %v10523_v2 = vld [vmem:[#allocation106_spill] sm:$0xff] }
 0x49a   : > { %v4296_v43 = vmul.f32 %v9048_v40, %v4011_v37  ;;  %v3370_v31 = vadd.f32 %v3369_v18, %v10514_v55  ;;  %v3483_v29 = vadd.f32 %v3482_v35, %v10515_v6  ;;  %v4018_v51 = vadd.f32 %v3368_v0, %v10517_v39  ;;  %v10519_v37 = vld [vmem:[#allocation104_spill] sm:$0xff]  ;;  %v10520_v23 = vld [vmem:[#allocation105_spill] sm:$0xff]  ;;  %v10524_v6 = vld [vmem:[#allocation107_spill] sm:$0xff] }
 0x49b   : > { %v4327_v61 = vadd.f32 %v4319_v62, %v4303_v20  ;;  %v4020_v46 = vadd.f32 %v3481_v1, %v10518_v63  ;;  %v3551_v25 = vpop.f32.mrf.mxu0  ;;  %v3664_v53 = vpop.f32.mrf.mxu1  ;;  %v4344_v62 = vmul.f32 %v9221_v48, %v4013_v12 }
 0x49c   : > { %v4304_v27 = vadd.f32 %v4296_v43, %v4280_v8  ;;  %v4019_v49 = vadd.f32 %v3370_v31, %v9122_v11  ;;  %v4021_v30 = vadd.f32 %v3483_v29, %v9138_v60  ;;  %v3552_v7 = vadd.f32 %v3551_v25, %v10519_v37  ;;  %v10521_v11 = vld [vmem:[#allocation64_spill] sm:$0xff] }
 0x49d   : > { %v9314_v18 = vadd.f32 %v4343_v59, %v4327_v61  ;;  %v3665_v20 = vadd.f32 %v3664_v53, %v10520_v23  ;;  %v3553_v0 = vpop.f32.mrf.mxu0  ;;  %v3666_v35 = vpop.f32.mrf.mxu1  ;;  %v4281_v55 = vmul.f32 %v9194_v44, %v4018_v51  ;;  %v4321_v60 = vmul.f32 %v9062_v22, %v4020_v46  ;;  %v10522_v31 = vld [vmem:[#allocation68_spill] sm:$0xff]  ;;  %v4842_v22 = vld [vmem:[#allocation8 + $0xe0] sm:$0xff] }
 0x49e   : > { %v4328_v1 = vadd.f32 %v4320_v42, %v4304_v27  ;;  %v4297_v8 = vmul.f32 %v9020_v56, %v4019_v49  ;;  %v3966_v43 = vadd.f32 %v3552_v7, %v10521_v11  ;;  %v3554_v59 = vadd.f32 %v3553_v0, %v10523_v2  ;;  %v9327_v51 = vpop.permute.xlu1 %4403  ;;  %v10526_v25 = vld [vmem:[#allocation108_spill] sm:$0xff]  ;;  %v9330_v27 = vpop.permute.xlu0 %4427  ;;  %v10527_v7 = vld [vmem:[#allocation109_spill] sm:$0xff]  ;;  %v10529_v11 = vld [vmem:[#allocation110_spill] sm:$0xff] }
 0x49f   : > { %v3968_v50 = vadd.f32 %v3665_v20, %v10522_v31  ;;  %v3667_v29 = vadd.f32 %v3666_v35, %v10524_v6  ;;  %v3557_v12 = vpop.f32.mrf.mxu0  ;;  %v3670_v61 = vpop.f32.mrf.mxu1  ;;  %v4345_v63 = vmul.f32 %v9182_v33, %v4021_v30  ;;  %10525 = vst [vmem:[#allocation34_spill] sm:$0xff] %v9327_v51  ;;  %v4839_v44 = vld [vmem:[#allocation8 + $0xc8] sm:$0xff] }
 0x4a0   : > { %v4305_v39 = vadd.f32 %v4297_v8, %v4281_v55  ;;  %v4362_v42 = vmul.f32 %v9276_v36, %v3966_v43  ;;  %v3558_v53 = vadd.f32 %v3557_v12, %v10526_v25  ;;  %v9332_v46 = vadd.f32 %v4344_v62, %v4328_v1  ;;  %v10528_v55 = vld [vmem:[#allocation66_spill] sm:$0xff]  ;;  %v10532_v12 = vld [vmem:[#allocation112_spill] sm:$0xff] }
 0x4a1   : > { %v3967_v49 = vadd.f32 %v3554_v59, %v9134_v26  ;;  %v3969_v37 = vadd.f32 %v3667_v29, %v9152_v15  ;;  %v3671_v23 = vadd.f32 %v3670_v61, %v10527_v7  ;;  %v3559_v20 = vpop.f32.mrf.mxu0  ;;  %v3672_v0 = vpop.f32.mrf.mxu1  ;;  %v4410_v62 = vmul.f32 %v9327_v51, %v3968_v50  ;;  %v10530_v1 = vld [vmem:[#allocation70_spill] sm:$0xff]  ;;  %v10531_v26 = vld [vmem:[#allocation111_spill] sm:$0xff]  ;;  %v10533_v50 = vld [vmem:[#allocation113_spill] sm:$0xff] }
 0x4a2   : > { %v4329_v35 = vadd.f32 %v4321_v60, %v4305_v39  ;;  %v4370_v30 = vadd.f32 %v4362_v42, %v9260_v28  ;;  %v3974_v8 = vadd.f32 %v3558_v53, %v10528_v55  ;;  %v3560_v43 = vadd.f32 %v3559_v20, %v10529_v11  ;;  %v10537_v11 = vld [vmem:[#allocation115_spill] sm:$0xff] }
 0x4a3   : > { %v4386_v31 = vmul.f32 %v9302_v19, %v3967_v49  ;;  %v3976_v2 = vadd.f32 %v3671_v23, %v10530_v1  ;;  %v3673_v59 = vadd.f32 %v3672_v0, %v10531_v26  ;;  %v3563_v15 = vpop.f32.mrf.mxu0  ;;  %v3676_v6 = vpop.f32.mrf.mxu1  ;;  %v4434_v60 = vmul.f32 %v9330_v27, %v3969_v37  ;;  %v10534_v0 = vld [vmem:[#allocation67_spill] sm:$0xff] }
 0x4a4   : > { %v4363_v29 = vmul.f32 %v9250_v34, %v3974_v8  ;;  %v3975_v28 = vadd.f32 %v3560_v43, %v9144_v24  ;;  %v3564_v61 = vadd.f32 %v3563_v15, %v10532_v12  ;;  %v9348_v39 = vadd.f32 %v4345_v63, %v4329_v35  ;;  %v9355_v37 = vpop.permute.xlu1 %4431  ;;  %v10535_v24 = vld [vmem:[#allocation114_spill] sm:$0xff]  ;;  %v10536_v35 = vld [vmem:[#allocation72_spill] sm:$0xff]  ;;  %v9366_v15 = vld [vmem:[%s10232_s6] sm:$0xff] }
 0x4a5   : > { %v4394_v42 = vadd.f32 %v4386_v31, %v4370_v30  ;;  %v3977_v25 = vadd.f32 %v3673_v59, %v9161_v21  ;;  %v3677_v53 = vadd.f32 %v3676_v6, %v10533_v50  ;;  %v3565_v49 = vpop.f32.mrf.mxu0  ;;  %v3678_v7 = vpop.f32.mrf.mxu1  ;;  %v4411_v63 = vmul.f32 %v9304_v17, %v3976_v2  ;;  %v10538_v6 = vld [vmem:[#allocation116_spill] sm:$0xff] }
 0x4a6   : > { %v4371_v23 = vadd.f32 %v4363_v29, %v9262_v32  ;;  %v4387_v20 = vmul.f32 %v9274_v10, %v3975_v28  ;;  %v3982_v55 = vadd.f32 %v3564_v61, %v10534_v0  ;;  %v3566_v8 = vadd.f32 %v3565_v49, %v10535_v24  ;;  %v10542_v24 = vld [vmem:[#allocation118_spill] sm:$0xff] }
 0x4a7   : > { %v3984_v30 = vadd.f32 %v3677_v53, %v10536_v35  ;;  %v3679_v21 = vadd.f32 %v3678_v7, %v10537_v11  ;;  %v4418_v43 = vadd.f32 %v4410_v62, %v4394_v42  ;;  %v3569_v31 = vpop.f32.mrf.mxu0  ;;  %v3682_v1 = vpop.f32.mrf.mxu1  ;;  %v4435_v2 = vmul.f32 %v9355_v37, %v3977_v25  ;;  %v10539_v62 = vld [vmem:[#allocation117_spill] sm:$0xff]  ;;  %v10543_v11 = vld [vmem:[#allocation119_spill] sm:$0xff] }
 0x4a8   : > { %v4395_v26 = vadd.f32 %v4387_v20, %v4371_v23  ;;  %v4364_v32 = vmul.f32 %v9276_v36, %v3982_v55  ;;  %v3983_v59 = vadd.f32 %v3566_v8, %v9148_v4  ;;  %v3570_v29 = vadd.f32 %v3569_v31, %v10538_v6  ;;  %v10540_v7 = vld [vmem:[#allocation69_spill] sm:$0xff]  ;;  %v10541_v55 = vld [vmem:[#allocation74_spill] sm:$0xff] }
 0x4a9   : > { %v3985_v28 = vadd.f32 %v3679_v21, %v9169_v54  ;;  %v4442_v12 = vadd.f32 %v4434_v60, %v4418_v43  ;;  %v3683_v61 = vadd.f32 %v3682_v1, %v10539_v62  ;;  %v3571_v42 = vpop.f32.mrf.mxu0  ;;  %v3684_v50 = vpop.f32.mrf.mxu1  ;;  %v4412_v20 = vmul.f32 %v9327_v51, %v3984_v30  ;;  %v9382_v60 = vld [vmem:[%s10232_s6 + $0x8] sm:$0xff] }
 0x4aa   : > { %v4419_v53 = vadd.f32 %v4411_v63, %v4395_v26  ;;  %v4372_v49 = vadd.f32 %v4364_v32, %v9278_v3  ;;  %v4388_v4 = vmul.f32 %v9302_v19, %v3983_v59  ;;  %v3990_v23 = vadd.f32 %v3570_v29, %v10540_v7  ;;  %v10544_v26 = vld [vmem:[#allocation121_spill] sm:$0xff] }
 0x4ab   : > { %v4450_v0 = vadd.f32 %v4442_v12, %v9366_v15  ;;  %v3992_v25 = vadd.f32 %v3683_v61, %v10541_v55  ;;  %v3572_v54 = vadd.f32 %v3571_v42, %v10542_v24  ;;  %v3575_v8 = vpop.f32.mrf.mxu0  ;;  %v3688_v63 = vpop.f32.mrf.mxu1  ;;  %v3685_v21 = vadd.f32 %v3684_v50, %v10543_v11  ;;  %v10548_v55 = vld [vmem:[#allocation76_spill] sm:$0xff] }
 0x4ac   : > { %v4396_v3 = vadd.f32 %v4388_v4, %v4372_v49  ;;  %v4365_v35 = vmul.f32 %v9250_v34, %v3990_v23  ;;  %v4443_v43 = vadd.f32 %v4435_v2, %v4419_v53  ;;  %v4436_v30 = vmul.f32 %v9330_v27, %v3985_v28  ;;  %v10545_v2 = vld [vmem:[#allocation71_spill] sm:$0xff]  ;;  %v10546_v28 = vld [vmem:[#allocation122_spill] sm:$0xff] }
 0x4ad   : > { %v6325_v31 = vmul.f32 -1.442695, %v4450_v0  ;;  %v3991_v1 = vadd.f32 %v3572_v54, %v9157_v58  ;;  %v3576_v32 = vadd.f32 %v3575_v8, %v10544_v26  ;;  %v3577_v59 = vpop.f32.mrf.mxu0  ;;  %v3690_v6 = vpop.f32.mrf.mxu1  ;;  %v3993_v62 = vadd.f32 %v3685_v21, %v9179_v45  ;;  %v10549_v54 = vld [vmem:[#allocation124_spill] sm:$0xff]  ;;  %v10550_v21 = vld [vmem:[#allocation125_spill] sm:$0xff] }
 0x4ae   : > { %v4420_v29 = vadd.f32 %v4412_v20, %v4396_v3  ;;  %v4373_v12 = vadd.f32 %v4365_v35, %v9290_v5  ;;  %v4451_v61 = vadd.f32 %v4443_v43, %v9382_v60  ;;  %v3689_v53 = vadd.f32 %v3688_v63, %v10546_v28  ;;  %v10547_v20 = vld [vmem:[#allocation123_spill] sm:$0xff] }
 0x4af   : > { %6701 = vpow2.f32 %v6325_v31  ;;  %v4389_v42 = vmul.f32 %v9274_v10, %v3991_v1  ;;  %v3998_v50 = vadd.f32 %v3576_v32, %v10545_v2  ;;  %v3581_v49 = vpop.f32.mrf.mxu0  ;;  %v3694_v58 = vpop.f32.mrf.mxu1  ;;  %v4413_v7 = vmul.f32 %v9304_v17, %v3992_v25 }
 0x4b0   : > { %v4444_v4 = vadd.f32 %v4436_v30, %v4420_v29  ;;  %v6326_v23 = vmul.f32 -1.442695, %v4451_v61  ;;  %v3578_v0 = vadd.f32 %v3577_v59, %v10547_v20  ;;  %v4000_v24 = vadd.f32 %v3689_v53, %v10548_v55  ;;  %v10551_v29 = vld [vmem:[#allocation73_spill] sm:$0xff]  ;;  %v10552_v61 = vld [vmem:[#allocation126_spill] sm:$0xff]  ;;  %v10554_v53 = vld [vmem:[#allocation128_spill] sm:$0xff] }
 0x4b1   : > { %v4397_v5 = vadd.f32 %v4389_v42, %v4373_v12  ;;  %v4366_v45 = vmul.f32 %v9276_v36, %v3998_v50  ;;  %v3691_v8 = vadd.f32 %v3690_v6, %v10549_v54  ;;  %v3583_v3 = vpop.f32.mrf.mxu0  ;;  %v3696_v35 = vpop.f32.mrf.mxu1  ;;  %v3582_v43 = vadd.f32 %v3581_v49, %v10550_v21  ;;  %v10553_v50 = vld [vmem:[#allocation127_spill] sm:$0xff] }
 0x4b2   : > { %v4452_v11 = vadd.f32 %v4444_v4, %v9366_v15  ;;  %6703 = vpow2.f32 %v6326_v23  ;;  %v3999_v63 = vadd.f32 %v3578_v0, %v9165_v57  ;;  %v4437_v30 = vmul.f32 %v9355_v37, %v3993_v62 }
 0x4b3   : > { %v4421_v25 = vadd.f32 %v4413_v7, %v4397_v5  ;;  %v4374_v31 = vadd.f32 %v4366_v45, %v9312_v52  ;;  %v4001_v1 = vadd.f32 %v3691_v8, %v9199_v38  ;;  %v3587_v26 = vpop.f32.mrf.mxu0  ;;  %v3700_v32 = vpop.f32.mrf.mxu1  ;;  %v4006_v12 = vadd.f32 %v3582_v43, %v10551_v29  ;;  %v10555_v7 = vld [vmem:[#allocation78_spill] sm:$0xff]  ;;  %v10557_v43 = vld [vmem:[#allocation75_spill] sm:$0xff]  ;;  %v10561_v29 = vld [vmem:[#allocation133_spill] sm:$0xff] }
 0x4b4   : > { %v6327_v59 = vmul.f32 -1.442695, %v4452_v11  ;;  %v4390_v6 = vmul.f32 %v9302_v19, %v3999_v63  ;;  %v3695_v42 = vadd.f32 %v3694_v58, %v10552_v61  ;;  %v4414_v57 = vmul.f32 %v9327_v51, %v4000_v24 }
 0x4b5   : > { %v4445_v2 = vadd.f32 %v4437_v30, %v4421_v25  ;;  %v3584_v28 = vadd.f32 %v3583_v3, %v10553_v50  ;;  %v3697_v62 = vadd.f32 %v3696_v35, %v10554_v53  ;;  %v3589_v49 = vpop.f32.mrf.mxu0  ;;  %v3702_v52 = vpop.f32.mrf.mxu1  ;;  %v4367_v4 = vmul.f32 %v9250_v34, %v4006_v12  ;;  %v10556_v3 = vld [vmem:[#allocation129_spill] sm:$0xff] }
 0x4b6   : > { %6705 = vpow2.f32 %v6327_v59  ;;  %v4398_v38 = vadd.f32 %v4390_v6, %v4374_v31  ;;  %v4008_v23 = vadd.f32 %v3695_v42, %v10555_v7  ;;  %v4438_v0 = vmul.f32 %v9330_v27, %v4001_v1  ;;  %v10560_v6 = vld [vmem:[#allocation131_spill] sm:$0xff] }
 0x4b7   : > { %v4453_v20 = vadd.f32 %v4445_v2, %v9382_v60  ;;  %v4007_v58 = vadd.f32 %v3584_v28, %v9173_v14  ;;  %v3588_v5 = vadd.f32 %v3587_v26, %v9054_v13  ;;  %v3593_v45 = vpop.f32.mrf.mxu0  ;;  %v3706_v55 = vpop.f32.mrf.mxu1  ;;  %v4375_v54 = vadd.f32 %v4367_v4, %v9314_v18  ;;  %v10558_v13 = vld [vmem:[#allocation79_spill] sm:$0xff]  ;;  %v10559_v26 = vld [vmem:[#allocation130_spill] sm:$0xff] }
 0x4b8   : > { %v4422_v24 = vadd.f32 %v4414_v57, %v4398_v38  ;;  %v4009_v8 = vadd.f32 %v3697_v62, %v9209_v47  ;;  %v3701_v35 = vadd.f32 %v3700_v32, %v10556_v3  ;;  %v4415_v63 = vmul.f32 %v9304_v17, %v4008_v23  ;;  %v10562_v38 = vld [vmem:[#allocation77_spill] sm:$0xff]  ;;  %v10565_v3 = vld [vmem:[#allocation135_spill] sm:$0xff] }
 0x4b9   : > { %v6328_v11 = vmul.f32 -1.442695, %v4453_v20  ;;  %v4391_v21 = vmul.f32 %v9274_v10, %v4007_v58  ;;  %v4014_v25 = vadd.f32 %v3588_v5, %v10557_v43  ;;  %v3595_v30 = vpop.f32.mrf.mxu0  ;;  %v3708_v14 = vpop.f32.mrf.mxu1  ;;  %v3590_v59 = vadd.f32 %v3589_v49, %v10559_v26  ;;  %v10563_v58 = vld [vmem:[#allocation30_spill] sm:$0xff]  ;;  %v10566_v43 = vld [vmem:[#allocation81_spill] sm:$0xff]  ;;  %v10568_v26 = vld [vmem:[#allocation136_spill] sm:$0xff] }
 0x4ba   : > { %v4446_v31 = vadd.f32 %v4438_v0, %v4422_v24  ;;  %v4016_v1 = vadd.f32 %v3701_v35, %v10558_v13  ;;  %v3703_v18 = vadd.f32 %v3702_v52, %v10560_v6  ;;  %v3594_v12 = vadd.f32 %v3593_v45, %v10561_v29  ;;  %v10564_v45 = vld [vmem:[#allocation134_spill] sm:$0xff]  ;;  %v10567_v13 = vld [vmem:[#allocation29_spill] sm:$0xff] }
 0x4bb   : > { %6707 = vpow2.f32 %v6328_v11  ;;  %v4399_v47 = vadd.f32 %v4391_v21, %v4375_v54  ;;  %v4368_v32 = vmul.f32 %v9276_v36, %v4014_v25  ;;  %v9429_v61 = vpop.f32.mrf.mxu0  ;;  %v9431_v42 = vpop.f32.mrf.mxu1  ;;  %v4439_v50 = vmul.f32 %v9355_v37, %v4009_v8 }
 0x4bc   : > { %v6702_v2 = vpop.eup %6701  ;;  %v4454_v57 = vadd.f32 %v4446_v31, %v9366_v15  ;;  %v4416_v28 = vmul.f32 %v9327_v51, %v4016_v1  ;;  %v4015_v53 = vadd.f32 %v3590_v59, %v9188_v41  ;;  %v4022_v4 = vadd.f32 %v3594_v12, %v10562_v38 }
 0x4bd   : > { %v4482_v62 = vadd.f32 1.0, %v6702_v2  ;;  %v4423_v49 = vadd.f32 %v4415_v63, %v4399_v47  ;;  %v4376_v52 = vadd.f32 %v4368_v32, %v9332_v46  ;;  %v9439_v7 = vpop.f32.mrf.mxu0  ;;  %v9441_v23 = vpop.f32.mrf.mxu1  ;;  %v4017_v5 = vadd.f32 %v3703_v18, %v10563_v58  ;;  %v10569_v2 = vld [vmem:[#allocation31_spill] sm:$0xff] }
 0x4be   : > { %v6329_v20 = vmul.f32 -1.442695, %v4454_v57  ;;  %v4392_v0 = vmul.f32 %v9302_v19, %v4015_v53  ;;  %v3707_v24 = vadd.f32 %v3706_v55, %v10564_v45  ;;  %v4369_v8 = vmul.f32 %v9250_v34, %v4022_v4 }
 0x4bf   : > { %v6704_v54 = vpop.eup %6703  ;;  %6709 = vrcp.f32 %v4482_v62  ;;  %v4447_v41 = vadd.f32 %v4439_v50, %v4423_v49  ;;  %v3596_v46 = vadd.f32 %v3595_v30, %v10565_v3  ;;  %v9448_v35 = vpop.f32.mrf.mxu0  ;;  %v3709_v59 = vadd.f32 %v3708_v14, %v10568_v26  ;;  %v6757_v26 = vld [vmem:[%s7285_s28 + $0x8] sm:$0xff] }
 0x4c0   : > { %v9450_v11 = vpop.f32.mrf.mxu1  ;;  %v4483_v63 = vadd.f32 1.0, %v6704_v54  ;;  %6711 = vpow2.f32 %v6329_v20  ;;  %v4400_v21 = vadd.f32 %v4392_v0, %v4376_v52  ;;  %v4024_v25 = vadd.f32 %v3707_v24, %v10566_v43 }
 0x4c1   : > { %v4455_v31 = vadd.f32 %v4447_v41, %v9382_v60  ;;  %v4377_v55 = vadd.f32 %v4369_v8, %v9348_v39  ;;  %v4023_v1 = vadd.f32 %v3596_v46, %v10567_v13  ;;  %v9457_v6 = vpop.f32.mrf.mxu0  ;;  %v4440_v47 = vmul.f32 %v9330_v27, %v4017_v5 }
 0x4c2   : > { %v9459_v30 = vpop.f32.mrf.mxu1  ;;  %6713 = vrcp.f32 %v4483_v63  ;;  %v4424_v18 = vadd.f32 %v4416_v28, %v4400_v21  ;;  %v4025_v57 = vadd.f32 %v3709_v59, %v10569_v2  ;;  %v4417_v62 = vmul.f32 %v9304_v17, %v4024_v25 }
 0x4c3   : > { %v6706_v32 = vpop.eup %6705  ;;  %v6330_v29 = vmul.f32 -1.442695, %v4455_v31  ;;  %v4393_v12 = vmul.f32 %v9274_v10, %v4023_v1  ;;  %v9464_v50 = vpop.f32.mrf.mxu0 }
 0x4c4   : > { %v9466_v39 = vpop.f32.mrf.mxu1  ;;  %v4448_v53 = vadd.f32 %v4440_v47, %v4424_v18  ;;  %v4484_v14 = vadd.f32 1.0, %v6706_v32  ;;  %v4441_v20 = vmul.f32 %v9355_v37, %v4025_v57 }
 0x4c5   : > { %6715 = vpow2.f32 %v6330_v29  ;;  %v4401_v49 = vadd.f32 %v4393_v12, %v4377_v55  ;;  %v9469_v52 = vpop.f32.mrf.mxu0  ;;  %v9510_v29 = vld [vmem:[%s7285_s28] sm:$0xff] }
 0x4c6   : > { %v9471_v28 = vpop.f32.mrf.mxu1  ;;  %v4456_v38 = vadd.f32 %v4448_v53, %v9366_v15  ;;  %6717 = vrcp.f32 %v4484_v14  ;;  %10572 = vst [vmem:[#allocation52_spill] sm:$0xff] %v9510_v29 }
 0x4c7   : > { %v4425_v4 = vadd.f32 %v4417_v62, %v4401_v49  ;;  %v9475_v0 = vpop.f32.mrf.mxu0 }
 0x4c8   : > { %v9477_v58 = vpop.f32.mrf.mxu1  ;;  %v6708_v5 = vpop.eup %6707  ;;  %v6331_v45 = vmul.f32 -1.442695, %v4456_v38  ;;  %v10574_v38 = vld [vmem:[#allocation21_spill] sm:$0xff] }
 0x4c9   : > { %v4485_v24 = vadd.f32 1.0, %v6708_v5  ;;  %v4449_v54 = vadd.f32 %v4441_v20, %v4425_v4  ;;  %v9479_v41 = vpop.f32.mrf.mxu0 }
 0x4ca   : > { %v9481_v8 = vpop.f32.mrf.mxu1  ;;  %6719 = vpow2.f32 %v6331_v45  ;;  %v10575_v45 = vld [vmem:[#allocation22_spill] sm:$0xff] }
 0x4cb   : > { %6721 = vrcp.f32 %v4485_v24  ;;  %v4457_v15 = vadd.f32 %v4449_v54, %v9382_v60  ;;  %v9484_v3 = vpop.f32.mrf.mxu0 }
 0x4cc   : > { %v9486_v46 = vpop.f32.mrf.mxu1  ;;  %v9488_v63 = vpop.eup %6709 }
 0x4cd   : > { %10570 = vst [vmem:[#allocation35_spill] sm:$0xff] %v9488_v63  ;;  %v6712_v21 = vpop.eup %6711  ;;  %v6332_v43 = vmul.f32 -1.442695, %v4457_v15  ;;  %v9490_v25 = vpop.f32.mrf.mxu0  ;;  %v9514_v12 = vmul.f32 %v9510_v29, %v9488_v63 }
 0x4ce   : > { %v9492_v31 = vpop.f32.mrf.mxu1  ;;  %v4486_v60 = vadd.f32 1.0, %v6712_v21  ;;  %v9544_v21 = vld [vmem:[%s7285_s28 + $0x18] sm:$0xff] }
 0x4cf   : > { %v9494_v55 = vpop.eup %6713  ;;  %6723 = vpow2.f32 %v6332_v43  ;;  %v9496_v13 = vpop.f32.mrf.mxu0  ;;  %10578 = vst [vmem:[#allocation40_spill] sm:$0xff] %v9544_v21 }
 0x4d0   : > { %10571 = vst [vmem:[#allocation36_spill] sm:$0xff] %v9494_v55  ;;  %v9498_v1 = vpop.f32.mrf.mxu1  ;;  %v9502_v59 = vmul.f32 %v6757_v26, %v9494_v55  ;;  %6725 = vrcp.f32 %v4486_v60 }
 0x4d1   : > { %v9504_v18 = vpop.f32.mrf.mxu0 }
 0x4d2   : > { %v9506_v47 = vpop.f32.mrf.mxu1  ;;  %v6716_v32 = vpop.eup %6715  ;;  %6535 = vmatprep.subr.mxu0 %v9502_v59 }
 0x4d3   : > { %v4487_v2 = vadd.f32 1.0, %v6716_v32  ;;  %v9516_v57 = vpop.f32.mrf.mxu0  ;;  %6536 = vmatpush3.msra.mxu0 %v9502_v59  ;;  %v9527_v49 = vpop.eup %6717 }
 0x4d4   : > { %v9518_v53 = vpop.f32.mrf.mxu1  ;;  %6537 = vmatprep.subr.mxu0 %v9514_v12  ;;  %10573 = vst [vmem:[#allocation37_spill] sm:$0xff] %v9527_v49 }
 0x4d5   : > { %6727 = vrcp.f32 %v4487_v2  ;;  %v9522_v14 = vpop.f32.mrf.mxu0  ;;  %6538 = vmatpush3.msra.mxu0 %v9514_v12  ;;  %v9552_v2 = vld [vmem:[%s7285_s28 + $0x10] sm:$0xff] }
 0x4d6   : > { %v9524_v62 = vpop.f32.mrf.mxu1  ;;  %6540 = vmatmul.mubr.msk.f32.vlgmr.msra.gmra.mxu0 %vm521_vm0, %v10574_v38  ;;  %10579 = vst [vmem:[#allocation41_spill] sm:$0xff] %v9552_v2  ;;  %v9556_v38 = vmul.f32 %v9552_v2, %v9527_v49 }
 0x4d7   : > { %v6720_v4 = vpop.eup %6719  ;;  %v9531_v20 = vpop.f32.mrf.mxu0  ;;  %6553 = vmatprep.mubr.msk.f32.mxu0 %vm521_vm0, %v10575_v45 }
 0x4d8   : > { %v9533_v5 = vpop.f32.mrf.mxu1  ;;  %v9537_v24 = vpop.eup %6721  ;;  %v4488_v60 = vadd.f32 1.0, %v6720_v4 }
 0x4d9   : > { %10576 = vst [vmem:[#allocation38_spill] sm:$0xff] %v9537_v24  ;;  %v9539_v54 = vpop.f32.mrf.mxu0  ;;  %v9548_v43 = vmul.f32 %v9544_v21, %v9537_v24 }
 0x4da   : > { %10577 = vst [vmem:[#allocation39_spill] sm:$0xff] %v9539_v54  ;;  %v9541_v15 = vpop.f32.mrf.mxu1  ;;  %6729 = vrcp.f32 %v4488_v60  ;;  %v4837_v54 = vld [vmem:[#allocation8 + $0xb8] sm:$0xff] }
 0x4db   : > { %6542 = vmatprep.subr.mxu1 %v9548_v43  ;;  %v4104_v26 = vpop.f32.mrf.mxu0 }
 0x4dc   : > { %v4217_v32 = vpop.f32.mrf.mxu1  ;;  %v6724_v45 = vpop.eup %6723  ;;  %v9559_v55 = vadd.f32 %v4104_v26, %v9429_v61  ;;  %6543 = vmatpush3.msra.mxu1 %v9548_v43  ;;  %v10580_v61 = vld [vmem:[#allocation24_spill] sm:$0xff] }
 0x4dd   : > { %v9562_v63 = vadd.f32 %v4217_v32, %v9431_v42  ;;  %v4489_v4 = vadd.f32 1.0, %v6724_v45  ;;  %6544 = vmatprep.subr.mxu1 %v9556_v38  ;;  %v4106_v24 = vpop.f32.mrf.mxu0 }
 0x4de   : > { %v4219_v17 = vpop.f32.mrf.mxu1  ;;  %v9567_v34 = vadd.f32 %v4106_v24, %v9439_v7  ;;  %6545 = vmatpush3.msra.mxu1 %v9556_v38  ;;  %v10581_v7 = vld [vmem:[#allocation25_spill] sm:$0xff] }
 0x4df   : > { %v9570_v49 = vadd.f32 %v4219_v17, %v9441_v23  ;;  %6731 = vrcp.f32 %v4489_v4  ;;  %6547 = vmatmul.mubr.msk.f32.vlgmr.msra.gmra.mxu1 %vm521_vm0, %v10580_v61  ;;  %v4110_v42 = vpop.f32.mrf.mxu0  ;;  %v9583_v17 = vpop.eup %6725 }
 0x4e0   : > { %v4223_v26 = vpop.f32.mrf.mxu1  ;;  %v9576_v32 = vadd.f32 %v4110_v42, %v9448_v35  ;;  %6560 = vmatprep.mubr.msk.f32.mxu1 %vm521_vm0, %v10581_v7  ;;  %10582 = vst [vmem:[#allocation42_spill] sm:$0xff] %v9583_v17  ;;  %v9594_v35 = vld [vmem:[%s7285_s28 + $0x28] sm:$0xff] }
 0x4e1   : > { %v9579_v60 = vadd.f32 %v4223_v26, %v9450_v11  ;;  %v4112_v23 = vpop.f32.mrf.mxu0  ;;  %10584 = vst [vmem:[#allocation49_spill] sm:$0xff] %v9594_v35 }
 0x4e2   : > { %v4225_v24 = vpop.f32.mrf.mxu1  ;;  %v9585_v45 = vpop.eup %6727  ;;  %v9588_v4 = vadd.f32 %v4112_v23, %v9457_v6  ;;  %v9608_v6 = vld [vmem:[%s7285_s28 + $0x20] sm:$0xff] }
 0x4e3   : > { %10583 = vst [vmem:[#allocation43_spill] sm:$0xff] %v9585_v45  ;;  %v9591_v61 = vadd.f32 %v4225_v24, %v9459_v30  ;;  %v9598_v11 = vmul.f32 %v9594_v35, %v9585_v45  ;;  %v4116_v42 = vpop.f32.mrf.mxu0  ;;  %10585 = vst [vmem:[#allocation44_spill] sm:$0xff] %v9608_v6  ;;  %v9612_v30 = vmul.f32 %v9608_v6, %v9583_v17  ;;  %v4830_v6 = vld [vmem:[#allocation8 + $0x80] sm:$0xff] }
 0x4e4   : > { %v4229_v26 = vpop.f32.mrf.mxu1  ;;  %v9601_v7 = vadd.f32 %v4116_v42, %v9464_v50 }
 0x4e5   : > { %v9604_v51 = vadd.f32 %v4229_v26, %v9466_v39  ;;  %6549 = vmatprep.subr.mxu0 %v9598_v11  ;;  %v4118_v23 = vpop.f32.mrf.mxu0  ;;  %v4843_v39 = vld [vmem:[#allocation8 + $0xe8] sm:$0xff] }
 0x4e6   : > { %v4231_v24 = vpop.f32.mrf.mxu1  ;;  %6550 = vmatpush3.msra.mxu0 %v9598_v11  ;;  %v9616_v45 = vadd.f32 %v4118_v23, %v9469_v52  ;;  %v10586_v52 = vld [vmem:[#allocation23_spill] sm:$0xff] }
 0x4e7   : > { %v9619_v50 = vadd.f32 %v4231_v24, %v9471_v28  ;;  %6551 = vmatprep.subr.mxu0 %v9612_v30  ;;  %v4122_v42 = vpop.f32.mrf.mxu0  ;;  %v4838_v24 = vld [vmem:[#allocation8 + $0xc0] sm:$0xff] }
 0x4e8   : > { %v4235_v26 = vpop.f32.mrf.mxu1  ;;  %6552 = vmatpush3.msra.mxu0 %v9612_v30  ;;  %v9624_v17 = vadd.f32 %v4122_v42, %v9475_v0  ;;  %v4835_v0 = vld [vmem:[#allocation8 + $0xa8] sm:$0xff]  ;;  %v10587_v42 = vmov 0.0  }
 0x4e9   : > { %v9627_v36 = vadd.f32 %v4235_v26, %v9477_v58  ;;  %6554 = vmatmul.mubr.msk.f32.vlgmr.msra.gmra.mxu0 %vm521_vm0, %v10586_v52  ;;  %4886 = vmatprep.subr.mxu0 %v4843_v39  ;;  %v4124_v28 = vpop.f32.mrf.mxu0  ;;  %v9638_v58 = vpop.eup %6729  ;;  %v4834_v39 = vld [vmem:[#allocation8 + $0xa0] sm:$0xff] }
 0x4ea   : > { %v4237_v23 = vpop.f32.mrf.mxu1  ;;  %4887 = vmatpush1.msra.mxu0 %v4842_v22  ;;  %v9632_v9 = vadd.f32 %v4124_v28, %v9479_v41  ;;  %4934 = vmatprep.mubr.f32.mxu0 %v10587_v42  ;;  %10588 = vst [vmem:[#allocation45_spill] sm:$0xff] %v9638_v58  ;;  %v9649_v28 = vld [vmem:[%s7285_s28 + $0x38] sm:$0xff] }
 0x4eb   : > { %v9635_v16 = vadd.f32 %v4237_v23, %v9481_v8  ;;  %4888 = vmatprep.subr.mxu0 %v4839_v44  ;;  %v4128_v26 = vpop.f32.mrf.mxu0  ;;  %v4831_v8 = vld [vmem:[#allocation8 + $0x88] sm:$0xff]  ;;  %10590 = vst [vmem:[#allocation46_spill] sm:$0xff] %v9649_v28 }
 0x4ec   : > { %v4241_v52 = vpop.f32.mrf.mxu1  ;;  %v9640_v35 = vpop.eup %6731  ;;  %4889 = vmatpush1.msra.mxu0 %v4838_v24  ;;  %v9643_v22 = vadd.f32 %v4128_v26, %v9484_v3  ;;  %v9663_v26 = vld [vmem:[%s7285_s28 + $0x30] sm:$0xff] }
 0x4ed   : > { %10589 = vst [vmem:[#allocation54_spill] sm:$0xff] %v9640_v35  ;;  %v9646_v41 = vadd.f32 %v4241_v52, %v9486_v46  ;;  %v9653_v23 = vmul.f32 %v9649_v28, %v9640_v35  ;;  %4890 = vmatprep.subr.mxu0 %v4835_v0  ;;  %v4130_v44 = vpop.f32.mrf.mxu0  ;;  %v4827_v46 = vld [vmem:[#allocation8 + $0x68] sm:$0xff]  ;;  %10591 = vst [vmem:[#allocation51_spill] sm:$0xff] %v9663_v26  ;;  %v9667_v52 = vmul.f32 %v9663_v26, %v9638_v58  ;;  %v4826_v28 = vld [vmem:[#allocation8 + $0x60] sm:$0xff] }
 0x4ee   : > { %v4243_v21 = vpop.f32.mrf.mxu1  ;;  %4891 = vmatpush1.msra.mxu0 %v4834_v39  ;;  %v9656_v24 = vadd.f32 %v4130_v44, %v9490_v25  ;;  %v4845_v25 = vld [vmem:[#allocation8 + $0xf8] sm:$0xff]  ;;  %v4844_v39 = vld [vmem:[#allocation8 + $0xf0] sm:$0xff]  ;;  %v4823_v44 = vld [vmem:[#allocation8 + $0x48] sm:$0xff] }
 0x4ef   : > { %v9659_v3 = vadd.f32 %v4243_v21, %v9492_v31  ;;  %6556 = vmatprep.subr.mxu1 %v9653_v23  ;;  %4892 = vmatprep.subr.mxu0 %v4831_v8  ;;  %v4134_v0 = vpop.f32.mrf.mxu0  ;;  %v4841_v26 = vld [vmem:[#allocation8 + $0xd8] sm:$0xff] }
 0x4f0   : > { %v4247_v35 = vpop.f32.mrf.mxu1  ;;  %6557 = vmatpush3.msra.mxu1 %v9653_v23  ;;  %4893 = vmatpush1.msra.mxu0 %v4830_v6  ;;  %v9671_v31 = vadd.f32 %v4134_v0, %v9496_v13  ;;  %v4822_v0 = vld [vmem:[#allocation8 + $0x40] sm:$0xff] }
 0x4f1   : > { %v9674_v21 = vadd.f32 %v4247_v35, %v9498_v1  ;;  %6558 = vmatprep.subr.mxu1 %v9667_v52  ;;  %4894 = vmatprep.subr.mxu0 %v4827_v46  ;;  %v4136_v58 = vpop.f32.mrf.mxu0  ;;  %v10593_v1 = vld [vmem:[#allocation26_spill] sm:$0xff]  ;;  %v4840_v35 = vld [vmem:[#allocation8 + $0xd0] sm:$0xff]  ;;  %v4819_v46 = vld [vmem:[#allocation8 + $0x28] sm:$0xff] }
 0x4f2   : > { %v4249_v8 = vpop.f32.mrf.mxu1  ;;  %6559 = vmatpush3.msra.mxu1 %v9667_v52  ;;  %4895 = vmatpush1.msra.mxu0 %v4826_v28  ;;  %v9679_v6 = vadd.f32 %v4136_v58, %v9504_v18  ;;  %v4836_v58 = vld [vmem:[#allocation8 + $0xb0] sm:$0xff] }
 0x4f3   : > { %v9682_v13 = vadd.f32 %v4249_v8, %v9506_v47  ;;  %6561 = vmatmul.mubr.msk.f32.vlgmr.msra.gmra.mxu1 %vm521_vm0, %v10593_v1  ;;  %4999 = vmatprep.subr.mxu1 %v4845_v25  ;;  %v4140_v2 = vpop.f32.mrf.mxu0  ;;  %v4818_v47 = vld [vmem:[#allocation8 + $0x20] sm:$0xff]  ;;  %v4815_v8 = vld [vmem:[#allocation8 + $0x8] sm:$0xff] }
 0x4f4   : > { %10592 = vst [vmem:[#allocation56_spill] sm:$0xff] %v9679_v6  ;;  %v4253_v29 = vpop.f32.mrf.mxu1  ;;  %5000 = vmatpush1.msra.mxu1 %v4844_v39  ;;  %4896 = vmatprep.subr.mxu0 %v4823_v44  ;;  %v9687_v28 = vadd.f32 %v4140_v2, %v9516_v57  ;;  %v4833_v6 = vld [vmem:[#allocation8 + $0x98] sm:$0xff]  ;;  %v4814_v57 = vld [vmem:[#allocation8] sm:$0xff] }
 0x4f5   : > { %v9690_v18 = vadd.f32 %v4253_v29, %v9518_v53  ;;  %5001 = vmatprep.subr.mxu1 %v4841_v26  ;;  %4897 = vmatpush1.msra.mxu0 %v4822_v0  ;;  %v4142_v1 = vpop.f32.mrf.mxu0  ;;  %v4832_v29 = vld [vmem:[#allocation8 + $0x90] sm:$0xff]  ;;  %v4829_v26 = vld [vmem:[#allocation8 + $0x78] sm:$0xff] }
 0x4f6   : > { %v4255_v25 = vpop.f32.mrf.mxu1  ;;  %5002 = vmatpush1.msra.mxu1 %v4840_v35  ;;  %4898 = vmatprep.subr.mxu0 %v4819_v46  ;;  %v9693_v39 = vadd.f32 %v4142_v1, %v9522_v14  ;;  %v4828_v14 = vld [vmem:[#allocation8 + $0x70] sm:$0xff]  ;;  %v5160_v1 = vld [vmem:[#allocation8 + $0x1f8] sm:$0xff] }
 0x4f7   : > { %10594 = vst [vmem:[#allocation48_spill] sm:$0xff] %v9690_v18  ;;  %v9696_v44 = vadd.f32 %v4255_v25, %v9524_v62  ;;  %5003 = vmatprep.subr.mxu1 %v4837_v54  ;;  %4899 = vmatpush1.msra.mxu0 %v4818_v47  ;;  %v4146_v53 = vpop.f32.mrf.mxu0  ;;  %v4825_v62 = vld [vmem:[#allocation8 + $0x58] sm:$0xff]  ;;  %v5158_v54 = vld [vmem:[#allocation8 + $0x1e8] sm:$0xff]  ;;  %v4824_v46 = vld [vmem:[#allocation8 + $0x50] sm:$0xff] }
 0x4f8   : > { %10595 = vst [vmem:[#allocation80_spill] sm:$0xff] %v9693_v39  ;;  %v4259_v2 = vpop.f32.mrf.mxu1  ;;  %5004 = vmatpush1.msra.mxu1 %v4836_v58  ;;  %4900 = vmatprep.subr.mxu0 %v4815_v8  ;;  %v9699_v0 = vadd.f32 %v4146_v53, %v9531_v20  ;;  %v4821_v47 = vld [vmem:[#allocation8 + $0x38] sm:$0xff]  ;;  %v4820_v20 = vld [vmem:[#allocation8 + $0x30] sm:$0xff]  ;;  %v5154_v58 = vld [vmem:[#allocation8 + $0x1c8] sm:$0xff] }
 0x4f9   : > { %10596 = vst [vmem:[#allocation84_spill] sm:$0xff] %v9696_v44  ;;  %v9702_v35 = vadd.f32 %v4259_v2, %v9533_v5  ;;  %5005 = vmatprep.subr.mxu1 %v4833_v6  ;;  %4901 = vmatpush1.msra.mxu0 %v4814_v57  ;;  %v5157_v5 = vld [vmem:[#allocation8 + $0x1e0] sm:$0xff]  ;;  %v4817_v6 = vld [vmem:[#allocation8 + $0x18] sm:$0xff]  ;;  %v4816_v8 = vld [vmem:[#allocation8 + $0x10] sm:$0xff] }
 0x4fa   : > { %10597 = vst [vmem:[#allocation85_spill] sm:$0xff] %v9699_v0  ;;  %5006 = vmatpush1.msra.mxu1 %v4832_v29  ;;  %6341 = vmatmul.mubr.msk.f32.vlgmr.msra.gmra.mxu0 %vm1654_vm1, %v9514_v12  ;;  %v5159_v25 = vld [vmem:[#allocation8 + $0x1f0] sm:$0xff]  ;;  %v5153_v57 = vld [vmem:[#allocation8 + $0x1c0] sm:$0xff]  ;;  %v5156_v29 = vld [vmem:[#allocation8 + $0x1d8] sm:$0xff] }
 0x4fb   : > { %10598 = vst [vmem:[#allocation83_spill] sm:$0xff] %v9702_v35  ;;  %5007 = vmatprep.subr.mxu1 %v4829_v26  ;;  %4940 = vmatprep.mubr.f32.mxu0 %v10587_v42  ;;  %v5155_v53 = vld [vmem:[#allocation8 + $0x1d0] sm:$0xff]  ;;  %v5150_v2 = vld [vmem:[#allocation8 + $0x1a8] sm:$0xff]  ;;  %v5152_v26 = vld [vmem:[#allocation8 + $0x1b8] sm:$0xff] }
 0x4fc   : > { %5008 = vmatpush1.msra.mxu1 %v4828_v14  ;;  %5047 = vmatprep.mubr.f32.mxu1 %v10587_v42  ;;  %v5149_v14 = vld [vmem:[#allocation8 + $0x1a0] sm:$0xff] }
 0x4fd   : > { %5009 = vmatprep.subr.mxu1 %v4825_v62  ;;  %5201 = vmatprep.subr.mxu0 %v5158_v54  ;;  %v5146_v62 = vld [vmem:[#allocation8 + $0x188] sm:$0xff]  ;;  %v5148_v54 = vld [vmem:[#allocation8 + $0x198] sm:$0xff] }
 0x4fe   : > { %5010 = vmatpush1.msra.mxu1 %v4824_v46  ;;  %6342 = vmatmul.mubr.msk.f32.gmra.mxu0 %vm1654_vm1, %v9502_v59  ;;  %v5145_v46 = vld [vmem:[#allocation8 + $0x180] sm:$0xff] }
 0x4ff   : > { %5011 = vmatprep.subr.mxu1 %v4821_v47  ;;  %4946 = vmatprep.mubr.f32.mxu0 %v10587_v42  ;;  %v5142_v47 = vld [vmem:[#allocation8 + $0x168] sm:$0xff] }
 0x500   : > { %5012 = vmatpush1.msra.mxu1 %v4820_v20  ;;  %5202 = vmatpush1.msra.mxu0 %v5157_v5  ;;  %v5144_v20 = vld [vmem:[#allocation8 + $0x178] sm:$0xff]  ;;  %v5141_v5 = vld [vmem:[#allocation8 + $0x160] sm:$0xff] }
 0x501   : > { %5013 = vmatprep.subr.mxu1 %v4817_v6  ;;  %5203 = vmatprep.subr.mxu0 %v5154_v58  ;;  %v5138_v6 = vld [vmem:[#allocation8 + $0x148] sm:$0xff]  ;;  %v5140_v58 = vld [vmem:[#allocation8 + $0x158] sm:$0xff] }
 0x502   : > { %5014 = vmatpush1.msra.mxu1 %v4816_v8  ;;  %6343 = vmatmul.mubr.msk.f32.gmra.mxu0 %vm1654_vm1, %v9556_v38  ;;  %v5137_v8 = vld [vmem:[#allocation8 + $0x140] sm:$0xff] }
 0x503   : > { %6349 = vmatmul.mubr.msk.f32.vlgmr.msra.gmra.mxu1 %vm1654_vm1, %v9514_v12  ;;  %4952 = vmatprep.mubr.f32.mxu0 %v10587_v42  ;;  %v5151_v12 = vld [vmem:[#allocation8 + $0x1b0] sm:$0xff] }
 0x504   : > { %5053 = vmatprep.mubr.f32.mxu1 %v10587_v42  ;;  %5314 = vmatprep.subr.mxu1 %v5160_v1  ;;  %v5134_v1 = vld [vmem:[#allocation8 + $0x128] sm:$0xff] }
 0x505   : > { %5315 = vmatpush1.msra.mxu1 %v5159_v25  ;;  %5204 = vmatpush1.msra.mxu0 %v5153_v57  ;;  %v5136_v25 = vld [vmem:[#allocation8 + $0x138] sm:$0xff]  ;;  %v5133_v57 = vld [vmem:[#allocation8 + $0x120] sm:$0xff] }
 0x506   : > { %6344 = vmatmul.mubr.msk.f32.gmra.mxu0 %vm1654_vm1, %v9548_v43  ;;  %5316 = vmatprep.subr.mxu1 %v5156_v29  ;;  %v5130_v29 = vld [vmem:[#allocation8 + $0x108] sm:$0xff] }
 0x507   : > { %6350 = vmatmul.mubr.msk.f32.gmra.mxu1 %vm1654_vm1, %v9502_v59  ;;  %4958 = vmatprep.mubr.f32.mxu0 %v10587_v42  ;;  %v5147_v59 = vld [vmem:[#allocation8 + $0x190] sm:$0xff] }
 0x508   : > { %5059 = vmatprep.mubr.f32.mxu1 %v10587_v42  ;;  %5317 = vmatpush1.msra.mxu1 %v5155_v53  ;;  %v5132_v53 = vld [vmem:[#allocation8 + $0x118] sm:$0xff] }
 0x509   : > { %5205 = vmatprep.subr.mxu0 %v5150_v2  ;;  %5318 = vmatprep.subr.mxu1 %v5152_v26  ;;  %v5129_v2 = vld [vmem:[#allocation8 + $0x100] sm:$0xff]  ;;  %v5131_v26 = vld [vmem:[#allocation8 + $0x110] sm:$0xff] }
 0x50a   : > { %6345 = vmatmul.mubr.msk.f32.gmra.mxu0 %vm1654_vm1, %v9612_v30  ;;  %5319 = vmatpush1.msra.mxu1 %v5151_v12 }
 0x50b   : > { %6351 = vmatmul.mubr.msk.f32.gmra.mxu1 %vm1654_vm1, %v9556_v38  ;;  %4964 = vmatprep.mubr.f32.mxu0 %v10587_v42  ;;  %v5143_v38 = vld [vmem:[#allocation8 + $0x170] sm:$0xff] }
 0x50c   : > { %5065 = vmatprep.mubr.f32.mxu1 %v10587_v42  ;;  %5206 = vmatpush1.msra.mxu0 %v5149_v14 }
 0x50d   : > { %5207 = vmatprep.subr.mxu0 %v5146_v62  ;;  %5320 = vmatprep.subr.mxu1 %v5148_v54 }
 0x50e   : > { %6346 = vmatmul.mubr.msk.f32.gmra.mxu0 %vm1654_vm1, %v9598_v11  ;;  %5321 = vmatpush1.msra.mxu1 %v5147_v59 }
 0x50f   : > { %6352 = vmatmul.mubr.msk.f32.gmra.mxu1 %vm1654_vm1, %v9548_v43  ;;  %4970 = vmatprep.mubr.f32.mxu0 %v10587_v42  ;;  %v5139_v43 = vld [vmem:[#allocation8 + $0x150] sm:$0xff] }
 0x510   : > { %5071 = vmatprep.mubr.f32.mxu1 %v10587_v42  ;;  %5208 = vmatpush1.msra.mxu0 %v5145_v46 }
 0x511   : > { %5209 = vmatprep.subr.mxu0 %v5142_v47  ;;  %5322 = vmatprep.subr.mxu1 %v5144_v20 }
 0x512   : > { %6347 = vmatmul.mubr.msk.f32.gmra.mxu0 %vm1654_vm1, %v9667_v52  ;;  %5323 = vmatpush1.msra.mxu1 %v5143_v38 }
 0x513   : > { %6353 = vmatmul.mubr.msk.f32.gmra.mxu1 %vm1654_vm1, %v9612_v30  ;;  %4976 = vmatprep.mubr.f32.mxu0 %v10587_v42  ;;  %v5135_v30 = vld [vmem:[#allocation8 + $0x130] sm:$0xff] }
 0x514   : > { %5077 = vmatprep.mubr.f32.mxu1 %v10587_v42  ;;  %5210 = vmatpush1.msra.mxu0 %v5141_v5 }
 0x515   : > { %5211 = vmatprep.subr.mxu0 %v5138_v6  ;;  %5324 = vmatprep.subr.mxu1 %v5140_v58 }
 0x516   : > { %6348 = vmatmul.mubr.msk.f32.gmra.mxu0 %vm1654_vm1, %v9653_v23  ;;  %5325 = vmatpush1.msra.mxu1 %v5139_v43 }
 0x517   : > { %6354 = vmatmul.mubr.msk.f32.gmra.mxu1 %vm1654_vm1, %v9598_v11  ;;  %5212 = vmatpush1.msra.mxu0 %v5137_v8  ;;  %v9753_v11 = vpop.f32.mrf.mxu0 }
 0x518   : > { %5083 = vmatprep.mubr.f32.mxu1 %v10587_v42  ;;  %5213 = vmatprep.subr.mxu0 %v5134_v1  ;;  %10599 = vst [vmem:[#allocation50_spill] sm:$0xff] %v9753_v11 }
 0x519   : > { %5326 = vmatprep.subr.mxu1 %v5136_v25  ;;  %5214 = vmatpush1.msra.mxu0 %v5133_v57 }
 0x51a   : > { %5327 = vmatpush1.msra.mxu1 %v5135_v30  ;;  %5215 = vmatprep.subr.mxu0 %v5130_v29 }
 0x51b   : > { %6355 = vmatmul.mubr.msk.f32.gmra.mxu1 %vm1654_vm1, %v9667_v52  ;;  %5328 = vmatprep.subr.mxu1 %v5132_v53  ;;  %v4261_v52 = vpop.f32.mrf.mxu1 }
 0x51c   : > { %5089 = vmatprep.mubr.f32.mxu1 %v10587_v42  ;;  %5216 = vmatpush1.msra.mxu0 %v5129_v2 }
 0x51d   : > { %5249 = vmatprep.mubr.f32.mxu0 %v10587_v42  ;;  %5329 = vmatpush1.msra.mxu1 %v5131_v26 }
 0x51f   : > { %6356 = vmatmul.mubr.msk.f32.gmra.mxu1 %vm1654_vm1, %v9653_v23 }
 0x520   : > { %5362 = vmatprep.mubr.f32.mxu1 %v10587_v42 }
 0x596   : > { %v6541_v12 = vpop.f32.mrf.mxu0 }
 0x598   : > { %v4580_v14 = vpop.f32.mrf.mxu0 }
 0x599   : > { %6357 = vmatmul.mubr.msk.f32.vlgmr.msra.gmra.mxu0 %vm1654_vm1, %v4580_v14  ;;  %6365 = vmatmul.mubr.msk.f32.vlgmr.msra.gmra.mxu1 %vm1654_vm1, %v4580_v14  ;;  %v4262_v14 = vadd.f32 %v4261_v52, %v9541_v15 }
 0x59a   : > { %5255 = vmatprep.mubr.f32.mxu0 %v10587_v42  ;;  %5368 = vmatprep.mubr.f32.mxu1 %v10587_v42 }
 0x59d   : > { %6358 = vmatmul.mubr.msk.f32.gmra.mxu0 %vm1654_vm1, %v6541_v12  ;;  %6366 = vmatmul.mubr.msk.f32.gmra.mxu1 %vm1654_vm1, %v6541_v12 }
 0x59e   : > { %5261 = vmatprep.mubr.f32.mxu0 %v10587_v42  ;;  %5374 = vmatprep.mubr.f32.mxu1 %v10587_v42 }
 0x59f   : > { %v6548_v23 = vpop.f32.mrf.mxu1 }
 0x5a1   : > { %v4655_v62 = vpop.f32.mrf.mxu1 }
 0x5a2   : > { %6359 = vmatmul.mubr.msk.f32.gmra.mxu0 %vm1654_vm1, %v4655_v62  ;;  %6367 = vmatmul.mubr.msk.f32.gmra.mxu1 %vm1654_vm1, %v4655_v62 }
 0x5a3   : > { %5267 = vmatprep.mubr.f32.mxu0 %v10587_v42  ;;  %5380 = vmatprep.mubr.f32.mxu1 %v10587_v42 }
 0x5a6   : > { %6360 = vmatmul.mubr.msk.f32.gmra.mxu0 %vm1654_vm1, %v6548_v23  ;;  %6368 = vmatmul.mubr.msk.f32.gmra.mxu1 %vm1654_vm1, %v6548_v23 }
 0x5a7   : > { %5273 = vmatprep.mubr.f32.mxu0 %v10587_v42  ;;  %5386 = vmatprep.mubr.f32.mxu1 %v10587_v42 }
 0x5a9   : > { %v6555_v54 = vpop.f32.mrf.mxu0 }
 0x5ab   : > { %v4730_v59 = vpop.f32.mrf.mxu0 }
 0x5ac   : > { %6361 = vmatmul.mubr.msk.f32.gmra.mxu0 %vm1654_vm1, %v4730_v59  ;;  %6369 = vmatmul.mubr.msk.f32.gmra.mxu1 %vm1654_vm1, %v4730_v59 }
 0x5ad   : > { %5279 = vmatprep.mubr.f32.mxu0 %v10587_v42  ;;  %5392 = vmatprep.mubr.f32.mxu1 %v10587_v42 }
 0x5b0   : > { %6362 = vmatmul.mubr.msk.f32.gmra.mxu0 %vm1654_vm1, %v6555_v54  ;;  %6370 = vmatmul.mubr.msk.f32.gmra.mxu1 %vm1654_vm1, %v6555_v54 }
 0x5b1   : > { %5285 = vmatprep.mubr.f32.mxu0 %v10587_v42  ;;  %5398 = vmatprep.mubr.f32.mxu1 %v10587_v42 }
 0x5b3   : > { %v6562_v46 = vpop.f32.mrf.mxu1 }
 0x5b5   : > { %v4805_v47 = vpop.f32.mrf.mxu1 }
 0x5b6   : > { %6363 = vmatmul.mubr.msk.f32.gmra.mxu0 %vm1654_vm1, %v4805_v47  ;;  %6371 = vmatmul.mubr.msk.f32.gmra.mxu1 %vm1654_vm1, %v4805_v47 }
 0x5b7   : > { %5291 = vmatprep.mubr.f32.mxu0 %v10587_v42  ;;  %5404 = vmatprep.mubr.f32.mxu1 %v10587_v42 }
 0x5ba   : > { %6364 = vmatmul.mubr.msk.f32.gmra.mxu0 %vm1654_vm1, %v6562_v46  ;;  %6372 = vmatmul.mubr.msk.f32.gmra.mxu1 %vm1654_vm1, %v6562_v46  ;;  %v4936_v54 = vpop.f32.mrf.mxu0 }
 0x5c3   : > { %v5049_v20 = vpop.f32.mrf.mxu1 }
 0x5c5   : > { %v5051_v38 = vpop.f32.mrf.mxu1 }
 0x5c7   : > { %v5055_v5 = vpop.f32.mrf.mxu1 }
 0x5c9   : > { %v9785_v6 = vpop.f32.mrf.mxu1 }
 0x5cb   : > { %v9787_v58 = vpop.f32.mrf.mxu1 }
 0x5cd   : > { %v9789_v43 = vpop.f32.mrf.mxu1 }
 0x5cf   : > { %v9791_v8 = vpop.f32.mrf.mxu1 }
 0x5d1   : > { %v9793_v1 = vpop.f32.mrf.mxu1 }
 0x5d3   : > { %v9795_v25 = vpop.f32.mrf.mxu1 }
 0x5d5   : > { %v5075_v42 = vpop.f32.mrf.mxu1 }
 0x5d6   : > { %v9798_v57 = vadd.f32 %v5075_v42, %v9659_v3  ;;  %v4938_v3 = vpop.f32.mrf.mxu0 }
 0x5d7   : > { %v9800_v30 = vpop.f32.mrf.mxu1  ;;  %v5097_v0 = vadd.f32 %v4938_v3, %v9567_v34  ;;  %v5099_v34 = vadd.f32 %v5051_v38, %v9570_v49 }
 0x5d8   : > { %10600 = vst [vmem:[#allocation82_spill] sm:$0xff] %v9798_v57  ;;  %v4942_v59 = vpop.f32.mrf.mxu0  ;;  %v5098_v57 = vadd.f32 %v5049_v20, %v9562_v63 }
 0x5d9   : > { %v5081_v29 = vpop.f32.mrf.mxu1 }
 0x5da   : > { %v9803_v53 = vadd.f32 %v5081_v29, %v9682_v13  ;;  %v4944_v46 = vpop.f32.mrf.mxu0 }
 0x5db   : > { %v9805_v2 = vpop.f32.mrf.mxu1 }
 0x5dc   : > { %10601 = vst [vmem:[#allocation53_spill] sm:$0xff] %v9803_v53  ;;  %10602 = vst [vmem:[#allocation58_spill] sm:$0xff] %v9805_v2  ;;  %v4948_v47 = vpop.f32.mrf.mxu0 }
 0x5dd   : > { %v9807_v26 = vpop.f32.mrf.mxu1  ;;  %v5104_v38 = vadd.f32 %v4948_v47, %v9601_v7  ;;  %v5106_v47 = vadd.f32 %v9787_v58, %v9604_v51 }
 0x5de   : > { %10603 = vst [vmem:[#allocation86_spill] sm:$0xff] %v9807_v26  ;;  %v4950_v42 = vpop.f32.mrf.mxu0 }
 0x5df   : > { %v9809_v12 = vpop.f32.mrf.mxu1  ;;  %v5105_v58 = vadd.f32 %v4950_v42, %v9616_v45  ;;  %v5107_v45 = vadd.f32 %v9789_v43, %v9619_v50 }
 0x5e0   : > { %10604 = vst [vmem:[#allocation87_spill] sm:$0xff] %v9809_v12  ;;  %v4954_v44 = vpop.f32.mrf.mxu0 }
 0x5e1   : > { %v5093_v23 = vpop.f32.mrf.mxu1 }
 0x5e2   : > { %v9812_v62 = vadd.f32 %v5093_v23, %v4262_v14  ;;  %v9814_v13 = vpop.f32.mrf.mxu0 }
 0x5e4   : > { %10605 = vst [vmem:[#allocation88_spill] sm:$0xff] %v9812_v62  ;;  %v9816_v29 = vpop.f32.mrf.mxu0  ;;  %v5096_v62 = vadd.f32 %v4936_v54, %v9559_v55 }
 0x5e5   : > { %v5112_v50 = vadd.f32 %v9816_v29, %v9643_v22  ;;  %v5114_v22 = vadd.f32 %v9795_v25, %v9646_v41 }
 0x5e6   : > { %v9818_v53 = vpop.f32.mrf.mxu0 }
 0x5e7   : > { %v5113_v41 = vadd.f32 %v9818_v53, %v9656_v24 }
 0x5e8   : > { %v9820_v26 = vpop.f32.mrf.mxu0 }
 0x5ea   : > { %v9822_v11 = vpop.f32.mrf.mxu0 }
 0x5eb   : > { %10606 = vst [vmem:[#allocation89_spill] sm:$0xff] %v9822_v11 }
 0x5ec   : > { %v9824_v15 = vpop.f32.mrf.mxu0 }
 0x5ed   : > { %v5120_v24 = vadd.f32 %v9824_v15, %v9687_v28  ;;  %v10610_v28 = vld [vmem:[#allocation58_spill] sm:$0xff] }
 0x5ee   : > { %v9826_v52 = vpop.f32.mrf.mxu0 }
 0x5ef   : > { %10607 = vst [vmem:[#allocation90_spill] sm:$0xff] %v9826_v52  ;;  %v5100_v52 = vadd.f32 %v4942_v59, %v9576_v32 }
 0x5f0   : > { %v9828_v14 = vpop.f32.mrf.mxu0 }
 0x5f1   : > { %10608 = vst [vmem:[#allocation55_spill] sm:$0xff] %v9828_v14 }
 0x5f2   : > { %v9830_v23 = vpop.f32.mrf.mxu0 }
 0x659   : > { %v5251_v12 = vpop.f32.mrf.mxu0  ;;  %v5364_v35 = vpop.f32.mrf.mxu1 }
 0x65a   : > { %v9835_v39 = vadd.f32 %v5251_v12, %v5096_v62  ;;  %v9837_v2 = vadd.f32 %v5364_v35, %v5098_v57  ;;  %v5102_v35 = vadd.f32 %v5055_v5, %v9579_v60  ;;  %v5101_v60 = vadd.f32 %v4944_v46, %v9588_v4 }
 0x65b   : > { %v5253_v11 = vpop.f32.mrf.mxu0  ;;  %v5366_v18 = vpop.f32.mrf.mxu1  ;;  %v5103_v4 = vadd.f32 %v9785_v6, %v9591_v61  ;;  %v5108_v61 = vadd.f32 %v4954_v44, %v9624_v17  ;;  %v5110_v17 = vadd.f32 %v9791_v8, %v9627_v36  ;;  %v5109_v36 = vadd.f32 %v9814_v13, %v9632_v9 }
 0x65c   : > { %v5451_v14 = vmul.f32 %v9835_v39, %v9048_v40  ;;  %v5579_v55 = vmul.f32 %v9837_v2, %v9302_v19  ;;  %v9844_v54 = vadd.f32 %v5253_v11, %v5097_v0  ;;  %v9854_v0 = vadd.f32 %v5366_v18, %v5099_v34 }
 0x65d   : > { %v5257_v63 = vpop.f32.mrf.mxu0  ;;  %v5370_v20 = vpop.f32.mrf.mxu1  ;;  %v5111_v9 = vadd.f32 %v9793_v1, %v9635_v16  ;;  %v5116_v16 = vadd.f32 %v9820_v26, %v9671_v31  ;;  %v5118_v31 = vadd.f32 %v9800_v30, %v9674_v21  ;;  %v10611_v21 = vld [vmem:[#allocation56_spill] sm:$0xff]  ;;  %v10612_v30 = vld [vmem:[#allocation89_spill] sm:$0xff] }
 0x65e   : > { %v9847_v12 = vadd.f32 %v5257_v63, %v5100_v52  ;;  %5595 = vrot.lane.b32.xlu0 %v5579_v55, %s6994_s16  ;;  %5467 = vrot.lane.b32.xlu1 %v5451_v14, %s6994_s16  ;;  %v5515_v62 = vmul.f32 %v9844_v54, %v9221_v48  ;;  %v9858_v49 = vadd.f32 %v5370_v20, %v5102_v35 }
 0x65f   : > { %v5259_v32 = vpop.f32.mrf.mxu0  ;;  %v5372_v57 = vpop.f32.mrf.mxu1  ;;  %v5643_v5 = vmul.f32 %v9854_v0, %v9330_v27 }
 0x660   : > { %v5452_v11 = vmul.f32 %v9847_v12, %v9020_v56  ;;  %v5580_v14 = vmul.f32 %v9858_v49, %v9274_v10  ;;  %v9870_v55 = vadd.f32 %v5259_v32, %v5101_v60  ;;  %v9884_v35 = vadd.f32 %v5372_v57, %v5103_v4 }
 0x662   : > { %v5263_v3 = vpop.f32.mrf.mxu0  ;;  %v5376_v59 = vpop.f32.mrf.mxu1  ;;  %5531 = vrot.lane.b32.xlu0 %v5515_v62, %s6994_s16  ;;  %5469 = vrot.lane.b32.xlu1 %v5452_v11, %s6994_s16  ;;  %v5516_v34 = vmul.f32 %v9870_v55, %v9182_v33  ;;  %v5644_v11 = vmul.f32 %v9884_v35, %v9355_v37 }
 0x663   : > { %v9866_v18 = vadd.f32 %v5263_v3, %v5104_v38  ;;  %v9880_v20 = vadd.f32 %v5376_v59, %v5106_v47 }
 0x664   : > { %v5265_v52 = vpop.f32.mrf.mxu0  ;;  %v5378_v7 = vpop.f32.mrf.mxu1 }
 0x665   : > { %v5453_v46 = vmul.f32 %v9866_v18, %v9048_v40  ;;  %v5581_v6 = vmul.f32 %v9880_v20, %v9302_v19  ;;  %v9892_v62 = vadd.f32 %v5265_v52, %v5105_v58  ;;  %v9906_v42 = vadd.f32 %v5378_v7, %v5107_v45  ;;  %v10609_v45 = vld [vmem:[#allocation48_spill] sm:$0xff] }
 0x666   : > { %v5269_v63 = vpop.f32.mrf.mxu0  ;;  %5659 = vrot.lane.b32.xlu0 %v5643_v5, %s6994_s16  ;;  %5597 = vrot.lane.b32.xlu1 %v5580_v14, %s6994_s16  ;;  %v5382_v32 = vpop.f32.mrf.mxu1  ;;  %v5122_v15 = vadd.f32 %v10610_v28, %v10609_v45 }
 0x667   : > { %v9896_v57 = vadd.f32 %v5269_v63, %v5108_v61  ;;  %v5517_v44 = vmul.f32 %v9892_v62, %v9221_v48  ;;  %v9910_v60 = vadd.f32 %v5382_v32, %v5110_v17  ;;  %v5645_v43 = vmul.f32 %v9906_v42, %v9330_v27 }
 0x668   : > { %v5271_v51 = vpop.f32.mrf.mxu0  ;;  %v5384_v38 = vpop.f32.mrf.mxu1 }
 0x669   : > { %v5454_v59 = vmul.f32 %v9896_v57, %v9020_v56  ;;  %v5582_v14 = vmul.f32 %v9910_v60, %v9274_v10  ;;  %v9924_v7 = vadd.f32 %v5271_v51, %v5109_v36  ;;  %v10613_v36 = vld [vmem:[#allocation80_spill] sm:$0xff] }
 0x66a   : > { %5471 = vrot.lane.b32.xlu0 %v5453_v46, %s6994_s16  ;;  %5533 = vrot.lane.b32.xlu1 %v5516_v34, %s6994_s16  ;;  %v9938_v46 = vadd.f32 %v5384_v38, %v5111_v9  ;;  %v10615_v9 = vld [vmem:[#allocation85_spill] sm:$0xff] }
 0x66b   : > { %v5518_v4 = vmul.f32 %v9924_v7, %v9182_v33 }
 0x66c   : > { %v5275_v3 = vpop.f32.mrf.mxu0  ;;  %v5388_v5 = vpop.f32.mrf.mxu1  ;;  %v5646_v51 = vmul.f32 %v9938_v46, %v9355_v37 }
 0x66d   : > { %v9920_v8 = vadd.f32 %v5275_v3, %v5112_v50  ;;  %v9934_v29 = vadd.f32 %v5388_v5, %v5114_v22 }
 0x66e   : > { %5599 = vrot.lane.b32.xlu0 %v5581_v6, %s6994_s16  ;;  %5661 = vrot.lane.b32.xlu1 %v5644_v11, %s6994_s16  ;;  %v5277_v52 = vpop.f32.mrf.mxu0  ;;  %v5390_v47 = vpop.f32.mrf.mxu1 }
 0x66f   : > { %v5455_v13 = vmul.f32 %v9920_v8, %v9048_v40  ;;  %v5583_v1 = vmul.f32 %v9934_v29, %v9302_v19  ;;  %v9948_v25 = vadd.f32 %v5277_v52, %v5113_v41 }
 0x670   : > { %v5281_v63 = vpop.f32.mrf.mxu0  ;;  %v5394_v34 = vpop.f32.mrf.mxu1 }
 0x671   : > { %v9952_v58 = vadd.f32 %v5281_v63, %v5116_v16  ;;  %v5519_v53 = vmul.f32 %v9948_v25, %v9221_v48  ;;  %v9966_v38 = vadd.f32 %v5394_v34, %v5118_v31 }
 0x672   : > { %5535 = vrot.lane.b32.xlu0 %v5517_v44, %s6994_s16  ;;  %5473 = vrot.lane.b32.xlu1 %v5454_v59, %s6994_s16  ;;  %v5283_v32 = vpop.f32.mrf.mxu0  ;;  %v5396_v61 = vpop.f32.mrf.mxu1  ;;  %v5117_v44 = vadd.f32 %v10612_v30, %v10611_v21 }
 0x673   : > { %v5456_v11 = vmul.f32 %v9952_v58, %v9020_v56  ;;  %v5584_v52 = vmul.f32 %v9966_v38, %v9274_v10 }
 0x674   : > { %v9980_v50 = vadd.f32 %v5283_v32, %v5117_v44 }
 0x676   : > { %5663 = vrot.lane.b32.xlu0 %v5645_v43, %s6994_s16  ;;  %5601 = vrot.lane.b32.xlu1 %v5582_v14, %s6994_s16  ;;  %v5287_v6 = vpop.f32.mrf.mxu0  ;;  %v5400_v3 = vpop.f32.mrf.mxu1  ;;  %v10614_v43 = vld [vmem:[#allocation90_spill] sm:$0xff]  ;;  %v5520_v32 = vmul.f32 %v9980_v50, %v9182_v33 }
 0x677   : > { %v9962_v26 = vadd.f32 %v5287_v6, %v5120_v24  ;;  %v9976_v5 = vadd.f32 %v5400_v3, %v5122_v15  ;;  %v5121_v14 = vadd.f32 %v10614_v43, %v10613_v36  ;;  %v10619_v24 = vld [vmem:[#allocation82_spill] sm:$0xff]  ;;  %v10622_v15 = vld [vmem:[#allocation84_spill] sm:$0xff] }
 0x678   : > { %v5289_v17 = vpop.f32.mrf.mxu0  ;;  %v5402_v63 = vpop.f32.mrf.mxu1  ;;  %v10001_v31 = vadd.f32 %v5390_v47, %v10619_v24  ;;  %v10634_v24 = vld [vmem:[#allocation27_spill] sm:$0xff] }
 0x679   : > { %v5457_v59 = vmul.f32 %v9962_v26, %v9048_v40  ;;  %v5585_v40 = vmul.f32 %v9976_v5, %v9302_v19  ;;  %v9990_v34 = vadd.f32 %v5289_v17, %v5121_v14  ;;  %v10623_v17 = vld [vmem:[#allocation86_spill] sm:$0xff] }
 0x67a   : > { %5475 = vrot.lane.b32.xlu0 %v5455_v13, %s6994_s16  ;;  %5537 = vrot.lane.b32.xlu1 %v5518_v4, %s6994_s16  ;;  %v5293_v22 = vpop.f32.mrf.mxu0  ;;  %v10616_v13 = vld [vmem:[#allocation55_spill] sm:$0xff]  ;;  %v5406_v16 = vpop.f32.mrf.mxu1  ;;  %v5123_v21 = vadd.f32 %v10623_v17, %v10622_v15 }
 0x67b   : > { %v5124_v4 = vadd.f32 %v10616_v13, %v10615_v9  ;;  %v5521_v19 = vmul.f32 %v9990_v34, %v9221_v48  ;;  %v5647_v48 = vmul.f32 %v10001_v31, %v9330_v27  ;;  %v10626_v9 = vld [vmem:[#allocation52_spill] sm:$0xff] }
 0x67c   : > { %v5295_v30 = vpop.f32.mrf.mxu0  ;;  %v10018_v44 = vadd.f32 %v5402_v63, %v5123_v21  ;;  %v5408_v14 = vpop.f32.mrf.mxu1  ;;  %v10625_v63 = vld [vmem:[#allocation88_spill] sm:$0xff]  ;;  %v10636_v21 = vld [vmem:[#allocation33_spill] sm:$0xff] }
 0x67d   : > { %v9994_v41 = vadd.f32 %v5293_v22, %v5124_v4  ;;  %v10038_v22 = vadd.f32 %v5408_v14, %v10625_v63  ;;  %v6765_v13 = vld [vmem:[%s7285_s28 + $0x8] sm:$0xff]  ;;  %v10629_v4 = vld [vmem:[#allocation51_spill] sm:$0xff]  ;;  %s486_s28 = scalar_lea.vmem [#allocation11], %s7273_s21 }
 0x67e   : > { %5603 = vrot.lane.b32.xlu0 %v5583_v1, %s6994_s16  ;;  %5665 = vrot.lane.b32.xlu1 %v5646_v51, %s6994_s16  ;;  %v10617_v1 = vld [vmem:[#allocation83_spill] sm:$0xff]  ;;  %s5850_s21 = sshll.u32 %s486_s28, 4  ;;  %s10176_s21 = int_to_ptr.vmem [resolvable:$true] %s5850_s21 }
 0x67f   : > { %v10618_v51 = vld [vmem:[#allocation87_spill] sm:$0xff]  ;;  %v5458_v45 = vmul.f32 %v9994_v41, %v9020_v56  ;;  %s6902_s23 = scalar_lea.vmem %s10176_s21, 1024  ;;  %p6909_p8 = scmp.lt.s32.totalorder %s10176_s21, %s6907_s8 }
 0x680   : > { %v5126_v6 = vadd.f32 %v10618_v51, %v10617_v1  ;;  %v10633_v1 = vld [vmem:[#allocation120_spill] sm:$0xff]  ;;  %p6903_p2 = scmp.ne.s32.totalorder %s10176_s21, %s6902_s23  ;;  %p6910_p9 = scmp.lt.s32.totalorder %s6908_s24, %s6902_s23 }
 0x681   : > { %v5443_v51 = vmul.f32 %v9835_v39, %v10633_v1 }
 0x682   : > { %5539 = vrot.lane.b32.xlu0 %v5519_v53, %s6994_s16  ;;  %5477 = vrot.lane.b32.xlu1 %v5456_v11, %s6994_s16  ;;  %v10620_v53 = vld [vmem:[#allocation39_spill] sm:$0xff]  ;;  %v10621_v11 = vld [vmem:[#allocation50_spill] sm:$0xff]  ;;  %v10009_v28 = vadd.f32 %v5406_v16, %v5126_v6  ;;  %p6904_p1 = pnand %p6903_p2, %p10650_p7  ;;  %p6911_p10 = por %p6910_p9, %p6909_p8 }
 0x683   : > { %v4149_v3 = vadd.f32 %v10621_v11, %v10620_v53 }
 0x684   : > { %v5586_v56 = vmul.f32 %v10009_v28, %v9274_v10  ;;  %p6905_p3 = pneg %p6904_p1 }
 0x685   : > { %v5125_v47 = vadd.f32 %v9830_v23, %v4149_v3  ;;  %v5649_v23 = vmul.f32 %v10018_v44, %v9330_v27  ;;  %v5650_v27 = vmul.f32 %v10038_v22, %v9355_v37 }
 0x686   : > { %5479 = vrot.lane.b32.xlu0 %v5457_v59, %s6994_s16  ;;  %5605 = vrot.lane.b32.xlu1 %v5584_v52, %s6994_s16  ;;  %v10624_v52 = vld [vmem:[#allocation53_spill] sm:$0xff]  ;;  %p6912_p5 = pnand %p6911_p10, %p6905_p3 }
 0x687   : > { %v10022_v59 = vadd.f32 %v5295_v30, %v5125_v47  ;;  %v10029_v36 = vadd.f32 %v5396_v61, %v10624_v52  ;;  %v10628_v61 = vld [vmem:[#allocation44_spill] sm:$0xff]  ;;  %v5563_v30 = vmul.f32 %v9837_v2, %v10636_v21  ;;  %v5501_v2 = vmul.f32 %v9892_v62, %v10634_v24 }
 0x688   : > { %v10637_v47 = vld [vmem:[#allocation132_spill] sm:$0xff] }
 0x689   : > { %v5522_v43 = vmul.f32 %v10022_v59, %v9182_v33  ;;  %v5648_v10 = vmul.f32 %v10029_v36, %v9355_v37  ;;  %v10627_v33 = vld [vmem:[#allocation41_spill] sm:$0xff]  ;;  %v10632_v37 = vld [vmem:[#allocation46_spill] sm:$0xff] }
 0x68a   : > { %5607 = vrot.lane.b32.xlu0 %v5585_v40, %s6994_s16  ;;  %5541 = vrot.lane.b32.xlu1 %v5520_v32, %s6994_s16  ;;  %v10630_v40 = vld [vmem:[#allocation40_spill] sm:$0xff]  ;;  %v10631_v32 = vld [vmem:[#allocation49_spill] sm:$0xff] }
 0x68e   : > { %5543 = vrot.lane.b32.xlu0 %v5521_v19, %s6994_s16  ;;  %5481 = vrot.lane.b32.xlu1 %v5458_v45, %s6994_s16  ;;  %v5499_v19 = vmul.f32 %v9844_v54, %v10634_v24  ;;  %v10635_v45 = vld [vmem:[#allocation28_spill] sm:$0xff]  ;;  %v10638_v54 = vld [vmem:[#allocation34_spill] sm:$0xff] }
 0x68f   : > { %v5444_v15 = vmul.f32 %v9847_v12, %v10635_v45  ;;  %v5445_v12 = vmul.f32 %v9866_v18, %v10633_v1 }
 0x692   : > { %5667 = vrot.lane.b32.xlu0 %v5647_v48, %s6994_s16  ;;  %5609 = vrot.lane.b32.xlu1 %v5586_v56, %s6994_s16  ;;  %v5500_v48 = vmul.f32 %v9870_v55, %v10637_v47 }
 0x696   : > { %5671 = vrot.lane.b32.xlu0 %v5649_v23, %s6994_s16  ;;  %5545 = vrot.lane.b32.xlu1 %v5522_v43, %s6994_s16 }
 0x69a   : > { %5707 = vrot.lane.b32.xlu0 %v10626_v9, %s6994_s16  ;;  %5669 = vrot.lane.b32.xlu1 %v5648_v10, %s6994_s16  ;;  %v5627_v10 = vmul.f32 %v9854_v0, %v10638_v54 }
 0x69e   : > { %5711 = vrot.lane.b32.xlu0 %v10627_v33, %s6994_s16  ;;  %5673 = vrot.lane.b32.xlu1 %v5650_v27, %s6994_s16  ;;  %v10076_v33 = vld [vmem:[#allocation10] sm:$0xff] }
 0x6a2   : > { %5715 = vrot.lane.b32.xlu0 %v10628_v61, %s6994_s16  ;;  %5709 = vrot.lane.b32.xlu1 %v6765_v13, %s6994_s16  ;;  %v10639_v13 = vld [vmem:[#allocation32_spill] sm:$0xff] }
 0x6a6   : > { %5719 = vrot.lane.b32.xlu0 %v10629_v4, %s6994_s16  ;;  %5713 = vrot.lane.b32.xlu1 %v10630_v40, %s6994_s16  ;;  %v5564_v4 = vmul.f32 %v9858_v49, %v10639_v13  ;;  %v5565_v49 = vmul.f32 %v9880_v20, %v10636_v21 }
 0x6aa   : > { %5717 = vrot.lane.b32.xlu1 %v10631_v32, %s6994_s16 }
 0x6ae   : > { %5721 = vrot.lane.b32.xlu1 %v10632_v37, %s6994_s16 }
 0x6d0   : > { %v5596_v16 = vpop.permute.xlu0 %5595  ;;  %v5468_v6 = vpop.permute.xlu1 %5467 }
 0x6d1   : > { %v5491_v53 = vadd.f32 %v5468_v6, %v5443_v51  ;;  %v10640_v6 = vld [vmem:[#allocation47_spill] sm:$0xff] }
 0x6d3   : > { %v5507_v3 = vadd.f32 %v5499_v19, %v5491_v53  ;;  %v5628_v19 = vmul.f32 %v9884_v35, %v10640_v6 }
 0x6d4   : > { %v5532_v11 = vpop.permute.xlu0 %5531  ;;  %v5470_v17 = vpop.permute.xlu1 %5469 }
 0x6d5   : > { %v5555_v56 = vadd.f32 %v5532_v11, %v5507_v3  ;;  %v5492_v23 = vadd.f32 %v5470_v17, %v5444_v15  ;;  %v5446_v3 = vmul.f32 %v9896_v57, %v10635_v45  ;;  %v10087_v15 = vld [vmem:[#allocation10 + $0x8] sm:$0xff]  ;;  %v5629_v57 = vmul.f32 %v9906_v42, %v10638_v54 }
 0x6d7   : > { %v5571_v39 = vadd.f32 %v5563_v30, %v5555_v56  ;;  %v5508_v43 = vadd.f32 %v5500_v48, %v5492_v23  ;;  %v5502_v48 = vmul.f32 %v9924_v7, %v10637_v47  ;;  %v5503_v7 = vmul.f32 %v9948_v25, %v10634_v24 }
 0x6d8   : > { %v5660_v52 = vpop.permute.xlu0 %5659  ;;  %v5598_v14 = vpop.permute.xlu1 %5597  ;;  %v5630_v25 = vmul.f32 %v9938_v46, %v10640_v6  ;;  %v5449_v46 = vmul.f32 %v9962_v26, %v10633_v1 }
 0x6d9   : > { %v5619_v63 = vadd.f32 %v5596_v16, %v5571_v39 }
 0x6db   : > { %v5635_v9 = vadd.f32 %v5627_v10, %v5619_v63  ;;  %v5447_v63 = vmul.f32 %v9920_v8, %v10633_v1 }
 0x6dc   : > { %v5472_v27 = vpop.permute.xlu0 %5471  ;;  %v5534_v55 = vpop.permute.xlu1 %5533 }
 0x6dd   : > { %v5493_v61 = vadd.f32 %v5472_v27, %v5445_v12  ;;  %v5683_v40 = vadd.f32 %v5660_v52, %v5635_v9  ;;  %v5556_v32 = vadd.f32 %v5534_v55, %v5508_v43  ;;  %v5566_v55 = vmul.f32 %v9910_v60, %v10639_v13 }
 0x6de   : > { %v5448_v60 = vmul.f32 %v9952_v58, %v10635_v45 }
 0x6df   : > { %v5509_v37 = vadd.f32 %v5501_v2, %v5493_v61  ;;  %v5691_v0 = vadd.f32 %v5683_v40, %v10076_v33  ;;  %v5572_v16 = vadd.f32 %v5564_v4, %v5556_v32 }
 0x6e0   : > { %v5600_v51 = vpop.permute.xlu0 %5599  ;;  %v5662_v18 = vpop.permute.xlu1 %5661 }
 0x6e1   : > { %6733 = vtanh.f32 %v5691_v0  ;;  %v5620_v62 = vadd.f32 %v5598_v14, %v5572_v16 }
 0x6e3   : > { %v5636_v53 = vadd.f32 %v5628_v19, %v5620_v62 }
 0x6e4   : > { %v5536_v11 = vpop.permute.xlu0 %5535  ;;  %v5474_v30 = vpop.permute.xlu1 %5473 }
 0x6e5   : > { %v5557_v17 = vadd.f32 %v5536_v11, %v5509_v37  ;;  %v5684_v56 = vadd.f32 %v5662_v18, %v5636_v53  ;;  %v5494_v23 = vadd.f32 %v5474_v30, %v5446_v3  ;;  %v5567_v18 = vmul.f32 %v9934_v29, %v10636_v21 }
 0x6e6   : > { %v5504_v53 = vmul.f32 %v9980_v50, %v10637_v47  ;;  %v5631_v29 = vmul.f32 %v10001_v31, %v10638_v54 }
 0x6e7   : > { %v5573_v35 = vadd.f32 %v5565_v49, %v5557_v17  ;;  %v5692_v39 = vadd.f32 %v5684_v56, %v10087_v15  ;;  %v5510_v43 = vadd.f32 %v5502_v48, %v5494_v23  ;;  %v5505_v56 = vmul.f32 %v9990_v34, %v10634_v24 }
 0x6e8   : > { %v5664_v52 = vpop.permute.xlu0 %5663  ;;  %v5602_v10 = vpop.permute.xlu1 %5601  ;;  %v5450_v34 = vmul.f32 %v9994_v41, %v10635_v45  ;;  %v5569_v24 = vmul.f32 %v9976_v5, %v10636_v21  ;;  %v5633_v41 = vmul.f32 %v10018_v44, %v10638_v54 }
 0x6e9   : > { %v5621_v14 = vadd.f32 %v5600_v51, %v5573_v35  ;;  %6735 = vtanh.f32 %v5692_v39 }
 0x6eb   : > { %v5637_v20 = vadd.f32 %v5629_v57, %v5621_v14  ;;  %v5568_v57 = vmul.f32 %v9966_v38, %v10639_v13 }
 0x6ec   : > { %v5476_v12 = vpop.permute.xlu0 %5475  ;;  %v5538_v27 = vpop.permute.xlu1 %5537 }
 0x6ed   : > { %v5685_v9 = vadd.f32 %v5664_v52, %v5637_v20  ;;  %v5495_v2 = vadd.f32 %v5476_v12, %v5447_v63  ;;  %v5558_v61 = vadd.f32 %v5538_v27, %v5510_v43  ;;  %v5632_v12 = vmul.f32 %v10029_v36, %v10640_v6 }
 0x6ee   : > { %v6734_v4 = vpop.eup %6733 }
 0x6ef   : > { %v5693_v42 = vadd.f32 %v5685_v9, %v10076_v33  ;;  %v5511_v40 = vadd.f32 %v5503_v7, %v5495_v2  ;;  %v5574_v32 = vadd.f32 %v5566_v55, %v5558_v61  ;;  %5755 = vrot.lane.b32.xlu0 %v6734_v4, %s6994_s16  ;;  %v5506_v7 = vmul.f32 %v10022_v59, %v10637_v47 }
 0x6f0   : > { %v5604_v37 = vpop.permute.xlu0 %5603  ;;  %v5666_v8 = vpop.permute.xlu1 %5665 }
 0x6f1   : > { %6737 = vtanh.f32 %v5693_v42  ;;  %v5622_v0 = vadd.f32 %v5602_v10, %v5574_v32  ;;  %v5570_v32 = vmul.f32 %v10009_v28, %v10639_v13 }
 0x6f3   : > { %v5638_v16 = vadd.f32 %v5630_v25, %v5622_v0  ;;  %v5634_v25 = vmul.f32 %v10038_v22, %v10640_v6 }
 0x6f4   : > { %v5540_v51 = vpop.permute.xlu0 %5539  ;;  %v5478_v62 = vpop.permute.xlu1 %5477 }
 0x6f5   : > { %v5559_v19 = vadd.f32 %v5540_v51, %v5511_v40  ;;  %v5686_v11 = vadd.f32 %v5666_v8, %v5638_v16  ;;  %v5496_v3 = vadd.f32 %v5478_v62, %v5448_v60 }
 0x6f6   : > { %v6736_v49 = vpop.eup %6735 }
 0x6f7   : > { %v5575_v17 = vadd.f32 %v5567_v18, %v5559_v19  ;;  %v5694_v30 = vadd.f32 %v5686_v11, %v10087_v15  ;;  %5757 = vrot.lane.b32.xlu1 %v6736_v49, %s6994_s16  ;;  %v5512_v48 = vadd.f32 %v5504_v53, %v5496_v3 }
 0x6f8   : > { %v5480_v58 = vpop.permute.xlu0 %5479  ;;  %v5606_v50 = vpop.permute.xlu1 %5605 }
 0x6f9   : > { %v5497_v23 = vadd.f32 %v5480_v58, %v5449_v46  ;;  %v5623_v35 = vadd.f32 %v5604_v37, %v5575_v17  ;;  %6739 = vtanh.f32 %v5694_v30  ;;  %v10641_v46 = vld [vmem:[#allocation35_spill] sm:$0xff] }
 0x6fa   : > { %v5739_v30 = vsub.f32 1.0, %v10641_v46 }
 0x6fb   : > { %v5513_v39 = vadd.f32 %v5505_v56, %v5497_v23  ;;  %v5639_v52 = vadd.f32 %v5631_v29, %v5623_v35  ;;  %v10642_v23 = vld [vmem:[#allocation36_spill] sm:$0xff] }
 0x6fc   : > { %v5608_v43 = vpop.permute.xlu0 %5607  ;;  %v5542_v26 = vpop.permute.xlu1 %5541  ;;  %v5740_v35 = vsub.f32 1.0, %v10642_v23 }
 0x6fd   : > { %v5560_v14 = vadd.f32 %v5542_v26, %v5512_v48 }
 0x6fe   : > { %v6738_v1 = vpop.eup %6737 }
 0x6ff   : > { %5759 = vrot.lane.b32.xlu0 %v6738_v1, %s6994_s16  ;;  %v5576_v10 = vadd.f32 %v5568_v57, %v5560_v14  ;;  %v10643_v1 = vld [vmem:[#allocation37_spill] sm:$0xff] }
 0x700   : > { %v5544_v31 = vpop.permute.xlu0 %5543  ;;  %v5482_v63 = vpop.permute.xlu1 %5481  ;;  %v5741_v57 = vsub.f32 1.0, %v10643_v1 }
 0x701   : > { %v5561_v20 = vadd.f32 %v5544_v31, %v5513_v39  ;;  %v5498_v38 = vadd.f32 %v5482_v63, %v5450_v34  ;;  %v5624_v9 = vadd.f32 %v5606_v50, %v5576_v10 }
 0x703   : > { %v5577_v27 = vadd.f32 %v5569_v24, %v5561_v20  ;;  %v5514_v55 = vadd.f32 %v5506_v7, %v5498_v38  ;;  %v5640_v61 = vadd.f32 %v5632_v12, %v5624_v9  ;;  %v10644_v24 = vld [vmem:[#allocation38_spill] sm:$0xff] }
 0x704   : > { %v5668_v2 = vpop.permute.xlu0 %5667  ;;  %v5610_v4 = vpop.permute.xlu1 %5609  ;;  %v5742_v20 = vsub.f32 1.0, %v10644_v24  ;;  %v10645_v9 = vld [vmem:[#allocation42_spill] sm:$0xff] }
 0x705   : > { %v5687_v45 = vadd.f32 %v5668_v2, %v5639_v52  ;;  %v5625_v5 = vadd.f32 %v5608_v43, %v5577_v27  ;;  %v5743_v27 = vsub.f32 1.0, %v10645_v9 }
 0x706   : > { %v6740_v21 = vpop.eup %6739 }
 0x707   : > { %v5695_v42 = vadd.f32 %v5687_v45, %v10076_v33  ;;  %v5641_v40 = vadd.f32 %v5633_v41, %v5625_v5  ;;  %5761 = vrot.lane.b32.xlu1 %v6740_v21, %s6994_s16  ;;  %v10646_v45 = vld [vmem:[#allocation45_spill] sm:$0xff] }
 0x708   : > { %v5672_v36 = vpop.permute.xlu0 %5671  ;;  %v5546_v47 = vpop.permute.xlu1 %5545 }
 0x709   : > { %6741 = vtanh.f32 %v5695_v42  ;;  %v5689_v59 = vadd.f32 %v5672_v36, %v5641_v40  ;;  %v5562_v37 = vadd.f32 %v5546_v47, %v5514_v55  ;;  %v10647_v36 = vld [vmem:[#allocation43_spill] sm:$0xff] }
 0x70b   : > { %v5697_v8 = vadd.f32 %v5689_v59, %v10076_v33  ;;  %v5578_v44 = vadd.f32 %v5570_v32, %v5562_v37  ;;  %v5744_v59 = vsub.f32 1.0, %v10647_v36 }
 0x70c   : > { %v5670_v54 = vpop.permute.xlu1 %5669  ;;  %v5708_v6 = vpop.permute.xlu0 %5707 }
 0x70d   : > { %6743 = vtanh.f32 %v5697_v8  ;;  %v5688_v0 = vadd.f32 %v5670_v54, %v5640_v61  ;;  %v5626_v16 = vadd.f32 %v5610_v4, %v5578_v44  ;;  %v5731_v48 = vmul.f32 %v10641_v46, %v5708_v6  ;;  %v10648_v44 = vld [vmem:[#allocation54_spill] sm:$0xff] }
 0x70e   : > { %v5745_v4 = vsub.f32 1.0, %v10646_v45  ;;  %v5746_v54 = vsub.f32 1.0, %v10648_v44 }
 0x70f   : > { %v5696_v51 = vadd.f32 %v5688_v0, %v10087_v15  ;;  %v5642_v60 = vadd.f32 %v5634_v25, %v5626_v16 }
 0x710   : > { %v5674_v18 = vpop.permute.xlu1 %5673  ;;  %v5712_v53 = vpop.permute.xlu0 %5711 }
 0x711   : > { %6745 = vtanh.f32 %v5696_v51  ;;  %v5690_v19 = vadd.f32 %v5674_v18, %v5642_v60  ;;  %v5733_v10 = vmul.f32 %v10643_v1, %v5712_v53 }
 0x713   : > { %v5698_v62 = vadd.f32 %v5690_v19, %v10087_v15 }
 0x714   : > { %v5710_v11 = vpop.permute.xlu1 %5709  ;;  %v5716_v3 = vpop.permute.xlu0 %5715 }
 0x715   : > { %6747 = vtanh.f32 %v5698_v62  ;;  %v5732_v52 = vmul.f32 %v10642_v23, %v5710_v11  ;;  %v5735_v55 = vmul.f32 %v10645_v9, %v5716_v3 }
 0x716   : > { %v6742_v28 = vpop.eup %6741 }
 0x717   : > { %5763 = vrot.lane.b32.xlu0 %v6742_v28, %s6994_s16 }
 0x718   : > { %v5714_v49 = vpop.permute.xlu1 %5713  ;;  %v5720_v17 = vpop.permute.xlu0 %5719 }
 0x719   : > { %v5734_v12 = vmul.f32 %v10644_v24, %v5714_v49  ;;  %v5737_v21 = vmul.f32 %v10646_v45, %v5720_v17 }
 0x71a   : > { %v6744_v33 = vpop.eup %6743 }
 0x71b   : > { %5767 = vrot.lane.b32.xlu0 %v6744_v33, %s6994_s16 }
 0x71c   : > { %v5718_v15 = vpop.permute.xlu1 %5717 }
 0x71d   : > { %v5736_v32 = vmul.f32 %v10647_v36, %v5718_v15 }
 0x71e   : > { %v6746_v13 = vpop.eup %6745 }
 0x71f   : > { %5765 = vrot.lane.b32.xlu1 %v6746_v13, %s6994_s16 }
 0x720   : > { %v5722_v50 = vpop.permute.xlu1 %5721 }
 0x721   : > { %v5738_v0 = vmul.f32 %v10648_v44, %v5722_v50 }
 0x722   : > { %v6748_v22 = vpop.eup %6747 }
 0x723   : > { %5769 = vrot.lane.b32.xlu1 %v6748_v22, %s6994_s16 }
 0x761   : > { %v5756_v58 = vpop.permute.xlu0 %5755 }
 0x762   : > { %v5779_v29 = vmul.f32 %v5756_v58, %v5739_v30 }
 0x764   : > { %v5787_v56 = vadd.f32 %v5779_v29, %v5731_v48 }
 0x766   : > { %5803 = vrot.lane.b32.xlu0 %v5787_v56, %s6994_s16 }
 0x769   : > { %v5758_v39 = vpop.permute.xlu1 %5757 }
 0x76a   : > { %v5780_v43 = vmul.f32 %v5758_v39, %v5740_v35 }
 0x76c   : > { %v5788_v26 = vadd.f32 %v5780_v43, %v5732_v52 }
 0x76e   : > { %5805 = vrot.lane.b32.xlu1 %v5788_v26, %s6994_s16 }
 0x771   : > { %v5760_v14 = vpop.permute.xlu0 %5759 }
 0x772   : > { %v5781_v31 = vmul.f32 %v5760_v14, %v5741_v57 }
 0x774   : > { %v5789_v34 = vadd.f32 %v5781_v31, %v5733_v10 }
 0x776   : > { %5807 = vrot.lane.b32.xlu0 %v5789_v34, %s6994_s16 }
 0x779   : > { %v5762_v63 = vpop.permute.xlu1 %5761 }
 0x77a   : > { %v5782_v7 = vmul.f32 %v5762_v63, %v5742_v20 }
 0x77c   : > { %v5790_v38 = vadd.f32 %v5782_v7, %v5734_v12 }
 0x77e   : > { %5809 = vrot.lane.b32.xlu1 %v5790_v38, %s6994_s16 }
 0x789   : > { %v5764_v2 = vpop.permute.xlu0 %5763 }
 0x78a   : > { %v5783_v61 = vmul.f32 %v5764_v2, %v5743_v27 }
 0x78c   : > { %v5791_v41 = vadd.f32 %v5783_v61, %v5735_v55 }
 0x78d   : > { %v5768_v5 = vpop.permute.xlu0 %5767 }
 0x78e   : > { %v5785_v42 = vmul.f32 %v5768_v5, %v5745_v4  ;;  %5811 = vrot.lane.b32.xlu0 %v5791_v41, %s6994_s16 }
 0x790   : > { %v5793_v40 = vadd.f32 %v5785_v42, %v5737_v21 }
 0x791   : > { %v5766_v47 = vpop.permute.xlu1 %5765 }
 0x792   : > { %5815 = vrot.lane.b32.xlu0 %v5793_v40, %s6994_s16  ;;  %v5784_v37 = vmul.f32 %v5766_v47, %v5744_v59 }
 0x794   : > { %v5792_v8 = vadd.f32 %v5784_v37, %v5736_v32 }
 0x795   : > { %v5770_v25 = vpop.permute.xlu1 %5769 }
 0x796   : > { %v5786_v16 = vmul.f32 %v5770_v25, %v5746_v54  ;;  %5813 = vrot.lane.b32.xlu1 %v5792_v8, %s6994_s16 }
 0x798   : > { %v5794_v51 = vadd.f32 %v5786_v16, %v5738_v0 }
 0x79a   : > { %5817 = vrot.lane.b32.xlu1 %v5794_v51, %s6994_s16 }
 0x7d8   : > { %v5804_v60 = vpop.permute.xlu0 %5803 }
 0x7d9   : > { %5827 = vst.msk [vmem:[%s486_s28] sm:$0xff] %vm1654_vm1, %v5804_v60 }
 0x7e0   : > { %v5806_v18 = vpop.permute.xlu1 %5805 }
 0x7e1   : > { %5828 = vst.msk [vmem:[%s486_s28 + $0x8] sm:$0xff] %vm1654_vm1, %v5806_v18 }
 0x7e8   : > { %v5808_v19 = vpop.permute.xlu0 %5807 }
 0x7e9   : > { %5829 = vst.msk [vmem:[%s486_s28 + $0x10] sm:$0xff] %vm1654_vm1, %v5808_v19 }
 0x7f0   : > { %v5810_v62 = vpop.permute.xlu1 %5809 }
 0x7f1   : > { %5830 = vst.msk [vmem:[%s486_s28 + $0x18] sm:$0xff] %vm1654_vm1, %v5810_v62 }
 0x800   : > { %v5812_v28 = vpop.permute.xlu0 %5811 }
 0x801   : > { %5831 = vst.msk [vmem:[%s486_s28 + $0x20] sm:$0xff] %vm1654_vm1, %v5812_v28 }
 0x804   : > { %v5816_v33 = vpop.permute.xlu0 %5815 }
 0x805   : > { %5833 = vst.msk [vmem:[%s486_s28 + $0x30] sm:$0xff] %vm1654_vm1, %v5816_v33 }
 0x808   : > { %v5814_v13 = vpop.permute.xlu1 %5813 }
 0x809   : > { %5832 = vst.msk [vmem:[%s486_s28 + $0x28] sm:$0xff] %vm1654_vm1, %v5814_v13 }
 0x80c   : > { %v5818_v22 = vpop.permute.xlu1 %5817 }
 0x80d   : > { %5834 = vst.msk [vmem:[%s486_s28 + $0x38] sm:$0xff] %vm1654_vm1, %v5818_v22 }
 0x80e   : > { %6915 = shalt.err (!%p6912_p5)
}
 0x80f   : > { %s6916_s10 = scalar_lea.hbm %s10182_s30, 1024  ;;  %s6920_s19 = scalar_lea.hbm %s10649_s26, 2048 }
 0x810   : > { %p6917_p12 = scmp.ne.s32.totalorder %s10182_s30, %s6916_s10  ;;  %p6921_p4 = scmp.lt.s32.totalorder %s10182_s30, %s10649_s26 }
 0x811   : > { %p6922_p6 = scmp.lt.s32.totalorder %s6920_s19, %s6916_s10 }
 0x812   : > { %p6918_p13 = pnand %p6917_p12, %p10650_p7 }
 0x813   : > { %p6923_p0 = por %p6922_p6, %p6921_p4 }
 0x814   : > { %p6919_p11 = pneg %p6918_p13 }
 0x816   : > { %p6924_p2 = pnand %p6923_p0, %p6919_p11 }
 0x818   : > { %6927 = shalt.err (!%p6924_p2)
}
 0x819   : > { %s6996_s13 = smov 128   ;;  %s6997_s16 = smov 8  }
 0x81a   : > { %6577 = dma.vmem_to_hbm [thread:$0]  (%p10650_p7), %s10176_s21, 1024, %s10182_s30, %s5836_s27, %s6996_s13, %s6996_s13, %s6997_s16  }
 0x81b PF: > { %s10651_s28 = sld [smem:[#allocation16_spill]] }
 0x81c   : > { %s10652_s22 = sld [smem:[#allocation20_spill]] }
 0x81d   : > { %s10653_s11 = sld [smem:[#allocation17_spill]] }
 0x821   : > { %s5865_s29 = sand.u32 1, %s10651_s28  }
 0x822   : > { %p10654_p1 = scmp.ne.s32.totalorder %s10652_s22, 0  ;;  %s5866_s23 = scalar_lea.sflag [#allocation4], %s5865_s29 }
 0x823   : > { %p10655_p3 = scmp.ge.s32.totalorder %s10653_s11, 2 }
 0x825   : > { %p6597_p8 = pnand %p10655_p3, %p10654_p1 }
 0x827   : > { %p6598_p9 = pneg %p6597_p8 }
 0x829   : > { %6957 = dma.done.wait (%p6598_p9), %s5866_s23, 1024  }
 0x82a   : > { %6959 = vsyncadd (%p6598_p9), %s5866_s23, 4294966272  ;;  %s10656_s16 = sld [smem:[#allocation18_spill]]  ;;  %s10658_s13 = smov %s6966_s14 }
 0x82b   : > { %s10657_s17 = sld [smem:[#allocation19_spill]]  ;;  %s10659_s14 = smov %s6970_s15 }
 0x830   : > { %p27_p10 = scmp.ge.s32.totalorder %s10656_s16, 4  }
 0x831   : > { %s10660_s15 = smov %s10657_s17 }
 0x832   :  { %29 = sbr.rel (!%p27_p10) target bundleno = 13 (0xd), region = 141 }
 0x837   :  { %5871 = vsyncpa [#allocation3], 1 }
 0x838   :  { %5873 = vsyncpa [#allocation3 + $0x1], 1 }
 0x839   :  { %5874 = vsyncpa [#allocation6], 1 }
 0x83a   :  { %5876 = vsyncpa [#allocation6 + $0x1], 1 }
 0x83b   :  { %5877 = vsyncpa [#allocation9], 1 }
 0x83c   :  { %5878 = vsyncpa [#allocation4], 1 }
 0x83d   :  { %5880 = vsyncpa [#allocation4 + $0x1], 1 }

</bundles_post_ra>
